<compile_context>
chip_gen: v7x
topology: tpu7x:2x2x1
jax: 0.10.0
libtpu: 0.0.40
codegen_flags: <defaults>
</compile_context>

<pallas_src>
import functools

import jax
import jax.numpy as jnp
from jax.experimental import pallas as pl
from jax.experimental.pallas import tpu as pltpu

_LANE = 128


def _round_up(x, m):
    return (x + m - 1) // m * m


def _pad_axis(a, axis, new_size):
    pads = [(0, 0)] * a.ndim
    pads[axis] = (0, new_size - a.shape[axis])
    return jnp.pad(a, pads)


# --------------------------------------------------------------------------- kernel

def _basic_block_kernel(*refs, Ho, Wo, stride, pad, has_ds):
    """One batch element per grid step: conv1+ReLU -> conv2 -> +identity -> ReLU."""
    if has_ds:
        xph, w1, b1, w2, b2, wd, bd, o_ref, hpad = refs
    else:
        xph, w1, b1, w2, b2, o_ref, hpad = refs

    cin_p = xph.shape[-1]
    c1_p = w1.shape[-1]
    c2_p = w2.shape[-1]
    m = Ho * Wo
    f32 = jnp.float32

    # ---- conv1: 3x3 / stride / pad=1.  Bias folded into the accumulator init. ----
    acc1 = b1[...]                                    # (1, c1_p) f32, broadcasts
    for t in range(9):
        i, j = divmod(t, 3)
        phase = (i % stride) * stride + (j % stride)
        tap = xph[phase, pl.ds(i // stride, Ho), pl.ds(j // stride, Wo), :]
        acc1 = acc1 + jnp.dot(tap.reshape(m, cin_p), w1[t],
                              preferred_element_type=f32)
    h = jnp.maximum(acc1, 0.0)

    # ---- stage conv1 activation in a zero-haloed VMEM scratch (halo for conv2) ----
    hpad[...] = jnp.zeros(hpad.shape, hpad.dtype)
    hpad[pl.ds(1, Ho), pl.ds(1, Wo), :] = h.reshape(Ho, Wo, c1_p)

    # ---- conv2: 3x3 / stride 1 / pad=1 ----
    acc2 = b2[...]
    for t in range(9):
        i, j = divmod(t, 3)
        tap = hpad[pl.ds(i, Ho), pl.ds(j, Wo), :].astype(jnp.bfloat16)
        acc2 = acc2 + jnp.dot(tap.reshape(m, c1_p), w2[t],
                              preferred_element_type=f32)

    # ---- residual path: identity or 1x1-conv (stride) downsample ----
    src = xph[(pad % stride) * stride + (pad % stride),
              pl.ds(pad // stride, Ho), pl.ds(pad // stride, Wo), :]
    src = src.reshape(m, cin_p)
    if has_ds:
        identity = jnp.dot(src, wd[...], preferred_element_type=f32) + bd[...]
    else:
        identity = src.astype(f32)

    o_ref[0] = jnp.maximum(acc2 + identity, 0.0).reshape(Ho, Wo, c2_p)


# --------------------------------------------------------------------------- wrapper

def basic_block_forward(x_nchw, params, *, stride=1):
    """Forward of BasicBlock_ACPR_merge_bn_v1. NCHW in / NCHW out, f32."""
    w1, b1 = params["w1"], params["b1"]          # torch layouts: (C1,Cin,3,3), (C1,)
    w2, b2 = params["w2"], params["b2"]          # (C2,C1,3,3), (C2,)
    wd = params.get("wd")                        # optional downsample: (C2,Cin,1,1)
    bd = params.get("bd")
    has_ds = wd is not None

    B, Cin, H, W = x_nchw.shape
    C1, C2 = w1.shape[0], w2.shape[0]
    if not has_ds and (stride != 1 or Cin != C2):
        raise ValueError("identity residual needs stride=1 and matching channels")

    pad = 1
    Ho = (H + 2 * pad - 3) // stride + 1
    Wo = (W + 2 * pad - 3) // stride + 1
    cin_p = _round_up(Cin, _LANE)
    c1_p = _round_up(C1, _LANE)
    c2_p = _round_up(C2, _LANE)

    # Activations: NCHW -> NHWC, lane-pad channels, spatial halo pad, then a
    # space-to-depth phase decomposition by `stride` so every conv tap is a
    # contiguous window inside the kernel (no im2col materialization), bf16.
    x = jnp.transpose(x_nchw, (0, 2, 3, 1))
    x = _pad_axis(x, 3, cin_p)
    xp = jnp.pad(x, ((0, 0), (pad, pad), (pad, pad), (0, 0)))
    hp = _round_up(H + 2 * pad, stride)
    wp = _round_up(W + 2 * pad, stride)
    xp = jnp.pad(xp, ((0, 0), (0, hp - (H + 2 * pad)), (0, wp - (W + 2 * pad)), (0, 0)))
    hs, ws = hp // stride, wp // stride
    ph = xp.reshape(B, hs, stride, ws, stride, cin_p)
    ph = jnp.transpose(ph, (0, 2, 4, 1, 3, 5))
    ph = ph.reshape(B * stride * stride, hs, ws, cin_p).astype(jnp.bfloat16)

    # Weights: torch OIHW -> (kh*kw, Ipad, Opad) bf16; biases -> (1, Opad) f32.
    def prep3x3(w, ip, op):
        w = jnp.transpose(w, (2, 3, 1, 0))                 # (3,3,I,O)
        w = _pad_axis(_pad_axis(w, 2, ip), 3, op)
        return w.reshape(9, ip, op).astype(jnp.bfloat16)

    w1p = prep3x3(w1, cin_p, c1_p)
    w2p = prep3x3(w2, c1_p, c2_p)
    b1p = _pad_axis(b1.astype(jnp.float32), 0, c1_p).reshape(1, c1_p)
    b2p = _pad_axis(b2.astype(jnp.float32), 0, c2_p).reshape(1, c2_p)

    inputs = [ph, w1p, b1p, w2p, b2p]
    in_specs = [
        pl.BlockSpec((stride * stride, hs, ws, cin_p), lambda b: (b, 0, 0, 0)),
        pl.BlockSpec((9, cin_p, c1_p), lambda b: (0, 0, 0)),
        pl.BlockSpec((1, c1_p), lambda b: (0, 0)),
        pl.BlockSpec((9, c1_p, c2_p), lambda b: (0, 0, 0)),
        pl.BlockSpec((1, c2_p), lambda b: (0, 0)),
    ]
    if has_ds:
        wdp = jnp.transpose(wd[:, :, 0, 0], (1, 0))        # (Cin, C2)
        wdp = _pad_axis(_pad_axis(wdp, 0, cin_p), 1, c2_p).astype(jnp.bfloat16)
        bdp = _pad_axis(bd.astype(jnp.float32), 0, c2_p).reshape(1, c2_p)
        inputs += [wdp, bdp]
        in_specs += [pl.BlockSpec((cin_p, c2_p), lambda b: (0, 0)),
                     pl.BlockSpec((1, c2_p), lambda b: (0, 0))]

    kernel = functools.partial(_basic_block_kernel, Ho=Ho, Wo=Wo,
                               stride=stride, pad=pad, has_ds=has_ds)
    out = pl.pallas_call(
        kernel,
        out_shape=jax.ShapeDtypeStruct((B, Ho, Wo, c2_p), jnp.float32),
        grid=(B,),
        in_specs=in_specs,
        out_specs=pl.BlockSpec((1, Ho, Wo, c2_p), lambda b: (b, 0, 0, 0)),
        scratch_shapes=[pltpu.VMEM((Ho + 2, Wo + 2, c1_p), jnp.float32)],
        compiler_params=pltpu.CompilerParams(dimension_semantics=("parallel",)),
    )(*inputs)

    return jnp.transpose(out[:, :, :, :C2], (0, 3, 1, 2))


# --------------------------------------------------------------------------- reference

def basic_block_reference(x_nchw, params, *, stride=1):
    """Pure-JAX reference with matching numerics (bf16 MXU inputs, f32 accumulation)."""
    w1, b1 = params["w1"], params["b1"]
    w2, b2 = params["w2"], params["b2"]
    wd, bd = params.get("wd"), params.get("bd")
    dn = ("NHWC", "HWIO", "NHWC")

    def conv(inp, w, s, p):
        w = jnp.transpose(w, (2, 3, 1, 0)).astype(jnp.bfloat16)
        return jax.lax.conv_general_dilated(
            inp, w, (s, s), [(p, p), (p, p)], dimension_numbers=dn,
            preferred_element_type=jnp.float32)

    x = jnp.transpose(x_nchw, (0, 2, 3, 1)).astype(jnp.bfloat16)
    h = jax.nn.relu(conv(x, w1, stride, 1) + b1)
    out = conv(h.astype(jnp.bfloat16), w2, 1, 1) + b2
    if wd is not None:
        identity = conv(x, wd, stride, 0) + bd
    else:
        identity = x.astype(jnp.float32)
    out = jax.nn.relu(out + identity)
    return jnp.transpose(out, (0, 3, 1, 2))


# --------------------------------------------------------------------------- main

if __name__ == "__main__":
    key = jax.random.PRNGKey(0)
    ks = jax.random.split(key, 6)

    B, Cin, H, W = 2, 16, 16, 16
    x = jax.random.normal(ks[0], (B, Cin, H, W), jnp.float32)

    # Case A: default module config (stride=1, downsample=None, planes == inplanes).
    params_a = {
        "w1": 0.1 * jax.random.normal(ks[1], (Cin, Cin, 3, 3), jnp.float32),
        "b1": 0.1 * jax.random.normal(ks[2], (Cin,), jnp.float32),
        "w2": 0.1 * jax.random.normal(ks[3], (Cin, Cin, 3, 3), jnp.float32),
        "b2": 0.1 * jax.random.normal(ks[4], (Cin,), jnp.float32),
    }

    # Case B: stride=2 with a merged-BN 1x1-conv (bias=True) downsample.
    C1b, C2b = 24, 32
    kb = jax.random.split(ks[5], 6)
    params_b = {
        "w1": 0.1 * jax.random.normal(kb[0], (C1b, Cin, 3, 3), jnp.float32),
        "b1": 0.1 * jax.random.normal(kb[1], (C1b,), jnp.float32),
        "w2": 0.1 * jax.random.normal(kb[2], (C2b, C1b, 3, 3), jnp.float32),
        "b2": 0.1 * jax.random.normal(kb[3], (C2b,), jnp.float32),
        "wd": 0.1 * jax.random.normal(kb[4], (C2b, Cin, 1, 1), jnp.float32),
        "bd": 0.1 * jax.random.normal(kb[5], (C2b,), jnp.float32),
    }

    fwd = jax.jit(basic_block_forward, static_argnames=("stride",))

    out_a = fwd(x, params_a, stride=1)
    jax.block_until_ready(out_a)
    assert out_a.shape == (B, Cin, H, W)
    ref_a = basic_block_reference(x, params_a, stride=1)
    err_a = float(jnp.max(jnp.abs(out_a - ref_a)))
    assert err_a < 5e-2, f"case A mismatch: {err_a}"

    out_b = fwd(x, params_b, stride=2)
    jax.block_until_ready(out_b)
    assert out_b.shape == (B, C2b, H // 2, W // 2)
    ref_b = basic_block_reference(x, params_b, stride=2)
    err_b = float(jnp.max(jnp.abs(out_b - ref_b)))
    assert err_b < 5e-2, f"case B mismatch: {err_b}"

    print("KERNEL_OK")
</pallas_src>

<mosaic_0001>
module attributes {stable_mosaic.version = 11 : i64} {
  func.func @_basic_block_kernel(%arg0: i32, %arg1: memref<1x18x18x128xbf16, #tpu.memory_space<vmem>>, %arg2: memref<9x128x128xbf16, #tpu.memory_space<vmem>>, %arg3: memref<1x128xf32, #tpu.memory_space<vmem>>, %arg4: memref<9x128x128xbf16, #tpu.memory_space<vmem>>, %arg5: memref<1x128xf32, #tpu.memory_space<vmem>>, %arg6: memref<1x16x16x128xf32, #tpu.memory_space<vmem>>, %arg7: memref<18x18x128xf32, #tpu.memory_space<vmem>>) attributes {dimension_semantics = [#tpu.dimension_semantics<parallel>], iteration_bounds = array<i64: 2>, scalar_prefetch = 0 : i64, scratch_operands = 1 : i64, tpu.core_type = #tpu.core_type<tc>, window_params = [{transform_indices = @transform_0, window_bounds = array<i64: 1, 18, 18, 128>}, {pipeline_mode = #tpu.pipeline_mode<synchronous>, transform_indices = @transform_1, window_bounds = array<i64: 9, 128, 128>}, {pipeline_mode = #tpu.pipeline_mode<synchronous>, transform_indices = @transform_2, window_bounds = array<i64: 1, 128>}, {pipeline_mode = #tpu.pipeline_mode<synchronous>, transform_indices = @transform_3, window_bounds = array<i64: 9, 128, 128>}, {pipeline_mode = #tpu.pipeline_mode<synchronous>, transform_indices = @transform_4, window_bounds = array<i64: 1, 128>}, {transform_indices = @transform_5, window_bounds = array<i64: 1, 16, 16, 128>}]} {
    %c0 = arith.constant 0 : index
    %c0_0 = arith.constant 0 : index
    %0 = vector.load %arg3[%c0, %c0_0] : memref<1x128xf32, #tpu.memory_space<vmem>>, vector<1x128xf32>
    %c0_1 = arith.constant 0 : index
    %c0_2 = arith.constant 0 : index
    %c0_3 = arith.constant 0 : index
    %c0_4 = arith.constant 0 : index
    %1 = vector.load %arg1[%c0_1, %c0_2, %c0_3, %c0_4] : memref<1x18x18x128xbf16, #tpu.memory_space<vmem>>, vector<1x16x16x128xbf16>
    %2 = vector.shape_cast %1 : vector<1x16x16x128xbf16> to vector<16x16x128xbf16>
    %3 = vector.shape_cast %2 : vector<16x16x128xbf16> to vector<256x128xbf16>
    %c0_5 = arith.constant 0 : index
    %c0_6 = arith.constant 0 : index
    %c0_7 = arith.constant 0 : index
    %4 = vector.load %arg2[%c0_5, %c0_6, %c0_7] : memref<9x128x128xbf16, #tpu.memory_space<vmem>>, vector<1x128x128xbf16>
    %5 = vector.shape_cast %4 : vector<1x128x128xbf16> to vector<128x128xbf16>
    %cst = arith.constant dense<0.000000e+00> : vector<256x128xf32>
    %6 = tpu.matmul %3, %5, %cst {dimension_numbers = #tpu.dot_dimension_numbers<[1], [0], [0], [1], [0, 0, 1, 1], [], []>} : vector<256x128xbf16>, vector<128x128xbf16>, vector<256x128xf32> -> vector<256x128xf32>
    %7 = vector.broadcast %0 : vector<1x128xf32> to vector<256x128xf32>
    %8 = arith.addf %7, %6 : vector<256x128xf32>
    %c0_8 = arith.constant 0 : index
    %c0_9 = arith.constant 0 : index
    %c1 = arith.constant 1 : index
    %c0_10 = arith.constant 0 : index
    %9 = vector.load %arg1[%c0_8, %c0_9, %c1, %c0_10] : memref<1x18x18x128xbf16, #tpu.memory_space<vmem>>, vector<1x16x16x128xbf16>
    %10 = vector.shape_cast %9 : vector<1x16x16x128xbf16> to vector<16x16x128xbf16>
    %11 = vector.shape_cast %10 : vector<16x16x128xbf16> to vector<256x128xbf16>
    %c1_11 = arith.constant 1 : index
    %c0_12 = arith.constant 0 : index
    %c0_13 = arith.constant 0 : index
    %12 = vector.load %arg2[%c1_11, %c0_12, %c0_13] : memref<9x128x128xbf16, #tpu.memory_space<vmem>>, vector<1x128x128xbf16>
    %13 = vector.shape_cast %12 : vector<1x128x128xbf16> to vector<128x128xbf16>
    %cst_14 = arith.constant dense<0.000000e+00> : vector<256x128xf32>
    %14 = tpu.matmul %11, %13, %cst_14 {dimension_numbers = #tpu.dot_dimension_numbers<[1], [0], [0], [1], [0, 0, 1, 1], [], []>} : vector<256x128xbf16>, vector<128x128xbf16>, vector<256x128xf32> -> vector<256x128xf32>
    %15 = arith.addf %8, %14 : vector<256x128xf32>
    %c0_15 = arith.constant 0 : index
    %c0_16 = arith.constant 0 : index
    %c2 = arith.constant 2 : index
    %c0_17 = arith.constant 0 : index
    %16 = vector.load %arg1[%c0_15, %c0_16, %c2, %c0_17] : memref<1x18x18x128xbf16, #tpu.memory_space<vmem>>, vector<1x16x16x128xbf16>
    %17 = vector.shape_cast %16 : vector<1x16x16x128xbf16> to vector<16x16x128xbf16>
    %18 = vector.shape_cast %17 : vector<16x16x128xbf16> to vector<256x128xbf16>
    %c2_18 = arith.constant 2 : index
    %c0_19 = arith.constant 0 : index
    %c0_20 = arith.constant 0 : index
    %19 = vector.load %arg2[%c2_18, %c0_19, %c0_20] : memref<9x128x128xbf16, #tpu.memory_space<vmem>>, vector<1x128x128xbf16>
    %20 = vector.shape_cast %19 : vector<1x128x128xbf16> to vector<128x128xbf16>
    %cst_21 = arith.constant dense<0.000000e+00> : vector<256x128xf32>
    %21 = tpu.matmul %18, %20, %cst_21 {dimension_numbers = #tpu.dot_dimension_numbers<[1], [0], [0], [1], [0, 0, 1, 1], [], []>} : vector<256x128xbf16>, vector<128x128xbf16>, vector<256x128xf32> -> vector<256x128xf32>
    %22 = arith.addf %15, %21 : vector<256x128xf32>
    %c0_22 = arith.constant 0 : index
    %c1_23 = arith.constant 1 : index
    %c0_24 = arith.constant 0 : index
    %c0_25 = arith.constant 0 : index
    %23 = vector.load %arg1[%c0_22, %c1_23, %c0_24, %c0_25] : memref<1x18x18x128xbf16, #tpu.memory_space<vmem>>, vector<1x16x16x128xbf16>
    %24 = vector.shape_cast %23 : vector<1x16x16x128xbf16> to vector<16x16x128xbf16>
    %25 = vector.shape_cast %24 : vector<16x16x128xbf16> to vector<256x128xbf16>
    %c3 = arith.constant 3 : index
    %c0_26 = arith.constant 0 : index
    %c0_27 = arith.constant 0 : index
    %26 = vector.load %arg2[%c3, %c0_26, %c0_27] : memref<9x128x128xbf16, #tpu.memory_space<vmem>>, vector<1x128x128xbf16>
    %27 = vector.shape_cast %26 : vector<1x128x128xbf16> to vector<128x128xbf16>
    %cst_28 = arith.constant dense<0.000000e+00> : vector<256x128xf32>
    %28 = tpu.matmul %25, %27, %cst_28 {dimension_numbers = #tpu.dot_dimension_numbers<[1], [0], [0], [1], [0, 0, 1, 1], [], []>} : vector<256x128xbf16>, vector<128x128xbf16>, vector<256x128xf32> -> vector<256x128xf32>
    %29 = arith.addf %22, %28 : vector<256x128xf32>
    %c0_29 = arith.constant 0 : index
    %c1_30 = arith.constant 1 : index
    %c1_31 = arith.constant 1 : index
    %c0_32 = arith.constant 0 : index
    %30 = vector.load %arg1[%c0_29, %c1_30, %c1_31, %c0_32] : memref<1x18x18x128xbf16, #tpu.memory_space<vmem>>, vector<1x16x16x128xbf16>
    %31 = vector.shape_cast %30 : vector<1x16x16x128xbf16> to vector<16x16x128xbf16>
    %32 = vector.shape_cast %31 : vector<16x16x128xbf16> to vector<256x128xbf16>
    %c4 = arith.constant 4 : index
    %c0_33 = arith.constant 0 : index
    %c0_34 = arith.constant 0 : index
    %33 = vector.load %arg2[%c4, %c0_33, %c0_34] : memref<9x128x128xbf16, #tpu.memory_space<vmem>>, vector<1x128x128xbf16>
    %34 = vector.shape_cast %33 : vector<1x128x128xbf16> to vector<128x128xbf16>
    %cst_35 = arith.constant dense<0.000000e+00> : vector<256x128xf32>
    %35 = tpu.matmul %32, %34, %cst_35 {dimension_numbers = #tpu.dot_dimension_numbers<[1], [0], [0], [1], [0, 0, 1, 1], [], []>} : vector<256x128xbf16>, vector<128x128xbf16>, vector<256x128xf32> -> vector<256x128xf32>
    %36 = arith.addf %29, %35 : vector<256x128xf32>
    %c0_36 = arith.constant 0 : index
    %c1_37 = arith.constant 1 : index
    %c2_38 = arith.constant 2 : index
    %c0_39 = arith.constant 0 : index
    %37 = vector.load %arg1[%c0_36, %c1_37, %c2_38, %c0_39] : memref<1x18x18x128xbf16, #tpu.memory_space<vmem>>, vector<1x16x16x128xbf16>
    %38 = vector.shape_cast %37 : vector<1x16x16x128xbf16> to vector<16x16x128xbf16>
    %39 = vector.shape_cast %38 : vector<16x16x128xbf16> to vector<256x128xbf16>
    %c5 = arith.constant 5 : index
    %c0_40 = arith.constant 0 : index
    %c0_41 = arith.constant 0 : index
    %40 = vector.load %arg2[%c5, %c0_40, %c0_41] : memref<9x128x128xbf16, #tpu.memory_space<vmem>>, vector<1x128x128xbf16>
    %41 = vector.shape_cast %40 : vector<1x128x128xbf16> to vector<128x128xbf16>
    %cst_42 = arith.constant dense<0.000000e+00> : vector<256x128xf32>
    %42 = tpu.matmul %39, %41, %cst_42 {dimension_numbers = #tpu.dot_dimension_numbers<[1], [0], [0], [1], [0, 0, 1, 1], [], []>} : vector<256x128xbf16>, vector<128x128xbf16>, vector<256x128xf32> -> vector<256x128xf32>
    %43 = arith.addf %36, %42 : vector<256x128xf32>
    %c0_43 = arith.constant 0 : index
    %c2_44 = arith.constant 2 : index
    %c0_45 = arith.constant 0 : index
    %c0_46 = arith.constant 0 : index
    %44 = vector.load %arg1[%c0_43, %c2_44, %c0_45, %c0_46] : memref<1x18x18x128xbf16, #tpu.memory_space<vmem>>, vector<1x16x16x128xbf16>
    %45 = vector.shape_cast %44 : vector<1x16x16x128xbf16> to vector<16x16x128xbf16>
    %46 = vector.shape_cast %45 : vector<16x16x128xbf16> to vector<256x128xbf16>
    %c6 = arith.constant 6 : index
    %c0_47 = arith.constant 0 : index
    %c0_48 = arith.constant 0 : index
    %47 = vector.load %arg2[%c6, %c0_47, %c0_48] : memref<9x128x128xbf16, #tpu.memory_space<vmem>>, vector<1x128x128xbf16>
    %48 = vector.shape_cast %47 : vector<1x128x128xbf16> to vector<128x128xbf16>
    %cst_49 = arith.constant dense<0.000000e+00> : vector<256x128xf32>
    %49 = tpu.matmul %46, %48, %cst_49 {dimension_numbers = #tpu.dot_dimension_numbers<[1], [0], [0], [1], [0, 0, 1, 1], [], []>} : vector<256x128xbf16>, vector<128x128xbf16>, vector<256x128xf32> -> vector<256x128xf32>
    %50 = arith.addf %43, %49 : vector<256x128xf32>
    %c0_50 = arith.constant 0 : index
    %c2_51 = arith.constant 2 : index
    %c1_52 = arith.constant 1 : index
    %c0_53 = arith.constant 0 : index
    %51 = vector.load %arg1[%c0_50, %c2_51, %c1_52, %c0_53] : memref<1x18x18x128xbf16, #tpu.memory_space<vmem>>, vector<1x16x16x128xbf16>
    %52 = vector.shape_cast %51 : vector<1x16x16x128xbf16> to vector<16x16x128xbf16>
    %53 = vector.shape_cast %52 : vector<16x16x128xbf16> to vector<256x128xbf16>
    %c7 = arith.constant 7 : index
    %c0_54 = arith.constant 0 : index
    %c0_55 = arith.constant 0 : index
    %54 = vector.load %arg2[%c7, %c0_54, %c0_55] : memref<9x128x128xbf16, #tpu.memory_space<vmem>>, vector<1x128x128xbf16>
    %55 = vector.shape_cast %54 : vector<1x128x128xbf16> to vector<128x128xbf16>
    %cst_56 = arith.constant dense<0.000000e+00> : vector<256x128xf32>
    %56 = tpu.matmul %53, %55, %cst_56 {dimension_numbers = #tpu.dot_dimension_numbers<[1], [0], [0], [1], [0, 0, 1, 1], [], []>} : vector<256x128xbf16>, vector<128x128xbf16>, vector<256x128xf32> -> vector<256x128xf32>
    %57 = arith.addf %50, %56 : vector<256x128xf32>
    %c0_57 = arith.constant 0 : index
    %c2_58 = arith.constant 2 : index
    %c2_59 = arith.constant 2 : index
    %c0_60 = arith.constant 0 : index
    %58 = vector.load %arg1[%c0_57, %c2_58, %c2_59, %c0_60] : memref<1x18x18x128xbf16, #tpu.memory_space<vmem>>, vector<1x16x16x128xbf16>
    %59 = vector.shape_cast %58 : vector<1x16x16x128xbf16> to vector<16x16x128xbf16>
    %60 = vector.shape_cast %59 : vector<16x16x128xbf16> to vector<256x128xbf16>
    %c8 = arith.constant 8 : index
    %c0_61 = arith.constant 0 : index
    %c0_62 = arith.constant 0 : index
    %61 = vector.load %arg2[%c8, %c0_61, %c0_62] : memref<9x128x128xbf16, #tpu.memory_space<vmem>>, vector<1x128x128xbf16>
    %62 = vector.shape_cast %61 : vector<1x128x128xbf16> to vector<128x128xbf16>
    %cst_63 = arith.constant dense<0.000000e+00> : vector<256x128xf32>
    %63 = tpu.matmul %60, %62, %cst_63 {dimension_numbers = #tpu.dot_dimension_numbers<[1], [0], [0], [1], [0, 0, 1, 1], [], []>} : vector<256x128xbf16>, vector<128x128xbf16>, vector<256x128xf32> -> vector<256x128xf32>
    %64 = arith.addf %57, %63 : vector<256x128xf32>
    %cst_64 = arith.constant 0.000000e+00 : f32
    %65 = vector.broadcast %cst_64 : f32 to vector<256x128xf32>
    %66 = arith.maximumf %64, %65 : vector<256x128xf32>
    %cst_65 = arith.constant 0.000000e+00 : f32
    %67 = vector.broadcast %cst_65 : f32 to vector<18x18x128xf32>
    %c0_66 = arith.constant 0 : index
    %c0_67 = arith.constant 0 : index
    %c0_68 = arith.constant 0 : index
    %68 = vector.load %arg7[%c0_66, %c0_67, %c0_68] : memref<18x18x128xf32, #tpu.memory_space<vmem>>, vector<18x18x128xf32>
    tpu.vector_store %arg7[%c0_66, %c0_67, %c0_68], %67 {strides = array<i32>} : memref<18x18x128xf32, #tpu.memory_space<vmem>>, vector<18x18x128xf32>,
    %69 = vector.shape_cast %66 : vector<256x128xf32> to vector<16x16x128xf32>
    %c1_69 = arith.constant 1 : index
    %c1_70 = arith.constant 1 : index
    %c0_71 = arith.constant 0 : index
    %70 = vector.load %arg7[%c1_69, %c1_70, %c0_71] : memref<18x18x128xf32, #tpu.memory_space<vmem>>, vector<16x16x128xf32>
    tpu.vector_store %arg7[%c1_69, %c1_70, %c0_71], %69 {strides = array<i32>} : memref<18x18x128xf32, #tpu.memory_space<vmem>>, vector<16x16x128xf32>,
    %c0_72 = arith.constant 0 : index
    %c0_73 = arith.constant 0 : index
    %71 = vector.load %arg5[%c0_72, %c0_73] : memref<1x128xf32, #tpu.memory_space<vmem>>, vector<1x128xf32>
    %c0_74 = arith.constant 0 : index
    %c0_75 = arith.constant 0 : index
    %c0_76 = arith.constant 0 : index
    %72 = vector.load %arg7[%c0_74, %c0_75, %c0_76] : memref<18x18x128xf32, #tpu.memory_space<vmem>>, vector<16x16x128xf32>
    %73 = arith.truncf %72 : vector<16x16x128xf32> to vector<16x16x128xbf16>
    %74 = vector.shape_cast %73 : vector<16x16x128xbf16> to vector<256x128xbf16>
    %c0_77 = arith.constant 0 : index
    %c0_78 = arith.constant 0 : index
    %c0_79 = arith.constant 0 : index
    %75 = vector.load %arg4[%c0_77, %c0_78, %c0_79] : memref<9x128x128xbf16, #tpu.memory_space<vmem>>, vector<1x128x128xbf16>
    %76 = vector.shape_cast %75 : vector<1x128x128xbf16> to vector<128x128xbf16>
    %cst_80 = arith.constant dense<0.000000e+00> : vector<256x128xf32>
    %77 = tpu.matmul %74, %76, %cst_80 {dimension_numbers = #tpu.dot_dimension_numbers<[1], [0], [0], [1], [0, 0, 1, 1], [], []>} : vector<256x128xbf16>, vector<128x128xbf16>, vector<256x128xf32> -> vector<256x128xf32>
    %78 = vector.broadcast %71 : vector<1x128xf32> to vector<256x128xf32>
    %79 = arith.addf %78, %77 : vector<256x128xf32>
    %c0_81 = arith.constant 0 : index
    %c1_82 = arith.constant 1 : index
    %c0_83 = arith.constant 0 : index
    %80 = vector.load %arg7[%c0_81, %c1_82, %c0_83] : memref<18x18x128xf32, #tpu.memory_space<vmem>>, vector<16x16x128xf32>
    %81 = arith.truncf %80 : vector<16x16x128xf32> to vector<16x16x128xbf16>
    %82 = vector.shape_cast %81 : vector<16x16x128xbf16> to vector<256x128xbf16>
    %c1_84 = arith.constant 1 : index
    %c0_85 = arith.constant 0 : index
    %c0_86 = arith.constant 0 : index
    %83 = vector.load %arg4[%c1_84, %c0_85, %c0_86] : memref<9x128x128xbf16, #tpu.memory_space<vmem>>, vector<1x128x128xbf16>
    %84 = vector.shape_cast %83 : vector<1x128x128xbf16> to vector<128x128xbf16>
    %cst_87 = arith.constant dense<0.000000e+00> : vector<256x128xf32>
    %85 = tpu.matmul %82, %84, %cst_87 {dimension_numbers = #tpu.dot_dimension_numbers<[1], [0], [0], [1], [0, 0, 1, 1], [], []>} : vector<256x128xbf16>, vector<128x128xbf16>, vector<256x128xf32> -> vector<256x128xf32>
    %86 = arith.addf %79, %85 : vector<256x128xf32>
    %c0_88 = arith.constant 0 : index
    %c2_89 = arith.constant 2 : index
    %c0_90 = arith.constant 0 : index
    %87 = vector.load %arg7[%c0_88, %c2_89, %c0_90] : memref<18x18x128xf32, #tpu.memory_space<vmem>>, vector<16x16x128xf32>
    %88 = arith.truncf %87 : vector<16x16x128xf32> to vector<16x16x128xbf16>
    %89 = vector.shape_cast %88 : vector<16x16x128xbf16> to vector<256x128xbf16>
    %c2_91 = arith.constant 2 : index
    %c0_92 = arith.constant 0 : index
    %c0_93 = arith.constant 0 : index
    %90 = vector.load %arg4[%c2_91, %c0_92, %c0_93] : memref<9x128x128xbf16, #tpu.memory_space<vmem>>, vector<1x128x128xbf16>
    %91 = vector.shape_cast %90 : vector<1x128x128xbf16> to vector<128x128xbf16>
    %cst_94 = arith.constant dense<0.000000e+00> : vector<256x128xf32>
    %92 = tpu.matmul %89, %91, %cst_94 {dimension_numbers = #tpu.dot_dimension_numbers<[1], [0], [0], [1], [0, 0, 1, 1], [], []>} : vector<256x128xbf16>, vector<128x128xbf16>, vector<256x128xf32> -> vector<256x128xf32>
    %93 = arith.addf %86, %92 : vector<256x128xf32>
    %c1_95 = arith.constant 1 : index
    %c0_96 = arith.constant 0 : index
    %c0_97 = arith.constant 0 : index
    %94 = vector.load %arg7[%c1_95, %c0_96, %c0_97] : memref<18x18x128xf32, #tpu.memory_space<vmem>>, vector<16x16x128xf32>
    %95 = arith.truncf %94 : vector<16x16x128xf32> to vector<16x16x128xbf16>
    %96 = vector.shape_cast %95 : vector<16x16x128xbf16> to vector<256x128xbf16>
    %c3_98 = arith.constant 3 : index
    %c0_99 = arith.constant 0 : index
    %c0_100 = arith.constant 0 : index
    %97 = vector.load %arg4[%c3_98, %c0_99, %c0_100] : memref<9x128x128xbf16, #tpu.memory_space<vmem>>, vector<1x128x128xbf16>
    %98 = vector.shape_cast %97 : vector<1x128x128xbf16> to vector<128x128xbf16>
    %cst_101 = arith.constant dense<0.000000e+00> : vector<256x128xf32>
    %99 = tpu.matmul %96, %98, %cst_101 {dimension_numbers = #tpu.dot_dimension_numbers<[1], [0], [0], [1], [0, 0, 1, 1], [], []>} : vector<256x128xbf16>, vector<128x128xbf16>, vector<256x128xf32> -> vector<256x128xf32>
    %100 = arith.addf %93, %99 : vector<256x128xf32>
    %c1_102 = arith.constant 1 : index
    %c1_103 = arith.constant 1 : index
    %c0_104 = arith.constant 0 : index
    %101 = vector.load %arg7[%c1_102, %c1_103, %c0_104] : memref<18x18x128xf32, #tpu.memory_space<vmem>>, vector<16x16x128xf32>
    %102 = arith.truncf %101 : vector<16x16x128xf32> to vector<16x16x128xbf16>
    %103 = vector.shape_cast %102 : vector<16x16x128xbf16> to vector<256x128xbf16>
    %c4_105 = arith.constant 4 : index
    %c0_106 = arith.constant 0 : index
    %c0_107 = arith.constant 0 : index
    %104 = vector.load %arg4[%c4_105, %c0_106, %c0_107] : memref<9x128x128xbf16, #tpu.memory_space<vmem>>, vector<1x128x128xbf16>
    %105 = vector.shape_cast %104 : vector<1x128x128xbf16> to vector<128x128xbf16>
    %cst_108 = arith.constant dense<0.000000e+00> : vector<256x128xf32>
    %106 = tpu.matmul %103, %105, %cst_108 {dimension_numbers = #tpu.dot_dimension_numbers<[1], [0], [0], [1], [0, 0, 1, 1], [], []>} : vector<256x128xbf16>, vector<128x128xbf16>, vector<256x128xf32> -> vector<256x128xf32>
    %107 = arith.addf %100, %106 : vector<256x128xf32>
    %c1_109 = arith.constant 1 : index
    %c2_110 = arith.constant 2 : index
    %c0_111 = arith.constant 0 : index
    %108 = vector.load %arg7[%c1_109, %c2_110, %c0_111] : memref<18x18x128xf32, #tpu.memory_space<vmem>>, vector<16x16x128xf32>
    %109 = arith.truncf %108 : vector<16x16x128xf32> to vector<16x16x128xbf16>
    %110 = vector.shape_cast %109 : vector<16x16x128xbf16> to vector<256x128xbf16>
    %c5_112 = arith.constant 5 : index
    %c0_113 = arith.constant 0 : index
    %c0_114 = arith.constant 0 : index
    %111 = vector.load %arg4[%c5_112, %c0_113, %c0_114] : memref<9x128x128xbf16, #tpu.memory_space<vmem>>, vector<1x128x128xbf16>
    %112 = vector.shape_cast %111 : vector<1x128x128xbf16> to vector<128x128xbf16>
    %cst_115 = arith.constant dense<0.000000e+00> : vector<256x128xf32>
    %113 = tpu.matmul %110, %112, %cst_115 {dimension_numbers = #tpu.dot_dimension_numbers<[1], [0], [0], [1], [0, 0, 1, 1], [], []>} : vector<256x128xbf16>, vector<128x128xbf16>, vector<256x128xf32> -> vector<256x128xf32>
    %114 = arith.addf %107, %113 : vector<256x128xf32>
    %c2_116 = arith.constant 2 : index
    %c0_117 = arith.constant 0 : index
    %c0_118 = arith.constant 0 : index
    %115 = vector.load %arg7[%c2_116, %c0_117, %c0_118] : memref<18x18x128xf32, #tpu.memory_space<vmem>>, vector<16x16x128xf32>
    %116 = arith.truncf %115 : vector<16x16x128xf32> to vector<16x16x128xbf16>
    %117 = vector.shape_cast %116 : vector<16x16x128xbf16> to vector<256x128xbf16>
    %c6_119 = arith.constant 6 : index
    %c0_120 = arith.constant 0 : index
    %c0_121 = arith.constant 0 : index
    %118 = vector.load %arg4[%c6_119, %c0_120, %c0_121] : memref<9x128x128xbf16, #tpu.memory_space<vmem>>, vector<1x128x128xbf16>
    %119 = vector.shape_cast %118 : vector<1x128x128xbf16> to vector<128x128xbf16>
    %cst_122 = arith.constant dense<0.000000e+00> : vector<256x128xf32>
    %120 = tpu.matmul %117, %119, %cst_122 {dimension_numbers = #tpu.dot_dimension_numbers<[1], [0], [0], [1], [0, 0, 1, 1], [], []>} : vector<256x128xbf16>, vector<128x128xbf16>, vector<256x128xf32> -> vector<256x128xf32>
    %121 = arith.addf %114, %120 : vector<256x128xf32>
    %c2_123 = arith.constant 2 : index
    %c1_124 = arith.constant 1 : index
    %c0_125 = arith.constant 0 : index
    %122 = vector.load %arg7[%c2_123, %c1_124, %c0_125] : memref<18x18x128xf32, #tpu.memory_space<vmem>>, vector<16x16x128xf32>
    %123 = arith.truncf %122 : vector<16x16x128xf32> to vector<16x16x128xbf16>
    %124 = vector.shape_cast %123 : vector<16x16x128xbf16> to vector<256x128xbf16>
    %c7_126 = arith.constant 7 : index
    %c0_127 = arith.constant 0 : index
    %c0_128 = arith.constant 0 : index
    %125 = vector.load %arg4[%c7_126, %c0_127, %c0_128] : memref<9x128x128xbf16, #tpu.memory_space<vmem>>, vector<1x128x128xbf16>
    %126 = vector.shape_cast %125 : vector<1x128x128xbf16> to vector<128x128xbf16>
    %cst_129 = arith.constant dense<0.000000e+00> : vector<256x128xf32>
    %127 = tpu.matmul %124, %126, %cst_129 {dimension_numbers = #tpu.dot_dimension_numbers<[1], [0], [0], [1], [0, 0, 1, 1], [], []>} : vector<256x128xbf16>, vector<128x128xbf16>, vector<256x128xf32> -> vector<256x128xf32>
    %128 = arith.addf %121, %127 : vector<256x128xf32>
    %c2_130 = arith.constant 2 : index
    %c2_131 = arith.constant 2 : index
    %c0_132 = arith.constant 0 : index
    %129 = vector.load %arg7[%c2_130, %c2_131, %c0_132] : memref<18x18x128xf32, #tpu.memory_space<vmem>>, vector<16x16x128xf32>
    %130 = arith.truncf %129 : vector<16x16x128xf32> to vector<16x16x128xbf16>
    %131 = vector.shape_cast %130 : vector<16x16x128xbf16> to vector<256x128xbf16>
    %c8_133 = arith.constant 8 : index
    %c0_134 = arith.constant 0 : index
    %c0_135 = arith.constant 0 : index
    %132 = vector.load %arg4[%c8_133, %c0_134, %c0_135] : memref<9x128x128xbf16, #tpu.memory_space<vmem>>, vector<1x128x128xbf16>
    %133 = vector.shape_cast %132 : vector<1x128x128xbf16> to vector<128x128xbf16>
    %cst_136 = arith.constant dense<0.000000e+00> : vector<256x128xf32>
    %134 = tpu.matmul %131, %133, %cst_136 {dimension_numbers = #tpu.dot_dimension_numbers<[1], [0], [0], [1], [0, 0, 1, 1], [], []>} : vector<256x128xbf16>, vector<128x128xbf16>, vector<256x128xf32> -> vector<256x128xf32>
    %135 = arith.addf %128, %134 : vector<256x128xf32>
    %c0_137 = arith.constant 0 : index
    %c1_138 = arith.constant 1 : index
    %c1_139 = arith.constant 1 : index
    %c0_140 = arith.constant 0 : index
    %136 = vector.load %arg1[%c0_137, %c1_138, %c1_139, %c0_140] : memref<1x18x18x128xbf16, #tpu.memory_space<vmem>>, vector<1x16x16x128xbf16>
    %137 = vector.shape_cast %136 : vector<1x16x16x128xbf16> to vector<16x16x128xbf16>
    %138 = vector.shape_cast %137 : vector<16x16x128xbf16> to vector<256x128xbf16>
    %139 = arith.extf %138 : vector<256x128xbf16> to vector<256x128xf32>
    %140 = arith.addf %135, %139 : vector<256x128xf32>
    %cst_141 = arith.constant 0.000000e+00 : f32
    %141 = vector.broadcast %cst_141 : f32 to vector<256x128xf32>
    %142 = arith.maximumf %140, %141 : vector<256x128xf32>
    %143 = vector.shape_cast %142 : vector<256x128xf32> to vector<16x16x128xf32>
    %c0_142 = arith.constant 0 : index
    %c0_143 = arith.constant 0 : index
    %c0_144 = arith.constant 0 : index
    %c0_145 = arith.constant 0 : index
    %144 = vector.load %arg6[%c0_142, %c0_143, %c0_144, %c0_145] : memref<1x16x16x128xf32, #tpu.memory_space<vmem>>, vector<1x16x16x128xf32>
    %145 = vector.shape_cast %144 : vector<1x16x16x128xf32> to vector<16x16x128xf32>
    %146 = vector.shape_cast %143 : vector<16x16x128xf32> to vector<1x16x16x128xf32>
    tpu.vector_store %arg6[%c0_142, %c0_143, %c0_144, %c0_145], %146 {strides = array<i32>} : memref<1x16x16x128xf32, #tpu.memory_space<vmem>>, vector<1x16x16x128xf32>,
    return
  }
  func.func @transform_0(%arg0: i32) -> (i32, i32, i32, i32) {
    %c0_i32 = arith.constant 0 : i32
    %c0_i32_0 = arith.constant 0 : i32
    %c0_i32_1 = arith.constant 0 : i32
    %c0_i32_2 = arith.constant 0 : i32
    return %arg0, %c0_i32, %c0_i32_0, %c0_i32_1 : i32, i32, i32, i32
  }
  func.func @transform_1(%arg0: i32) -> (i32, i32, i32) {
    %c0_i32 = arith.constant 0 : i32
    %c0_i32_0 = arith.constant 0 : i32
    %c0_i32_1 = arith.constant 0 : i32
    %c0_i32_2 = arith.constant 0 : i32
    return %c0_i32, %c0_i32_0, %c0_i32_1 : i32, i32, i32
  }
  func.func @transform_2(%arg0: i32) -> (i32, i32) {
    %c0_i32 = arith.constant 0 : i32
    %c0_i32_0 = arith.constant 0 : i32
    %c0_i32_1 = arith.constant 0 : i32
    return %c0_i32, %c0_i32_0 : i32, i32
  }
  func.func @transform_3(%arg0: i32) -> (i32, i32, i32) {
    %c0_i32 = arith.constant 0 : i32
    %c0_i32_0 = arith.constant 0 : i32
    %c0_i32_1 = arith.constant 0 : i32
    %c0_i32_2 = arith.constant 0 : i32
    return %c0_i32, %c0_i32_0, %c0_i32_1 : i32, i32, i32
  }
  func.func @transform_4(%arg0: i32) -> (i32, i32) {
    %c0_i32 = arith.constant 0 : i32
    %c0_i32_0 = arith.constant 0 : i32
    %c0_i32_1 = arith.constant 0 : i32
    return %c0_i32, %c0_i32_0 : i32, i32
  }
  func.func @transform_5(%arg0: i32) -> (i32, i32, i32, i32) {
    %c0_i32 = arith.constant 0 : i32
    %c0_i32_0 = arith.constant 0 : i32
    %c0_i32_1 = arith.constant 0 : i32
    %c0_i32_2 = arith.constant 0 : i32
    return %arg0, %c0_i32, %c0_i32_0, %c0_i32_1 : i32, i32, i32, i32
  }
}

</mosaic_0001>

<bundles_post_ra>
// kernel: basic_block_forward.1
= control target key start
LH: loop header
LB: loop body
LE: loop exit
PB: predicated region body
PF: predicated region fallthrough
CT: control target
= control target key end

     0   :  { %s11656_s18 = smov 0   ;;  %s14512_s0 = inlined_call_operand.vmem [shape: bf16[2,18,18,128], index: 0, kind: input, shape index: {}]   ;;  %s14513_s1 = inlined_call_operand.vmem [shape: bf16[9,128,128], index: 1, kind: input, shape index: {}]   ;;  %s14514_s2 = inlined_call_operand.vmem [shape: f32[1,128], index: 2, kind: input, shape index: {}]   ;;  %s14515_s3 = inlined_call_operand.vmem [shape: bf16[9,128,128], index: 3, kind: input, shape index: {}]   ;;  %s14516_s4 = inlined_call_operand.vmem [shape: f32[1,128], index: 4, kind: input, shape index: {}]   ;;  %s14517_s5 = inlined_call_operand.vmem [shape: f32[2,16,16,128], index: 5, kind: output, shape index: {}]  }
   0x1 LB: > { %s8681_s19 = sadd.s32 4294967295, %s11622_s18   ;;  %p8685_p0 = scmp.ge.s32.totalorder %s11622_s18, 1  ;;  %s11622_s18 = sphi %s11656_s18, %s15_s18  }
   0x2   : > { %p187_p1 = scmp.lt.s32.totalorder %s11622_s18, 3 }
   0x4   : > { %p188_p2 = pnand %p8685_p0, %p187_p1 }
   0x6   : > { %191 = sbr.rel (%p188_p2) target bundleno = 1577 (0x629), region = 40 }
   0xd   : > { %v11408_v0 = vld [vmem:[%s14513_s1] sm:$0xff]   ;;  %p215_p3 = scmp.lt.s32.totalorder %s8681_s19, 1  ;;  %v11409_v1 = vld [vmem:[%s14513_s1 + $0x8] sm:$0xff]   ;;  %v11410_v2 = vld [vmem:[%s14513_s1 + $0x10] sm:$0xff]   ;;  %vm666_vm0 = vsmask.f32 3328 }
   0xe   : > { %9958 = vmatprep.subr.bf16.mxu0 %v11408_v0  ;;  %v11411_v3 = vld [vmem:[%s14513_s1 + $0x18] sm:$0xff]   ;;  %v11412_v5 = vld [vmem:[%s14513_s1 + $0x20] sm:$0xff]   ;;  %v11413_v6 = vld [vmem:[%s14513_s1 + $0x28] sm:$0xff]   ;;  %vm667_vm1 = vsmask.f32 7440  ;;  %vm1439_vm3 = vcmask 1042432  }
   0xf   : > { %s14713_s19 = smov (!%p215_p3, %s8681_s19), 1  ;;  %9959 = vmatpush3.bf16.msra.mxu0 %v11408_v0  ;;  %v11414_v7 = vld [vmem:[%s14513_s1 + $0x30] sm:$0xff]   ;;  %v11415_v8 = vld [vmem:[%s14513_s1 + $0x38] sm:$0xff]   ;;  %v11418_v9 = vld [vmem:[%s14513_s1 + $0x40] sm:$0xff]   ;;  %vm1440_vm4 = vcmask 1046532  }
  0x10   : > { %9960 = vmatprep.subr.bf16.mxu0 %v11409_v1  ;;  %s11398_s26 = smul.u32 216, %s14713_s19  ;;  %v11421_v12 = vld [vmem:[%s14513_s1 + $0x48] sm:$0xff]   ;;  %v11424_v16 = vld [vmem:[%s14513_s1 + $0x50] sm:$0xff]   ;;  %v11427_v28 = vld [vmem:[%s14513_s1 + $0x58] sm:$0xff]   ;;  %s9525_s30 = sshll.u32 %s14713_s19, 8 }
  0x11   : > { %v11430_v41 = vld [vmem:[%s14513_s1 + $0x60] sm:$0xff]   ;;  %v11433_v57 = vld [vmem:[%s14513_s1 + $0x68] sm:$0xff]   ;;  %vm11750_vm2 = vmor %vm666_vm0, %vm667_vm1  ;;  %s14315_s7 = scalar_lea.vmem %s14517_s5, %s9525_s30 }
  0x12   : > { %s11679_s29 = scalar_lea.vmem %s14512_s0, %s11398_s26  ;;  %vm12177_vm5 = vmor %vm1439_vm3, %vm1440_vm4 }
  0x13   : > { %9961 = vmatpush3.bf16.msra.mxu0 %v11409_v1  ;;  %v11416_v4 = vld [vmem:[%s11679_s29] sm:$0xff]   ;;  %v11417_v10 = vld [vmem:[%s11679_s29 + $0xc] sm:$0xff]   ;;  %v11419_v11 = vld [vmem:[%s11679_s29 + $0x18] sm:$0xff]  }
  0x14   : > { %9962 = vmatprep.subr.bf16.mxu0 %v11410_v2  ;;  %9974 = vmatprep.mubr.bf16.mxu0 %v11416_v4  ;;  %v618_v13 = vld [vmem:[%s11679_s29] sm:$0xf]  ;;  %v619_v14 = vld [vmem:[%s11679_s29 + $0x4] sm:$0xf]  ;;  %v621_v15 = vld [vmem:[%s11679_s29 + $0xc] sm:$0xf] }
  0x15   : > { %v622_v17 = vld [vmem:[%s11679_s29 + $0x10] sm:$0xf]  ;;  %v670_v18 = vshrl.u32 %v618_v13, 16  ;;  %v673_v19 = vshll.u32 %v618_v13, 16  ;;  %v679_v20 = vshll.u32 %v619_v14, 16  ;;  %v683_v21 = vshrl.u32 %v619_v14, 16 }
  0x16   : > { %v11420_v22 = vld [vmem:[%s11679_s29 + $0x24] sm:$0xff]   ;;  %v694_v23 = vshrl.u32 %v621_v15, 16  ;;  %v697_v24 = vshll.u32 %v621_v15, 16  ;;  %v11422_v25 = vld [vmem:[%s11679_s29 + $0x30] sm:$0xff]   ;;  %v703_v26 = vshll.u32 %v622_v17, 16  ;;  %v707_v27 = vshrl.u32 %v622_v17, 16 }
  0x17   : > { %9963 = vmatpush3.bf16.msra.mxu0 %v11410_v2  ;;  %v620_v29 = vld [vmem:[%s11679_s29 + $0x8] sm:$0x1]  ;;  %v672_v30 = vrot.slane %v670_v18, 4  ;;  %v675_v31 = vrot.slane %v673_v19, 5  ;;  %v11718_v32 = vrot.slane %v679_v20, 5  ;;  %v685_v33 = vrot.slane %v683_v21, 4 }
  0x18   : > { %9964 = vmatprep.subr.bf16.mxu0 %v11411_v3  ;;  %v623_v34 = vld [vmem:[%s11679_s29 + $0x14] sm:$0x1]  ;;  %v696_v35 = vrot.slane %v694_v23, 4  ;;  %v699_v36 = vrot.slane %v697_v24, 5  ;;  %v624_v37 = vld [vmem:[%s11679_s29 + $0x18] sm:$0xf] }
  0x19   : > { %v11722_v38 = vrot.slane %v703_v26, 5  ;;  %v709_v39 = vrot.slane %v707_v27, 4  ;;  %v11725_v40 = vld [vmem:[%s11679_s29 + $0x1c] sm:$0xf]  ;;  %v689_v42 = vshll.u32 %v620_v29, 16  ;;  %v676_v44 = vor.u32 %v675_v31, %v672_v30  ;;  %v11425_v53 = vld [vmem:[%s11679_s29 + $0x48] sm:$0xff]  }
  0x1a   : > { %v627_v43 = vld [vmem:[%s11679_s29 + $0x24] sm:$0xf]  ;;  %v686_v45 = vor.u32 %v685_v33, %v11718_v32  ;;  %v718_v46 = vshrl.u32 %v624_v37, 16  ;;  %v721_v47 = vshll.u32 %v624_v37, 16  ;;  %v11423_v48 = vld [vmem:[%s11679_s29 + $0x3c] sm:$0xff]   ;;  %v700_v49 = vor.u32 %v699_v36, %v696_v35 }
  0x1b   : > { %9965 = vmatpush3.bf16.msra.mxu0 %v11411_v3  ;;  %v713_v50 = vshll.u32 %v623_v34, 16  ;;  %v727_v51 = vshll.u32 %v11725_v40, 16  ;;  %v731_v52 = vshrl.u32 %v11725_v40, 16  ;;  %v710_v54 = vor.u32 %v709_v39, %v11722_v38  ;;  %v11741_v59 = vld [vmem:[%s11679_s29 + $0x28] sm:$0xf]  ;;  %v11428_v17 = vld [vmem:[%s11679_s29 + $0x60] sm:$0xff]  }
  0x1c   : > { %9966 = vmatprep.subr.bf16.mxu0 %v11412_v5  ;;  %v742_v55 = vshrl.u32 %v627_v43, 16  ;;  %v745_v56 = vshll.u32 %v627_v43, 16  ;;  %v691_v58 = vrot.slane %v689_v42, 5  ;;  %v677_v60 = vrot.slane %v676_v44, 4  ;;  %v11744_v2 = vld [vmem:[%s11679_s29 + $0x20] sm:$0x1] }
  0x1d   : > { %v687_v61 = vrot.slane %v686_v45, 4  ;;  %v720_v62 = vrot.slane %v718_v46, 4  ;;  %v723_v63 = vrot.slane %v721_v47, 5  ;;  %v701_v0 = vrot.slane %v700_v49, 4  ;;  %v11762_v15 = vld [vmem:[%s11679_s29 + $0x34] sm:$0xf] }
  0x1e   : > { %v715_v1 = vrot.slane %v713_v50, 5  ;;  %v11746_v3 = vrot.slane %v727_v51, 5  ;;  %v733_v4 = vrot.slane %v731_v52, 4  ;;  %v737_v14 = vshll.u32 %v11744_v2, 16  ;;  %v11778_v23 = vld [vmem:[%s11679_s29 + $0x2c] sm:$0x1] }
  0x1f   : > { %9967 = vmatpush3.bf16.msra.mxu0 %v11412_v5  ;;  %v724_v13 = vor.u32 %v723_v63, %v720_v62  ;;  %v682_v18 = vsel %vm11750_vm2, %v677_v60, %v11718_v32  ;;  %v692_v19 = vsel %vm11750_vm2, %v687_v61, %v691_v58  ;;  %v706_v20 = vsel %vm11750_vm2, %v701_v0, %v11722_v38  ;;  %v11439_v27 = vld [vmem:[%s14513_s1 + $0x78] sm:$0xff]   ;;  %v11799_v38 = vld [vmem:[%s11679_s29 + $0x40] sm:$0xf]  ;;  %v636_v44 = vld [vmem:[%s11679_s29 + $0x48] sm:$0xf] }
  0x20   : > { %9968 = vmatprep.subr.bf16.mxu0 %v11413_v6  ;;  %v734_v21 = vor.u32 %v733_v4, %v11746_v3  ;;  %v775_v30 = vshll.u32 %v11762_v15, 16  ;;  %v779_v31 = vshrl.u32 %v11762_v15, 16  ;;  %v11789_v33 = vrot.slane %v737_v14, 5  ;;  %v11795_v36 = vld [vmem:[%s11679_s29 + $0x38] sm:$0x1]  ;;  %v11814_v46 = vld [vmem:[%s14513_s1 + $0x80] sm:$0xff]  }
  0x21   : > { %v11787_v32 = vrot.slane %v724_v13, 4  ;;  %v761_v35 = vshll.u32 %v11778_v23, 16  ;;  %v633_v37 = vld [vmem:[%s11679_s29 + $0x3c] sm:$0xf]  ;;  %v11801_v39 = vcombine.low %v682_v18, %v692_v19  ;;  %v11809_v45 = vld [vmem:[%s11679_s29 + $0x4c] sm:$0xf] }
  0x22   : > { %v11791_v34 = vrot.slane %v734_v21, 4  ;;  %v11817_v49 = vrot.slane %v775_v30, 5  ;;  %v781_v50 = vrot.slane %v779_v31, 4  ;;  %v790_v51 = vshrl.u32 %v633_v37, 16  ;;  %v11431_v61 = vld [vmem:[%s11679_s29 + $0x78] sm:$0xff]  }
  0x23   : > { %9969 = vmatpush3.bf16.msra.mxu0 %v11413_v6  ;;  %v711_v6 = vrot.slane %v710_v54, 4  ;;  %v793_v52 = vshll.u32 %v633_v37, 16  ;;  %v803_v54 = vshrl.u32 %v11799_v38, 16  ;;  %v817_v58 = vshll.u32 %v636_v44, 16  ;;  %v639_v4 = vld [vmem:[%s11679_s29 + $0x54] sm:$0xf] }
  0x24   : > { %9970 = vmatprep.subr.bf16.mxu0 %v11414_v7  ;;  %v823_v60 = vshll.u32 %v11809_v45, 16  ;;  %v740_v62 = vsel %vm11750_vm2, %v11791_v34, %v11789_v33  ;;  %v11832_v63 = vrot.slane %v761_v35, 5  ;;  %v785_v0 = vshll.u32 %v11795_v36, 16  ;;  %v11855_v18 = vld [vmem:[%s11679_s29 + $0x50] sm:$0x1] }
  0x25   : > { %v795_v13 = vrot.slane %v793_v52, 5 }
  0x26   : > { %v11857_v21 = vrot.slane %v823_v60, 5  ;;  %v11865_v30 = vrot.slane %v785_v0, 5 }
  0x27   : > { %9971 = vmatpush3.bf16.msra.mxu0 %v11414_v7  ;;  %v744_v7 = vrot.slane %v742_v55, 4  ;;  %v11429_v55 = vld [vmem:[%s11679_s29 + $0x6c] sm:$0xff]  }
  0x28   : > { %9972 = vmatprep.subr.bf16.mxu0 %v11415_v8 }
  0x2b   : > { %9973 = vmatpush3.bf16.msra.mxu0 %v11415_v8  ;;  %v747_v8 = vrot.slane %v745_v56, 5  ;;  %v730_v56 = vsel %vm11750_vm2, %v11787_v32, %v11746_v3  ;;  %v651_v3 = vld [vmem:[%s11679_s29 + $0x84] sm:$0xf]  ;;  %v11972_v32 = vld [vmem:[%s11679_s29 + $0x88] sm:$0xf] }
  0x2c   : > { %10006 = vmatprep.subr.bf16.mxu0 %v11418_v9  ;;  %14573 = vst [vmem:[#allocation5_spill] sm:$0xff] %v11972_v32 }
  0x2d   : > { %v748_v24 = vor.u32 %v747_v8, %v744_v7 }
  0x2e   : > { %9975 = vmatmul.mubr.bf16.vlgmr.msra.gmra.mrb[0].mxu0 %v11417_v10  ;;  %v11436_v10 = vld [vmem:[%s14513_s1 + $0x70] sm:$0xff]  }
  0x2f   : > { %10007 = vmatpush3.bf16.msra.mxu0 %v11418_v9  ;;  %9978 = vmatprep.mubr.bf16.mxu0 %v11419_v11  ;;  %v751_v9 = vshll.u32 %v11741_v59, 16  ;;  %v755_v11 = vshrl.u32 %v11741_v59, 16  ;;  %v11805_v42 = vrot.slane %v748_v24, 4 }
  0x30   : > { %10008 = vmatprep.subr.bf16.mxu0 %v11421_v12 }
  0x33   : > { %10009 = vmatpush3.bf16.msra.mxu0 %v11421_v12  ;;  %v630_v12 = vld [vmem:[%s11679_s29 + $0x30] sm:$0xf] }
  0x34   : > { %10010 = vmatprep.subr.bf16.mxu0 %v11424_v16  ;;  %v766_v26 = vshrl.u32 %v630_v12, 16  ;;  %v769_v29 = vshll.u32 %v630_v12, 16  ;;  %v792_v12 = vrot.slane %v790_v51, 4 }
  0x36   : > { %9979 = vmatmul.mubr.bf16.gmra.mrb[4].mxu0 %v11420_v22  ;;  %v716_v22 = vsel %vm11750_vm2, %v711_v6, %v715_v1  ;;  %v768_v43 = vrot.slane %v766_v26, 4  ;;  %v827_v1 = vshrl.u32 %v11809_v45, 16  ;;  %v841_v26 = vshll.u32 %v639_v4, 16  ;;  %v11929_v6 = vld [vmem:[%s11679_s29 + $0x7c] sm:$0xf] }
  0x37   : > { %9982 = vmatprep.mubr.bf16.mxu0 %v11422_v25  ;;  %10011 = vmatpush3.bf16.msra.mxu0 %v11424_v16  ;;  %v11426_v16 = vld [vmem:[%s11679_s29 + $0x54] sm:$0xff]   ;;  %v11780_v25 = vrot.slane %v751_v9, 5  ;;  %v782_v9 = vor.u32 %v781_v50, %v11817_v49  ;;  %v11432_v50 = vld [vmem:[%s11679_s29 + $0x84] sm:$0xff]   ;;  %14571 = vst [vmem:[#allocation4_spill] sm:$0xff] %v11929_v6 }
  0x38   : > { %10012 = vmatprep.subr.bf16.mxu0 %v11427_v28  ;;  %v829_v24 = vrot.slane %v827_v1, 4  ;;  %v843_v60 = vrot.slane %v841_v26, 5  ;;  %v11884_v1 = vld [vmem:[%s11679_s29 + $0x5c] sm:$0x1] }
  0x3b   : > { %10013 = vmatpush3.bf16.msra.mxu0 %v11427_v28  ;;  %v757_v28 = vrot.slane %v755_v11, 4  ;;  %v11849_v11 = vld [vmem:[%s11679_s29 + $0x58] sm:$0xf] }
  0x3c   : > { %10014 = vmatprep.subr.bf16.mxu0 %v11430_v41 }
  0x3d   : > { %v758_v47 = vor.u32 %v757_v28, %v11780_v25  ;;  %v851_v28 = vshrl.u32 %v11849_v11, 16 }
  0x3e   : > { %9983 = vmatmul.mubr.bf16.gmra.mrb[8].mxu0 %v11423_v48  ;;  %v771_v48 = vrot.slane %v769_v29, 5 }
  0x3f   : > { %9986 = vmatprep.mubr.bf16.mxu0 %v11425_v53  ;;  %10015 = vmatpush3.bf16.msra.mxu0 %v11430_v41  ;;  %v11803_v41 = vcombine.low %v706_v20, %v716_v22  ;;  %v799_v53 = vshll.u32 %v11799_v38, 16  ;;  %v11842_v7 = vrot.slane %v758_v47, 4  ;;  %v819_v20 = vrot.slane %v817_v58, 5 }
  0x40   : > { %10016 = vmatprep.subr.bf16.mxu0 %v11433_v57  ;;  %v772_v8 = vor.u32 %v771_v48, %v768_v43  ;;  %v838_v22 = vshrl.u32 %v639_v4, 16  ;;  %v11869_v43 = vrot.slane %v782_v9, 4  ;;  %v11873_v48 = vld [vmem:[%s11679_s29 + $0x64] sm:$0xf]  ;;  %v830_v58 = vor.u32 %v829_v24, %v11857_v21 }
  0x41   : > { %v11851_v14 = vrot.slane %v799_v53, 5  ;;  %v764_v29 = vsel %vm11750_vm2, %v11842_v7, %v11832_v63  ;;  %v833_v53 = vshll.u32 %v11855_v18, 16  ;;  %v853_v0 = vrot.slane %v851_v28, 4  ;;  %v11987_v63 = vld [vmem:[%s11679_s29 + $0x80] sm:$0x1] }
  0x42   : > { %v11867_v37 = vrot.slane %v772_v8, 4  ;;  %v871_v9 = vshll.u32 %v11873_v48, 16  ;;  %14574 = vst [vmem:[#allocation6_spill] sm:$0xff] %v11987_v63  ;;  %v654_v7 = vld [vmem:[%s11679_s29 + $0x90] sm:$0xf] }
  0x43   : > { %10017 = vmatpush3.bf16.msra.mxu0 %v11433_v57  ;;  %v814_v57 = vshrl.u32 %v636_v44, 16  ;;  %v796_v44 = vor.u32 %v795_v13, %v792_v12  ;;  %v875_v12 = vshrl.u32 %v11873_v48, 16  ;;  %v835_v26 = vrot.slane %v833_v53, 5 }
  0x44   : > { %10018 = vmatprep.subr.bf16.mxu0 %v11436_v10 }
  0x45   : > { %v816_v19 = vrot.slane %v814_v57, 4  ;;  %v11434_v57 = vld [vmem:[%s11679_s29 + $0x90] sm:$0xff]   ;;  %v797_v13 = vrot.slane %v796_v44, 4  ;;  %v857_v44 = vshll.u32 %v11884_v1, 16 }
  0x46   : > { %9987 = vmatmul.mubr.bf16.gmra.mrb[12].mxu0 %v11426_v16  ;;  %v805_v16 = vrot.slane %v803_v54, 4  ;;  %v840_v54 = vrot.slane %v838_v22, 4  ;;  %v788_v22 = vsel %vm11750_vm2, %v11869_v43, %v11865_v30  ;;  %v877_v30 = vrot.slane %v875_v12, 4  ;;  %v11905_v43 = vld [vmem:[%s11679_s29 + $0x68] sm:$0x1] }
  0x47   : > { %9990 = vmatprep.mubr.bf16.mxu0 %v11428_v17  ;;  %10019 = vmatpush3.bf16.msra.mxu0 %v11436_v10  ;;  %v11846_v10 = vld [vmem:[%s11679_s29 + $0x44] sm:$0x1]  ;;  %v642_v17 = vld [vmem:[%s11679_s29 + $0x60] sm:$0xf]  ;;  %v820_v52 = vor.u32 %v819_v20, %v816_v19  ;;  %v778_v20 = vsel %vm11750_vm2, %v11867_v37, %v11817_v49 }
  0x48   : > { %10020 = vmatprep.subr.bf16.mxu0 %v11439_v27  ;;  %v862_v31 = vshrl.u32 %v642_v17, 16  ;;  %v865_v35 = vshll.u32 %v642_v17, 16  ;;  %v809_v47 = vshll.u32 %v11846_v10, 16  ;;  %v806_v51 = vor.u32 %v805_v16, %v11851_v14 }
  0x49   : > { %v821_v28 = vrot.slane %v820_v52, 4  ;;  %v11966_v33 = vcombine.low %v778_v20, %v788_v22 }
  0x4a   : > { %v864_v4 = vrot.slane %v862_v31, 4  ;;  %v867_v8 = vrot.slane %v865_v35, 5  ;;  %v811_v16 = vrot.slane %v809_v47, 5  ;;  %v807_v24 = vrot.slane %v806_v51, 4  ;;  %v648_v47 = vld [vmem:[%s11679_s29 + $0x78] sm:$0xf] }
  0x4b   : > { %10021 = vmatpush3.bf16.msra.mxu0 %v11439_v27  ;;  %v847_v27 = vshll.u32 %v11849_v11, 16  ;;  %v831_v31 = vrot.slane %v830_v58, 4  ;;  %v844_v35 = vor.u32 %v843_v60, %v840_v54  ;;  %v11435_v54 = vld [vmem:[%s11679_s29 + $0x9c] sm:$0xff]   ;;  %v802_v58 = vsel %vm11750_vm2, %v797_v13, %v11851_v14 }
  0x4c   : > { %10054 = vmatprep.subr.bf16.mxu0 %v11814_v46  ;;  %v868_v37 = vor.u32 %v867_v8, %v864_v4  ;;  %v812_v60 = vsel %vm11750_vm2, %v807_v24, %v811_v16  ;;  %v910_v4 = vshrl.u32 %v648_v47, 16  ;;  %v913_v8 = vshll.u32 %v648_v47, 16 }
  0x4d   : > { %v836_v12 = vsel %vm11750_vm2, %v831_v31, %v835_v26  ;;  %v881_v24 = vshll.u32 %v11905_v43, 16  ;;  %v919_v47 = vshll.u32 %v11929_v6, 16  ;;  %v11968_v34 = vcombine.low %v802_v58, %v812_v60 }
  0x4e   : > { %9991 = vmatmul.mubr.bf16.gmra.mrb[16].mxu0 %v11429_v55  ;;  %v645_v55 = vld [vmem:[%s11679_s29 + $0x6c] sm:$0xf]  ;;  %v11933_v13 = vrot.slane %v868_v37, 4  ;;  %v11952_v37 = vcombine.low %v730_v56, %v740_v62 }
  0x4f   : > { %9994 = vmatprep.mubr.bf16.mxu0 %v11431_v61  ;;  %v11881_v61 = vrot.slane %v847_v27, 5  ;;  %v886_v17 = vshrl.u32 %v645_v55, 16  ;;  %v889_v19 = vshll.u32 %v645_v55, 16  ;;  %v11897_v27 = vld [vmem:[%s11679_s29 + $0x70] sm:$0xf]  ;;  %v12006_v60 = vrot.slane %v919_v47, 5 }
  0x50   : > { %v895_v55 = vshll.u32 %v11897_v27, 16  ;;  %v899_v52 = vshrl.u32 %v11897_v27, 16  ;;  %v12022_v62 = vld [vmem:[%s11679_s29 + $0x8c] sm:$0x1] }
  0x51   : > { %v854_v49 = vor.u32 %v853_v0, %v11881_v61  ;;  %v888_v51 = vrot.slane %v886_v17, 4  ;;  %v891_v53 = vrot.slane %v889_v19, 5  ;;  %v11917_v0 = vld [vmem:[%s11679_s29 + $0x74] sm:$0x1]  ;;  %v11924_v17 = vrot.slane %v844_v35, 4  ;;  %14577 = vst [vmem:[#allocation9_spill] sm:$0xff] %v12022_v62 }
  0x52   : > { %14570 = vst [vmem:[#allocation3_spill] sm:$0xff] %v11917_v0  ;;  %v11926_v19 = vrot.slane %v857_v44, 5  ;;  %v901_v26 = vrot.slane %v899_v52, 4  ;;  %v905_v31 = vshll.u32 %v11917_v0, 16  ;;  %v912_v35 = vrot.slane %v910_v4, 4 }
  0x53   : > { %v11931_v14 = vrot.slane %v854_v49, 4  ;;  %v915_v44 = vrot.slane %v913_v8, 5  ;;  %v923_v49 = vshrl.u32 %v11929_v6, 16  ;;  %v657_v52 = vld [vmem:[%s11679_s29 + $0x9c] sm:$0xf]  ;;  %v934_v8 = vshrl.u32 %v651_v3, 16 }
  0x54   : > { %v982_v47 = vshrl.u32 %v657_v52, 16  ;;  %v12071_v0 = vld [vmem:[%s11679_s29 + $0xb0] sm:$0x1] }
  0x55   : > { %v916_v58 = vor.u32 %v915_v44, %v912_v35  ;;  %v925_v4 = vrot.slane %v923_v49, 4  ;;  %v929_v44 = vshll.u32 %v11987_v63, 16  ;;  %v985_v49 = vshll.u32 %v657_v52, 16  ;;  %14581 = vst [vmem:[#allocation13_spill] sm:$0xff] %v12071_v0 }
  0x56   : > { %9995 = vmatmul.mubr.bf16.gmra.mrb[20].mxu0 %v11432_v50  ;;  %v11902_v50 = vrot.slane %v871_v9, 5  ;;  %v826_v9 = vsel %vm11750_vm2, %v821_v28, %v11857_v21  ;;  %v892_v21 = vor.u32 %v891_v53, %v888_v51  ;;  %v11937_v28 = vrot.slane %v895_v55, 5 }
  0x57   : > { %9998 = vmatprep.mubr.bf16.mxu0 %v11434_v57  ;;  %v11437_v57 = vld [vmem:[%s11679_s29 + $0xa8] sm:$0xff]   ;;  %v11974_v56 = vcombine.low %v826_v9, %v836_v12  ;;  %v12000_v55 = vrot.slane %v905_v31, 5  ;;  %v937_v9 = vshll.u32 %v651_v3, 16  ;;  %v943_v12 = vshll.u32 %v11972_v32, 16 }
  0x58   : > { %v878_v16 = vor.u32 %v877_v30, %v11902_v50  ;;  %v14572_v30 = vsel %vm11750_vm2, %v11805_v42, %v11780_v25  ;;  %v11984_v42 = vrot.slane %v881_v24, 5  ;;  %v902_v53 = vor.u32 %v901_v26, %v11937_v28  ;;  %v12011_v24 = vld [vmem:[%s11679_s29 + $0xa0] sm:$0xf] }
  0x59   : > { %v11964_v51 = vcombine.low %v14572_v30, %v764_v29  ;;  %v11991_v29 = vld [vmem:[%s11679_s29 + $0x94] sm:$0xf]  ;;  %14576 = vst [vmem:[#allocation8_spill] sm:$0xff] %v12011_v24  ;;  %v958_v26 = vshrl.u32 %v654_v7, 16  ;;  %v961_v31 = vshll.u32 %v654_v7, 16  ;;  %v12018_v3 = vrot.slane %v916_v58, 4 }
  0x5a   : > { %14575 = vst [vmem:[#allocation7_spill] sm:$0xff] %v11991_v29  ;;  %v11997_v22 = vrot.slane %v878_v16, 4  ;;  %v947_v16 = vshrl.u32 %v11972_v32, 16  ;;  %v967_v30 = vshll.u32 %v11991_v29, 16  ;;  %v12015_v35 = vrot.slane %v902_v53, 4 }
  0x5b   : > { %v926_v20 = vor.u32 %v925_v4, %v12006_v60  ;;  %v991_v7 = vshll.u32 %v12011_v24, 16  ;;  %v995_v25 = vshrl.u32 %v12011_v24, 16  ;;  %v936_v53 = vrot.slane %v934_v8, 4  ;;  %v12043_v8 = vld [vmem:[%s11679_s29 + $0xa4] sm:$0x1] }
  0x5c   : > { %v12027_v32 = vrot.slane %v943_v12, 5  ;;  %v949_v52 = vrot.slane %v947_v16, 4  ;;  %v960_v58 = vrot.slane %v958_v26, 4  ;;  %v963_v63 = vrot.slane %v961_v31, 5  ;;  %v660_v16 = vld [vmem:[%s11679_s29 + $0xa8] sm:$0xf] }
  0x5d   : > { %v12032_v4 = vrot.slane %v967_v30, 5  ;;  %v987_v12 = vrot.slane %v985_v49, 5  ;;  %v12046_v26 = vrot.slane %v926_v20, 4  ;;  %v12048_v31 = vrot.slane %v929_v44, 5 }
  0x5e   : > { %9999 = vmatmul.mubr.bf16.gmra.mrb[24].mxu0 %v11435_v54  ;;  %v11438_v54 = vld [vmem:[%s11679_s29 + $0xb4] sm:$0xff]   ;;  %v12050_v30 = vrot.slane %v991_v7, 5  ;;  %v908_v24 = vsel %vm11750_vm2, %v12015_v35, %v12000_v55  ;;  %v953_v20 = vshll.u32 %v12022_v62, 16  ;;  %v950_v44 = vor.u32 %v949_v52, %v12027_v32 }
  0x5f   : > { %10002 = vmatprep.mubr.bf16.mxu0 %v11437_v57  ;;  %v12004_v57 = vrot.slane %v892_v21, 4  ;;  %v971_v21 = vshrl.u32 %v11991_v29, 16  ;;  %v939_v29 = vrot.slane %v937_v9, 5  ;;  %14578 = vst [vmem:[#allocation10_spill] sm:$0xff] %v12032_v4  ;;  %v984_v9 = vrot.slane %v982_v47, 4  ;;  %v11442_v52 = vld [vmem:[%s14513_s1 + $0x90] sm:$0xff]  }
  0x60   : > { %14579 = vst [vmem:[#allocation11_spill] sm:$0xff] %v12050_v30  ;;  %v922_v47 = vsel %vm11750_vm2, %v12018_v3, %v12006_v60  ;;  %v964_v7 = vor.u32 %v963_v63, %v960_v58  ;;  %v1001_v3 = vshll.u32 %v12043_v8, 16  ;;  %v1009_v62 = vshll.u32 %v660_v16, 16 }
  0x61   : > { %v973_v6 = vrot.slane %v971_v21, 4  ;;  %v997_v21 = vrot.slane %v995_v25, 4  ;;  %v940_v49 = vor.u32 %v939_v29, %v936_v53  ;;  %v11441_v25 = vld [vmem:[%s14513_s1 + $0x88] sm:$0xff]   ;;  %v663_v29 = vld [vmem:[%s11679_s29 + $0xb4] sm:$0xf]  ;;  %v988_v60 = vor.u32 %v987_v12, %v984_v9 }
  0x62   : > { %v1006_v53 = vshrl.u32 %v660_v16, 16  ;;  %v1025_v12 = vshll.u32 %v12071_v0, 16  ;;  %v12092_v16 = vld [vmem:[%s11679_s29 + $0xb8] sm:$0xf] }
  0x63   : > { %v974_v55 = vor.u32 %v973_v6, %v12032_v4  ;;  %v932_v6 = vsel %vm11750_vm2, %v12046_v26, %v12048_v31  ;;  %v998_v63 = vor.u32 %v997_v21, %v12050_v30  ;;  %v1030_v4 = vshrl.u32 %v663_v29, 16 }
  0x64   : > { %v1033_v26 = vshll.u32 %v663_v29, 16  ;;  %v12094_v31 = vrot.slane %v940_v49, 4  ;;  %v12096_v21 = vrot.slane %v950_v44, 4  ;;  %v12098_v30 = vrot.slane %v964_v7, 4  ;;  %v1378_v29 = vld [vmem:[%s11679_s29 + $0x24] sm:$0xe] }
  0x65   : > { %v12109_v0 = vrot.slane %v1006_v53, 4  ;;  %v11443_v49 = vld [vmem:[%s14513_s1 + $0x98] sm:$0xff]   ;;  %v12115_v44 = vrot.slane %v998_v63, 4  ;;  %v12117_v7 = vrot.slane %v1009_v62, 5  ;;  %v14585_v62 = vsel %vm11750_vm2, %v11931_v14, %v11926_v19 }
  0x66   : > { %10003 = vmatmul.mubr.bf16.gmra.mrb[28].mxu0 %v11438_v54  ;;  %v12030_v54 = vld [vmem:[%s11679_s29 + $0x98] sm:$0x1]  ;;  %v12127_v53 = vrot.slane %v1033_v26, 5  ;;  %v1043_v19 = vshrl.u32 %v12092_v16, 16 }
  0x67   : > { %10022 = vmatprep.mubr.bf16.mxu0 %v11801_v39  ;;  %v12062_v39 = vld [vmem:[%s11679_s29 + $0xac] sm:$0xf]  ;;  %v977_v35 = vshll.u32 %v12030_v54, 16  ;;  %v1012_v26 = vor.u32 %v12117_v7, %v12109_v0  ;;  %v11600_v7 = vld [vmem:[%s11679_s29 + $0x4] sm:$0xf] }
  0x68   : > { %14580 = vst [vmem:[#allocation12_spill] sm:$0xff] %v12062_v39  ;;  %v1015_v58 = vshll.u32 %v12062_v39, 16  ;;  %v1019_v9 = vshrl.u32 %v12062_v39, 16 }
  0x69   : > { %v12100_v39 = vrot.slane %v977_v35, 5 }
  0x6a   : > { %v12119_v35 = vrot.slane %v1015_v58, 5  ;;  %v14588_v58 = vsel %vm11750_vm2, %v11933_v13, %v11902_v50  ;;  %v1461_v50 = vrot.slane %v11744_v2, 5  ;;  %v1465_v2 = vrot.slane %v11741_v59, 5  ;;  %v11444_v59 = vld [vmem:[%s14513_s1 + $0xa0] sm:$0xff]  }
  0x6e   : > { %10023 = vmatmul.mubr.bf16.vlgmr.msra.gmra.mrb[0].mxu0 %v11803_v41  ;;  %v12088_v41 = vrot.slane %v953_v20, 5  ;;  %v12105_v20 = vrot.slane %v988_v60, 4  ;;  %v12123_v60 = vrot.slane %v1025_v12, 5  ;;  %v1380_v12 = vld [vmem:[%s11679_s29 + $0x3c] sm:$0xe] }
  0x6f   : > { %10055 = vmatpush3.bf16.msra.mxu0 %v11814_v46  ;;  %10026 = vmatprep.mubr.bf16.mxu0 %v11952_v37  ;;  %v1377_v46 = vld [vmem:[%s11679_s29 + $0x18] sm:$0xe]  ;;  %v12103_v37 = vrot.slane %v974_v55, 4  ;;  %v12121_v55 = vrot.slane %v1019_v9, 4 }
  0x70   : > { %14582 = vst [vmem:[#allocation14_spill] sm:$0xff] %v12088_v41  ;;  %10056 = vmatprep.subr.bf16.mxu0 %v11441_v25  ;;  %14583 = vst [vmem:[#allocation15_spill] sm:$0xff] %v12105_v20  ;;  %v12107_v41 = vrot.slane %v1001_v3, 5  ;;  %v12125_v3 = vrot.slane %v1030_v4, 4  ;;  %v1379_v20 = vld [vmem:[%s11679_s29 + $0x30] sm:$0xe]  ;;  %v14587_v4 = vsel %vm11750_vm2, %v11997_v22, %v11984_v42  ;;  %v12164_v42 = vcombine.low %v922_v47, %v932_v6 }
  0x71   : > { %v12153_v9 = vcombine.low %v14588_v58, %v14587_v4  ;;  %v8756_v14 = vrot.slane %v1377_v46, 9  ;;  %v1458_v22 = vrot.slane %v11725_v40, 5  ;;  %v8757_v40 = vrot.slane %v1378_v29, 9  ;;  %v1381_v6 = vld [vmem:[%s11679_s29 + $0x48] sm:$0xe] }
  0x72   : > { %14584 = vst [vmem:[#allocation16_spill] sm:$0xff] %v12107_v41  ;;  %v1039_v41 = vshll.u32 %v12092_v16, 16  ;;  %v1468_v47 = vrot.slane %v11778_v23, 5  ;;  %v8758_v46 = vrot.slane %v1379_v20, 9  ;;  %v1472_v29 = vrot.slane %v11762_v15, 5 }
  0x73   : > { %10057 = vmatpush3.bf16.msra.mxu0 %v11441_v25  ;;  %v14586_v25 = vsel %vm11750_vm2, %v11924_v17, %v11881_v61  ;;  %v14589_v61 = vsel %vm11750_vm2, %v12004_v57, %v11937_v28  ;;  %v12187_v57 = vsel %vm12177_vm5, %v8756_v14, %v1458_v22  ;;  %v8759_v4 = vrot.slane %v1380_v12, 9  ;;  %v1389_v14 = vld [vmem:[%s11679_s29 + $0xa8] sm:$0xe] }
  0x74   : > { %10058 = vmatprep.subr.bf16.mxu0 %v11442_v52  ;;  %v12141_v63 = vcombine.low %v14586_v25, %v14585_v62  ;;  %v12162_v17 = vcombine.low %v14589_v61, %v908_v24  ;;  %v1460_v24 = vrot.slane %v1458_v22, 4  ;;  %v1382_v62 = vld [vmem:[%s11679_s29 + $0x54] sm:$0xe]  ;;  %v1475_v25 = vrot.slane %v11795_v36, 5  ;;  %v1383_v22 = vld [vmem:[%s11679_s29 + $0x60] sm:$0xe] }
  0x75   : > { %v1479_v58 = vrot.slane %v11799_v38, 5  ;;  %v12214_v15 = vsel %vm12177_vm5, %v8758_v46, %v1472_v29  ;;  %v1474_v20 = vrot.slane %v1472_v29, 4  ;;  %v8761_v29 = vrot.slane %v1382_v62, 9  ;;  %v14595_v46 = vld [vmem:[#allocation5_spill] sm:$0xff] }
  0x76   : > { %10027 = vmatmul.mubr.bf16.gmra.mrb[4].mxu0 %v11964_v51  ;;  %v1022_v51 = vor.u32 %v12121_v55, %v12119_v35  ;;  %v12202_v23 = vsel %vm12177_vm5, %v1460_v24, %v1461_v50  ;;  %v1482_v50 = vrot.slane %v11846_v10, 5  ;;  %v8760_v24 = vrot.slane %v1381_v6, 9  ;;  %v14594_v6 = vld [vmem:[#allocation6_spill] sm:$0xff] }
  0x77   : > { %10030 = vmatprep.mubr.bf16.mxu0 %v11966_v33  ;;  %10059 = vmatpush3.bf16.msra.mxu0 %v11442_v52  ;;  %v12196_v33 = vsel %vm12177_vm5, %v8757_v40, %v1465_v2  ;;  %v1467_v52 = vrot.slane %v1465_v2, 4  ;;  %v12221_v38 = vsel %vm12177_vm5, %v8759_v4, %v1479_v58  ;;  %v1481_v12 = vrot.slane %v1479_v58, 4  ;;  %v1384_v40 = vld [vmem:[%s11679_s29 + $0x6c] sm:$0xe]  ;;  %v1385_v58 = vld [vmem:[%s11679_s29 + $0x78] sm:$0xe] }
  0x78   : > { %10060 = vmatprep.subr.bf16.mxu0 %v11443_v49  ;;  %v11445_v2 = vld [vmem:[%s14513_s1 + $0xa8] sm:$0xff]   ;;  %v1493_v4 = vrot.slane %v11849_v11, 5  ;;  %v8762_v62 = vrot.slane %v1383_v22, 9  ;;  %v1388_v22 = vld [vmem:[%s11679_s29 + $0x9c] sm:$0xe]  ;;  %v1521_v36 = vrot.slane %v14595_v46, 5  ;;  %v980_v55 = vsel %vm11750_vm2, %v12103_v37, %v12100_v39 }
  0x79   : > { %v12210_v61 = vsel %vm12177_vm5, %v1467_v52, %v1468_v47  ;;  %v1486_v47 = vrot.slane %v11809_v45, 5  ;;  %v1489_v52 = vrot.slane %v11855_v18, 5  ;;  %v12238_v10 = vsel %vm12177_vm5, %v1481_v12, %v1482_v50  ;;  %v1386_v12 = vld [vmem:[%s11679_s29 + $0x84] sm:$0xe]  ;;  %v11601_v37 = vld [vmem:[%s11679_s29 + $0x8] sm:$0x1] }
  0x7a   : > { %v12253_v11 = vsel %vm12177_vm5, %v8761_v29, %v1493_v4  ;;  %v8763_v50 = vrot.slane %v1384_v40, 9  ;;  %v14592_v40 = vld [vmem:[#allocation3_spill] sm:$0xff]  ;;  %v1023_v0 = vrot.slane %v1022_v51, 4  ;;  %v1375_v51 = vld [vmem:[%s11679_s29] sm:$0xe] }
  0x7b   : > { %10061 = vmatpush3.bf16.msra.mxu0 %v11443_v49  ;;  %v12230_v49 = vsel %vm12177_vm5, %v1474_v20, %v1475_v25  ;;  %v12246_v45 = vsel %vm12177_vm5, %v8760_v24, %v1486_v47  ;;  %v1488_v18 = vrot.slane %v1486_v47, 4  ;;  %v1496_v25 = vrot.slane %v11884_v1, 5  ;;  %v11446_v1 = vld [vmem:[%s14513_s1 + $0xb0] sm:$0xff]  }
  0x7c   : > { %10062 = vmatprep.subr.bf16.mxu0 %v11444_v59  ;;  %v1500_v20 = vrot.slane %v11873_v48, 5  ;;  %v1507_v24 = vrot.slane %v11897_v27, 5  ;;  %v8754_v39 = vrot.slane %v1375_v51, 9 }
  0x7e   : > { %10031 = vmatmul.mubr.bf16.gmra.mrb[8].mxu0 %v11968_v34  ;;  %v1495_v34 = vrot.slane %v1493_v4, 4  ;;  %v12274_v47 = vsel %vm12177_vm5, %v8762_v62, %v1500_v20  ;;  %v1502_v29 = vrot.slane %v1500_v20, 4  ;;  %v1387_v4 = vld [vmem:[%s11679_s29 + $0x90] sm:$0xe]  ;;  %v1509_v27 = vrot.slane %v1507_v24, 4  ;;  %v14593_v20 = vld [vmem:[#allocation4_spill] sm:$0xff] }
  0x7f   : > { %10034 = vmatprep.mubr.bf16.mxu0 %v11974_v56  ;;  %10063 = vmatpush3.bf16.msra.mxu0 %v11444_v59  ;;  %v12262_v56 = vsel %vm12177_vm5, %v1488_v18, %v1489_v52  ;;  %v1503_v59 = vrot.slane %v11905_v43, 5  ;;  %v12281_v43 = vsel %vm12177_vm5, %v8763_v50, %v1507_v24  ;;  %v1510_v18 = vrot.slane %v14592_v40, 5 }
  0x80   : > { %10064 = vmatprep.subr.bf16.mxu0 %v11445_v2  ;;  %v12270_v48 = vsel %vm12177_vm5, %v1495_v34, %v1496_v25  ;;  %v11447_v25 = vld [vmem:[%s14513_s1 + $0xb8] sm:$0xff]   ;;  %v8764_v62 = vrot.slane %v1385_v58, 9  ;;  %v1514_v52 = vrot.slane %v14593_v20, 5  ;;  %v1517_v50 = vrot.slane %v14594_v6, 5 }
  0x81   : > { %v12290_v34 = vsel %vm12177_vm5, %v1502_v29, %v1503_v59  ;;  %v8765_v40 = vrot.slane %v1386_v12, 9  ;;  %v14596_v29 = vld [vmem:[#allocation9_spill] sm:$0xff]  ;;  %v1523_v12 = vrot.slane %v1521_v36, 4  ;;  %v8766_v46 = vrot.slane %v1387_v4, 9  ;;  %v1390_v59 = vld [vmem:[%s11679_s29 + $0xb4] sm:$0xe] }
  0x82   : > { %v12305_v58 = vsel %vm12177_vm5, %v8764_v62, %v1514_v52  ;;  %v1516_v6 = vrot.slane %v1514_v52, 4  ;;  %v1524_v20 = vrot.slane %v14596_v29, 5  ;;  %v1531_v62 = vrot.slane %v12030_v54, 5  ;;  %v14598_v29 = vld [vmem:[#allocation8_spill] sm:$0xff]  ;;  %v14600_v4 = vld [vmem:[#allocation13_spill] sm:$0xff] }
  0x83   : > { %10065 = vmatpush3.bf16.msra.mxu0 %v11445_v2  ;;  %v12298_v2 = vsel %vm12177_vm5, %v1509_v27, %v1510_v18  ;;  %v12312_v27 = vsel %vm12177_vm5, %v8765_v40, %v1521_v36  ;;  %v14597_v18 = vld [vmem:[#allocation7_spill] sm:$0xff]  ;;  %v1535_v13 = vrot.slane %v14598_v29, 5  ;;  %v12326_v36 = vld [vmem:[%s14513_s1 + $0xc0] sm:$0xff]   ;;  %v14599_v29 = vld [vmem:[#allocation12_spill] sm:$0xff] }
  0x84   : > { %10066 = vmatprep.subr.bf16.mxu0 %v11446_v1  ;;  %v1528_v24 = vrot.slane %v14597_v18, 5  ;;  %v12319_v52 = vsel %vm12177_vm5, %v1516_v6, %v1517_v50  ;;  %v1538_v18 = vrot.slane %v12043_v8, 5  ;;  %v1549_v8 = vrot.slane %v12092_v16, 5 }
  0x85   : > { %v1537_v6 = vrot.slane %v1535_v13, 4 }
  0x86   : > { %10035 = vmatmul.mubr.bf16.gmra.mrb[12].mxu0 %v12141_v63  ;;  %v8767_v63 = vrot.slane %v1388_v22, 9  ;;  %v1530_v54 = vrot.slane %v1528_v24, 4  ;;  %v665_v22 = vld [vmem:[%s11679_s29 + $0xbc] sm:$0x1] }
  0x87   : > { %10038 = vmatprep.mubr.bf16.mxu0 %v12153_v9  ;;  %10067 = vmatpush3.bf16.msra.mxu0 %v11446_v1  ;;  %v12332_v9 = vsel %vm12177_vm5, %v1523_v12, %v1524_v20  ;;  %v12336_v1 = vsel %vm12177_vm5, %v8766_v46, %v1528_v24  ;;  %v8768_v12 = vrot.slane %v1389_v14, 9  ;;  %v1542_v46 = vrot.slane %v14599_v29, 5 }
  0x88   : > { %10068 = vmatprep.subr.bf16.mxu0 %v11447_v25  ;;  %v12343_v40 = vsel %vm12177_vm5, %v8767_v63, %v1535_v13  ;;  %v12348_v20 = vsel %vm12177_vm5, %v1530_v54, %v1531_v62  ;;  %v1545_v24 = vrot.slane %v14600_v4, 5  ;;  %v12356_v63 = vsel %vm12177_vm5, %v1537_v6, %v1538_v18  ;;  %v14601_v54 = vld [vmem:[#allocation14_spill] sm:$0xff] }
  0x89   : > { %v8798_v50 = vcombine.low %v12336_v1, %v12348_v20  ;;  %v8769_v13 = vrot.slane %v1390_v59, 9  ;;  %v12364_v62 = vsel %vm12177_vm5, %v8768_v12, %v1542_v46  ;;  %v1552_v4 = vrot.slane %v665_v22, 5  ;;  %v8889_v1 = vld [vmem:[%s11679_s29 + $0x28] sm:$0xf] }
  0x8a   : > { %v956_v6 = vsel %vm11750_vm2, %v12096_v21, %v14601_v54  ;;  %v1013_v59 = vrot.slane %v1012_v26, 4  ;;  %v1551_v29 = vrot.slane %v1549_v8, 4  ;;  %v1041_v12 = vrot.slane %v1039_v41, 5 }
  0x8b   : > { %10069 = vmatpush3.bf16.msra.mxu0 %v11447_v25  ;;  %v1544_v25 = vrot.slane %v1542_v46, 4  ;;  %v12375_v18 = vsel %vm12177_vm5, %v8769_v13, %v1549_v8  ;;  %v1045_v46 = vrot.slane %v1043_v19, 4  ;;  %v1049_v14 = vshll.u32 %v665_v22, 16  ;;  %v14602_v19 = vld [vmem:[#allocation10_spill] sm:$0xff] }
  0x8c   : > { %10102 = vmatprep.subr.bf16.mxu0 %v12326_v36  ;;  %v12395_v16 = vsel %vm12177_vm5, %v1551_v29, %v1552_v4  ;;  %v970_v26 = vsel %vm11750_vm2, %v12098_v30, %v14602_v19  ;;  %v14603_v22 = vsel %vm11750_vm2, %v12094_v31, %v12027_v32  ;;  %v1036_v13 = vor.u32 %v12127_v53, %v12125_v3  ;;  %v14604_v29 = vld [vmem:[#allocation11_spill] sm:$0xff]  ;;  %v14606_v31 = vld [vmem:[#allocation16_spill] sm:$0xff] }
  0x8d   : > { %v12384_v21 = vsel %vm12177_vm5, %v1544_v25, %v1545_v24  ;;  %v8741_v24 = vcombine.low %v14603_v22, %v956_v6  ;;  %v8742_v8 = vcombine.low %v970_v26, %v980_v55  ;;  %v1046_v30 = vor.u32 %v1045_v46, %v1041_v12  ;;  %v1376_v55 = vld [vmem:[%s11679_s29 + $0xc] sm:$0xe]  ;;  %v11602_v22 = vld [vmem:[%s11679_s29 + $0x10] sm:$0xf] }
  0x8e   : > { %10039 = vmatmul.mubr.bf16.gmra.mrb[16].mxu0 %v12162_v17  ;;  %v1444_v17 = vrot.slane %v11600_v7, 5  ;;  %v8800_v41 = vcombine.low %v12364_v62, %v12384_v21  ;;  %v1037_v25 = vrot.slane %v1036_v13, 4  ;;  %v1051_v4 = vrot.slane %v1049_v14, 5  ;;  %v14605_v7 = vld [vmem:[#allocation15_spill] sm:$0xff]  ;;  %v8893_v62 = vld [vmem:[%s11679_s29 + $0x38] sm:$0x1] }
  0x8f   : > { %10042 = vmatprep.mubr.bf16.mxu0 %v12164_v42  ;;  %v8801_v42 = vcombine.low %v12375_v18, %v12395_v16  ;;  %v1447_v54 = vrot.slane %v11601_v37, 5  ;;  %v994_v32 = vsel %vm11750_vm2, %v14605_v7, %v14604_v29  ;;  %v1004_v3 = vsel %vm11750_vm2, %v12115_v44, %v14606_v31  ;;  %v11451_v29 = vld [vmem:[%s14513_s1 + $0xd8] sm:$0xff]   ;;  %v11459_v18 = vld [vmem:[%s11679_s29 + $0x24] sm:$0xff]  }
  0x90   : > { %v1047_v53 = vrot.slane %v1046_v30, 4  ;;  %v1446_v6 = vrot.slane %v1444_v17, 4  ;;  %v1018_v14 = vsel %vm11750_vm2, %v1013_v59, %v12119_v35  ;;  %v1028_v46 = vsel %vm11750_vm2, %v1023_v0, %v12123_v60  ;;  %v11603_v30 = vld [vmem:[%s11679_s29 + $0x14] sm:$0x1] }
  0x91   : > { %v8743_v19 = vcombine.low %v994_v32, %v1004_v3  ;;  %v8744_v26 = vcombine.low %v1018_v14, %v1028_v46  ;;  %v1042_v51 = vsel %vm11750_vm2, %v1037_v25, %v1041_v12  ;;  %v1445_v35 = vsel %vm12177_vm5, %v8754_v39, %v1444_v17  ;;  %v11449_v17 = vld [vmem:[%s14513_s1 + $0xc8] sm:$0xff]   ;;  %v8886_v46 = vld [vmem:[%s11679_s29 + $0x1c] sm:$0xf] }
  0x92   : > { %v1052_v44 = vsel %vm11750_vm2, %v1047_v53, %v1051_v4  ;;  %v1448_v60 = vsel %vm12177_vm5, %v1446_v6, %v1447_v54  ;;  %v8755_v13 = vrot.slane %v1376_v55, 9  ;;  %v1454_v37 = vrot.slane %v11603_v30, 5  ;;  %v11450_v54 = vld [vmem:[%s14513_s1 + $0xd0] sm:$0xff]  }
  0x93   : > { %v8745_v59 = vcombine.low %v1042_v51, %v1052_v44  ;;  %v8786_v0 = vcombine.low %v1445_v35, %v1448_v60  ;;  %v14607_v39 = vcombine.low %v12187_v57, %v12202_v23  ;;  %v14608_v7 = vcombine.low %v12196_v33, %v12210_v61  ;;  %v11452_v57 = vld [vmem:[%s14513_s1 + $0xe0] sm:$0xff]   ;;  %v11453_v23 = vld [vmem:[%s14513_s1 + $0xe8] sm:$0xff]  }
  0x94   : > { %v14610_v33 = vcombine.low %v12221_v38, %v12238_v10  ;;  %v14611_v61 = vcombine.low %v12246_v45, %v12262_v56  ;;  %v11455_v38 = vld [vmem:[%s14513_s1 + $0xf8] sm:$0xff]   ;;  %v14613_v10 = vcombine.low %v12274_v47, %v12290_v34  ;;  %v12491_v45 = vld [vmem:[%s14513_s1 + $0x100] sm:$0xff]   ;;  %v14614_v56 = vcombine.low %v12281_v43, %v12298_v2 }
  0x95   : > { %v14615_v47 = vcombine.low %v12305_v58, %v12319_v52  ;;  %v8885_v34 = vld [vmem:[%s11679_s29 + $0x18] sm:$0xf]  ;;  %v14616_v55 = vcombine.low %v12312_v27, %v12332_v9  ;;  %v8884_v58 = vld [vmem:[%s11679_s29 + $0x14] sm:$0x1]  ;;  %v2345_v44 = vshll.u32 %v8886_v46, 16 }
  0x96   : > { %10043 = vmatmul.mubr.bf16.gmra.mrb[20].mxu0 %v8741_v24  ;;  %v1451_v24 = vrot.slane %v11602_v22, 5  ;;  %v2336_v6 = vshrl.u32 %v8885_v34, 16  ;;  %v2339_v14 = vshll.u32 %v8885_v34, 16  ;;  %v2349_v22 = vshrl.u32 %v8886_v46, 16  ;;  %v8888_v35 = vld [vmem:[%s11679_s29 + $0x24] sm:$0xf] }
  0x97   : > { %10046 = vmatprep.mubr.bf16.mxu0 %v8742_v8  ;;  %v12516_v27 = vrot.slane %v2345_v44, 5  ;;  %v2360_v30 = vshrl.u32 %v8888_v35, 16  ;;  %v8895_v34 = vld [vmem:[%s11679_s29 + $0x40] sm:$0xf]  ;;  %v2403_v46 = vshll.u32 %v8893_v62, 16 }
  0x98   : > { %v1453_v8 = vrot.slane %v1451_v24, 4  ;;  %v1452_v12 = vsel %vm12177_vm5, %v8755_v13, %v1451_v24  ;;  %v2338_v52 = vrot.slane %v2336_v6, 4  ;;  %v2341_v51 = vrot.slane %v2339_v14, 5  ;;  %v8887_v24 = vld [vmem:[%s11679_s29 + $0x20] sm:$0x1]  ;;  %v11457_v6 = vld [vmem:[%s11679_s29 + $0x18] sm:$0xff]  }
  0x99   : > { %v2351_v9 = vrot.slane %v2349_v22, 4  ;;  %v2417_v16 = vshll.u32 %v8895_v34, 16 }
  0x9a   : > { %v1455_v25 = vsel %vm12177_vm5, %v1453_v8, %v1454_v37  ;;  %v2342_v13 = vor.u32 %v2341_v51, %v2338_v52  ;;  %v2355_v8 = vshll.u32 %v8887_v24, 16  ;;  %v2363_v37 = vshll.u32 %v8888_v35, 16  ;;  %v11464_v35 = vld [vmem:[%s14513_s1 + $0x110] sm:$0xff]  }
  0x9b   : > { %v8787_v4 = vcombine.low %v1452_v12, %v1455_v25 }
  0x9e   : > { %10047 = vmatmul.mubr.bf16.gmra.mrb[24].mxu0 %v8743_v19 }
  0x9f   : > { %10050 = vmatprep.mubr.bf16.mxu0 %v8744_v26 }
  0xa6   : > { %10051 = vmatmul.mubr.bf16.gmra.mrb[28].mxu0 %v8745_v59 }
  0xa7   : > { %10070 = vmatprep.mubr.bf16.mxu0 %v8786_v0  ;;  %v2331_v0 = vshll.u32 %v8884_v58, 16 }
  0xa9   : > { %v12526_v25 = vrot.slane %v2331_v0, 5  ;;  %v12571_v0 = vrot.slane %v2417_v16, 5 }
  0xae   : > { %10071 = vmatmul.mubr.bf16.vlgmr.msra.gmra.mrb[0].mxu0 %v8787_v4  ;;  %v12528_v4 = vrot.slane %v2342_v13, 4 }
  0xaf   : > { %10103 = vmatpush3.bf16.msra.mxu0 %v12326_v36  ;;  %10074 = vmatprep.mubr.bf16.mxu0 %v14607_v39  ;;  %v14609_v36 = vcombine.low %v12214_v15, %v12230_v49  ;;  %v11454_v15 = vld [vmem:[%s14513_s1 + $0xf0] sm:$0xff]   ;;  %v14612_v49 = vcombine.low %v12253_v11, %v12270_v48  ;;  %v8882_v11 = vld [vmem:[%s11679_s29 + $0xc] sm:$0xf]  ;;  %v2352_v39 = vor.u32 %v2351_v9, %v12516_v27 }
  0xb0   : > { %10104 = vmatprep.subr.bf16.mxu0 %v11449_v17  ;;  %v8883_v48 = vld [vmem:[%s11679_s29 + $0x10] sm:$0xf]  ;;  %v2312_v32 = vshrl.u32 %v8882_v11, 16  ;;  %v2315_v31 = vshll.u32 %v8882_v11, 16 }
  0xb1   : > { %v2321_v3 = vshll.u32 %v8883_v48, 16  ;;  %v2325_v53 = vshrl.u32 %v8883_v48, 16 }
  0xb2   : > { %v2314_v19 = vrot.slane %v2312_v32, 4  ;;  %v2317_v43 = vrot.slane %v2315_v31, 5 }
  0xb3   : > { %10105 = vmatpush3.bf16.msra.mxu0 %v11449_v17  ;;  %v12504_v2 = vrot.slane %v2321_v3, 5  ;;  %v2327_v26 = vrot.slane %v2325_v53, 4  ;;  %v12530_v17 = vrot.slane %v2355_v8, 5  ;;  %v8896_v3 = vld [vmem:[%s11679_s29 + $0x44] sm:$0x1]  ;;  %v11460_v8 = vld [vmem:[%s11679_s29 + $0x30] sm:$0xff]  }
  0xb4   : > { %10106 = vmatprep.subr.bf16.mxu0 %v11450_v54  ;;  %v2318_v60 = vor.u32 %v2317_v43, %v2314_v19  ;;  %v8897_v53 = vld [vmem:[%s11679_s29 + $0x48] sm:$0xf] }
  0xb5   : > { %v2328_v59 = vor.u32 %v2327_v26, %v12504_v2  ;;  %v11461_v26 = vld [vmem:[%s14513_s1 + $0x108] sm:$0xff]   ;;  %v2432_v58 = vshrl.u32 %v8897_v53, 16 }
  0xb6   : > { %10075 = vmatmul.mubr.bf16.gmra.mrb[4].mxu0 %v14608_v7  ;;  %v12518_v12 = vrot.slane %v2318_v60, 4  ;;  %v2373_v7 = vshrl.u32 %v8889_v1, 16 }
  0xb7   : > { %10078 = vmatprep.mubr.bf16.mxu0 %v14609_v36  ;;  %10107 = vmatpush3.bf16.msra.mxu0 %v11450_v54  ;;  %v12524_v20 = vrot.slane %v2328_v59, 4  ;;  %v2362_v54 = vrot.slane %v2360_v30, 4  ;;  %v8892_v36 = vld [vmem:[%s11679_s29 + $0x34] sm:$0xf] }
  0xb8   : > { %10108 = vmatprep.subr.bf16.mxu0 %v11451_v29  ;;  %v2393_v21 = vshll.u32 %v8892_v36, 16 }
  0xba   : > { %v12552_v31 = vrot.slane %v2393_v21, 5 }
  0xbb   : > { %10109 = vmatpush3.bf16.msra.mxu0 %v11451_v29  ;;  %v2365_v29 = vrot.slane %v2363_v37, 5  ;;  %v12580_v37 = vrot.slane %v2432_v58, 4 }
  0xbc   : > { %10110 = vmatprep.subr.bf16.mxu0 %v11452_v57 }
  0xbe   : > { %10079 = vmatmul.mubr.bf16.gmra.mrb[8].mxu0 %v14610_v33 }
  0xbf   : > { %10082 = vmatprep.mubr.bf16.mxu0 %v14611_v61  ;;  %10111 = vmatpush3.bf16.msra.mxu0 %v11452_v57  ;;  %v11456_v57 = vld [vmem:[%s11679_s29 + $0xc] sm:$0xff]  }
  0xc0   : > { %10112 = vmatprep.subr.bf16.mxu0 %v11453_v23 }
  0xc3   : > { %10113 = vmatpush3.bf16.msra.mxu0 %v11453_v23  ;;  %v8890_v23 = vld [vmem:[%s11679_s29 + $0x2c] sm:$0x1] }
  0xc4   : > { %10114 = vmatprep.subr.bf16.mxu0 %v11454_v15  ;;  %v2379_v11 = vshll.u32 %v8890_v23, 16 }
  0xc6   : > { %10083 = vmatmul.mubr.bf16.gmra.mrb[12].mxu0 %v14612_v49  ;;  %v2397_v49 = vshrl.u32 %v8892_v36, 16  ;;  %v12569_v59 = vrot.slane %v2379_v11, 5  ;;  %v8900_v36 = vld [vmem:[%s11679_s29 + $0x54] sm:$0xf]  ;;  %v11463_v11 = vld [vmem:[%s11679_s29 + $0x48] sm:$0xff]  }
  0xc7   : > { %10086 = vmatprep.mubr.bf16.mxu0 %v14613_v10  ;;  %10115 = vmatpush3.bf16.msra.mxu0 %v11454_v15  ;;  %v12540_v15 = vrot.slane %v2352_v39, 4  ;;  %v8894_v10 = vld [vmem:[%s11679_s29 + $0x3c] sm:$0xf]  ;;  %v8898_v39 = vld [vmem:[%s11679_s29 + $0x4c] sm:$0xf] }
  0xc8   : > { %10116 = vmatprep.subr.bf16.mxu0 %v11455_v38  ;;  %v2399_v14 = vrot.slane %v2397_v49, 4  ;;  %v2408_v19 = vshrl.u32 %v8894_v10, 16  ;;  %v2411_v43 = vshll.u32 %v8894_v10, 16  ;;  %v8975_v49 = vld [vmem:[%s11679_s29 + $0x48] sm:$0xe]  ;;  %v3118_v10 = vrot.slane %v8898_v39, 5 }
  0xca   : > { %v2400_v44 = vor.u32 %v2399_v14, %v12552_v31  ;;  %v2410_v22 = vrot.slane %v2408_v19, 4  ;;  %v2413_v24 = vrot.slane %v2411_v43, 5  ;;  %v12614_v19 = vld [vmem:[%s11679_s29 + $0x58] sm:$0xf] }
  0xcb   : > { %10117 = vmatpush3.bf16.msra.mxu0 %v11455_v38  ;;  %v2366_v38 = vor.u32 %v2365_v29, %v2362_v54  ;;  %v2435_v54 = vshll.u32 %v8897_v53, 16  ;;  %v11467_v29 = vld [vmem:[%s14513_s1 + $0x118] sm:$0xff]   ;;  %v3120_v53 = vrot.slane %v3118_v10, 4 }
  0xcc   : > { %10150 = vmatprep.subr.bf16.mxu0 %v12491_v45  ;;  %v12576_v30 = vrot.slane %v2400_v44, 4 }
  0xcd   : > { %v12550_v32 = vrot.slane %v2366_v38, 4  ;;  %v2445_v38 = vshrl.u32 %v8898_v39, 16 }
  0xce   : > { %10087 = vmatmul.mubr.bf16.gmra.mrb[16].mxu0 %v14614_v56  ;;  %v2375_v56 = vrot.slane %v2373_v7, 4 }
  0xcf   : > { %10090 = vmatprep.mubr.bf16.mxu0 %v14615_v47 }
  0xd6   : > { %10091 = vmatmul.mubr.bf16.gmra.mrb[20].mxu0 %v14616_v55  ;;  %v2427_v55 = vshll.u32 %v8896_v3, 16  ;;  %v2459_v3 = vshll.u32 %v8900_v36, 16 }
  0xd7   : > { %10094 = vmatprep.mubr.bf16.mxu0 %v8798_v50  ;;  %v14617_v50 = vcombine.low %v12343_v40, %v12356_v63  ;;  %v8891_v40 = vld [vmem:[%s11679_s29 + $0x30] sm:$0xf]  ;;  %v2369_v63 = vshll.u32 %v8889_v1, 16  ;;  %v11462_v1 = vld [vmem:[%s11679_s29 + $0x3c] sm:$0xff]  }
  0xd8   : > { %v2384_v33 = vshrl.u32 %v8891_v40, 16  ;;  %v2387_v61 = vshll.u32 %v8891_v40, 16  ;;  %v2414_v40 = vor.u32 %v2413_v24, %v2410_v22  ;;  %v11466_v24 = vld [vmem:[%s11679_s29 + $0x60] sm:$0xff]  }
  0xda   : > { %v2386_v48 = vrot.slane %v2384_v33, 4  ;;  %v2389_v47 = vrot.slane %v2387_v61, 5  ;;  %v12595_v23 = vrot.slane %v2414_v40, 4  ;;  %v2437_v33 = vrot.slane %v2435_v54, 5  ;;  %v11479_v54 = vld [vmem:[%s14513_s1 + $0x138] sm:$0xff]  }
  0xdb   : > { %v2441_v61 = vshll.u32 %v8898_v39, 16 }
  0xdc   : > { %v2390_v51 = vor.u32 %v2389_v47, %v2386_v48  ;;  %v2456_v48 = vshrl.u32 %v8900_v36, 16  ;;  %v8991_v47 = vrot.slane %v8975_v49, 9  ;;  %v2438_v40 = vor.u32 %v2437_v33, %v12580_v37  ;;  %v12660_v36 = vld [vmem:[%s14513_s1 + $0x140] sm:$0xff]  }
  0xdd   : > { %v12621_v16 = vrot.slane %v2441_v61, 5  ;;  %v12666_v61 = vld [vmem:[%s11679_s29 + $0x7c] sm:$0xf]  ;;  %v12669_v37 = vld [vmem:[%s11679_s29 + $0x80] sm:$0x1] }
  0xde   : > { %10095 = vmatmul.mubr.bf16.gmra.mrb[24].mxu0 %v14617_v50  ;;  %v12574_v9 = vrot.slane %v2390_v51, 4  ;;  %v12583_v50 = vrot.slane %v2427_v55, 5  ;;  %v12607_v14 = vsel %vm12177_vm5, %v8991_v47, %v3118_v10  ;;  %v12629_v55 = vld [vmem:[%s11679_s29 + $0x68] sm:$0x1]  ;;  %v8977_v51 = vld [vmem:[%s11679_s29 + $0x60] sm:$0xe] }
  0xdf   : > { %10098 = vmatprep.mubr.bf16.mxu0 %v8800_v41  ;;  %v12543_v41 = vrot.slane %v2369_v63, 5  ;;  %v8899_v63 = vld [vmem:[%s11679_s29 + $0x50] sm:$0x1]  ;;  %14618 = vst [vmem:[#allocation3_spill] sm:$0xff] %v12607_v14  ;;  %v3135_v22 = vrot.slane %v12629_v55, 5  ;;  %v12671_v33 = vrot.slane %v2438_v40, 4 }
  0xe0   : > { %v2451_v21 = vshll.u32 %v8899_v63, 16  ;;  %v3146_v49 = vrot.slane %v12666_v61, 5  ;;  %v3149_v10 = vrot.slane %v12669_v37, 5  ;;  %v11471_v47 = vld [vmem:[%s11679_s29 + $0x84] sm:$0xff]  }
  0xe1   : > { %v2376_v52 = vor.u32 %v2375_v56, %v12543_v41  ;;  %v3121_v56 = vrot.slane %v8899_v63, 5  ;;  %v11478_v14 = vld [vmem:[%s11679_s29 + $0xc0] sm:$0xff]  }
  0xe2   : > { %v12631_v58 = vrot.slane %v2451_v21, 5  ;;  %v8979_v21 = vld [vmem:[%s11679_s29 + $0x78] sm:$0xe] }
  0xe3   : > { %v12567_v60 = vrot.slane %v2376_v52, 4  ;;  %v12633_v52 = vrot.slane %v2456_v48, 4  ;;  %v8995_v48 = vrot.slane %v8979_v21, 9  ;;  %v8981_v21 = vld [vmem:[%s11679_s29 + $0x90] sm:$0xe] }
  0xe6   : > { %10099 = vmatmul.mubr.bf16.gmra.mrb[28].mxu0 %v8801_v42  ;;  %v2421_v42 = vshrl.u32 %v8895_v34, 16  ;;  %v11465_v34 = vld [vmem:[%s11679_s29 + $0x54] sm:$0xff]  }
  0xe7   : > { %10118 = vmatprep.mubr.bf16.mxu0 %v11456_v57  ;;  %v11470_v57 = vld [vmem:[%s14513_s1 + $0x120] sm:$0xff]  }
  0xe8   : > { %v2423_v13 = vrot.slane %v2421_v42, 4  ;;  %v12623_v42 = vrot.slane %v2445_v38, 4  ;;  %v2469_v38 = vshrl.u32 %v12614_v19, 16 }
  0xea   : > { %v2424_v7 = vor.u32 %v2423_v13, %v12571_v0  ;;  %v8993_v13 = vrot.slane %v8977_v51, 9 }
  0xec   : > { %v12597_v62 = vrot.slane %v2424_v7, 4 }
  0xee   : > { %10119 = vmatmul.mubr.bf16.vlgmr.msra.gmra.mrb[0].mxu0 %v11457_v6  ;;  %v11473_v6 = vld [vmem:[%s14513_s1 + $0x128] sm:$0xff]  }
  0xef   : > { %10151 = vmatpush3.bf16.msra.mxu0 %v12491_v45  ;;  %10122 = vmatprep.mubr.bf16.mxu0 %v11459_v18  ;;  %v12578_v45 = vrot.slane %v2403_v46, 5  ;;  %v12611_v46 = vsel %vm12177_vm5, %v3120_v53, %v3121_v56  ;;  %v11476_v18 = vld [vmem:[%s14513_s1 + $0x130] sm:$0xff]   ;;  %v11469_v56 = vld [vmem:[%s11679_s29 + $0x78] sm:$0xff]   ;;  %v12683_v53 = vld [vmem:[%s11679_s29 + $0x60] sm:$0xf] }
  0xf0   : > { %10152 = vmatprep.subr.bf16.mxu0 %v11461_v26  ;;  %14619 = vst [vmem:[#allocation4_spill] sm:$0xff] %v12611_v46 }
  0xf3   : > { %10153 = vmatpush3.bf16.msra.mxu0 %v11461_v26  ;;  %v12626_v26 = vld [vmem:[%s11679_s29 + $0x64] sm:$0xf] }
  0xf4   : > { %10154 = vmatprep.subr.bf16.mxu0 %v11464_v35  ;;  %v3132_v44 = vrot.slane %v12626_v26, 5 }
  0xf6   : > { %10123 = vmatmul.mubr.bf16.gmra.mrb[4].mxu0 %v11460_v8  ;;  %v11468_v8 = vld [vmem:[%s11679_s29 + $0x6c] sm:$0xff]   ;;  %v3134_v39 = vrot.slane %v3132_v44, 4 }
  0xf7   : > { %10126 = vmatprep.mubr.bf16.mxu0 %v11462_v1  ;;  %10155 = vmatpush3.bf16.msra.mxu0 %v11464_v35  ;;  %v12639_v35 = vrot.slane %v2459_v3, 5  ;;  %v2465_v1 = vshll.u32 %v12614_v19, 16  ;;  %v3148_v3 = vrot.slane %v3146_v49, 4  ;;  %v12690_v19 = vld [vmem:[%s11679_s29 + $0x88] sm:$0xf] }
  0xf8   : > { %10156 = vmatprep.subr.bf16.mxu0 %v11467_v29  ;;  %v12653_v63 = vsel %vm12177_vm5, %v3134_v39, %v3135_v22 }
  0xf9   : > { %14621 = vst [vmem:[#allocation5_spill] sm:$0xff] %v12653_v63  ;;  %v12697_v51 = vsel %vm12177_vm5, %v3148_v3, %v3149_v10  ;;  %v11472_v10 = vld [vmem:[%s11679_s29 + $0x90] sm:$0xff]   ;;  %v11474_v3 = vld [vmem:[%s11679_s29 + $0x9c] sm:$0xff]   ;;  %v12777_v63 = vld [vmem:[%s11679_s29 + $0xb8] sm:$0xf] }
  0xfa   : > { %14623 = vst [vmem:[#allocation7_spill] sm:$0xff] %v12697_v51  ;;  %v2483_v51 = vshll.u32 %v12683_v53, 16 }
  0xfb   : > { %10157 = vmatpush3.bf16.msra.mxu0 %v11467_v29  ;;  %v12648_v29 = vsel %vm12177_vm5, %v8993_v13, %v3132_v44  ;;  %v12701_v44 = vld [vmem:[%s11679_s29 + $0x94] sm:$0xf]  ;;  %v12708_v13 = vld [vmem:[%s11679_s29 + $0x98] sm:$0x1] }
  0xfc   : > { %10158 = vmatprep.subr.bf16.mxu0 %v11470_v57  ;;  %14620 = vst [vmem:[#allocation6_spill] sm:$0xff] %v12648_v29  ;;  %v2489_v29 = vshll.u32 %v12626_v26, 16 }
  0xfe   : > { %10127 = vmatmul.mubr.bf16.gmra.mrb[8].mxu0 %v11463_v11  ;;  %v12678_v11 = vrot.slane %v2465_v1, 5  ;;  %v3153_v1 = vrot.slane %v12690_v19, 5 }
  0xff   : > { %10130 = vmatprep.mubr.bf16.mxu0 %v11465_v34  ;;  %10159 = vmatpush3.bf16.msra.mxu0 %v11470_v57  ;;  %v12663_v57 = vld [vmem:[%s11679_s29 + $0x5c] sm:$0x1]  ;;  %v12734_v34 = vld [vmem:[%s11679_s29 + $0xa0] sm:$0xf] }
 0x100   : > { %10160 = vmatprep.subr.bf16.mxu0 %v11473_v6 }
 0x103   : > { %10161 = vmatpush3.bf16.msra.mxu0 %v11473_v6  ;;  %v12687_v6 = vsel %vm12177_vm5, %v8995_v48, %v3146_v49  ;;  %v3160_v49 = vrot.slane %v12701_v44, 5  ;;  %v8997_v48 = vrot.slane %v8981_v21, 9  ;;  %v12737_v21 = vld [vmem:[%s11679_s29 + $0xa4] sm:$0x1] }
 0x104   : > { %10162 = vmatprep.subr.bf16.mxu0 %v11476_v18  ;;  %14622 = vst [vmem:[#allocation9_spill] sm:$0xff] %v12687_v6 }
 0x105   : > { %v3162_v7 = vrot.slane %v3160_v49, 4  ;;  %v12731_v43 = vsel %vm12177_vm5, %v8997_v48, %v3160_v49  ;;  %v12751_v49 = vld [vmem:[%s11679_s29 + $0xb0] sm:$0x1]  ;;  %v3167_v48 = vrot.slane %v12734_v34, 5 }
 0x106   : > { %10131 = vmatmul.mubr.bf16.gmra.mrb[12].mxu0 %v11466_v24  ;;  %v2448_v24 = vor.u32 %v12623_v42, %v12621_v16  ;;  %v3163_v42 = vrot.slane %v12708_v13, 5  ;;  %14626 = vst [vmem:[#allocation13_spill] sm:$0xff] %v12731_v43 }
 0x107   : > { %10134 = vmatprep.mubr.bf16.mxu0 %v11468_v8  ;;  %10163 = vmatpush3.bf16.msra.mxu0 %v11476_v18  ;;  %v12693_v18 = vld [vmem:[%s11679_s29 + $0x8c] sm:$0x1]  ;;  %v8980_v8 = vld [vmem:[%s11679_s29 + $0x84] sm:$0xe] }
 0x108   : > { %10164 = vmatprep.subr.bf16.mxu0 %v11479_v54  ;;  %v3156_v39 = vrot.slane %v12693_v18, 5  ;;  %v8996_v40 = vrot.slane %v8980_v8, 9  ;;  %v12719_v22 = vrot.slane %v2448_v24, 4  ;;  %v12756_v24 = vrot.slane %v2469_v38, 4 }
 0x10b   : > { %10165 = vmatpush3.bf16.msra.mxu0 %v11479_v54  ;;  %v3170_v54 = vrot.slane %v12737_v21, 5 }
 0x10c   : > { %10198 = vmatprep.subr.bf16.mxu0 %v12660_v36 }
 0x10e   : > { %10135 = vmatmul.mubr.bf16.gmra.mrb[16].mxu0 %v11469_v56  ;;  %v3155_v56 = vrot.slane %v3153_v1, 4 }
 0x10f   : > { %10138 = vmatprep.mubr.bf16.mxu0 %v11471_v47  ;;  %v12723_v47 = vsel %vm12177_vm5, %v8996_v40, %v3153_v1  ;;  %v12743_v1 = vsel %vm12177_vm5, %v3162_v7, %v3163_v42  ;;  %v12746_v40 = vld [vmem:[%s11679_s29 + $0xac] sm:$0xf]  ;;  %v8983_v42 = vld [vmem:[%s11679_s29 + $0xa8] sm:$0xe] }
 0x110   : > { %14624 = vst [vmem:[#allocation8_spill] sm:$0xff] %v12723_v47  ;;  %v12727_v8 = vsel %vm12177_vm5, %v3155_v56, %v3156_v39  ;;  %14627 = vst [vmem:[#allocation14_spill] sm:$0xff] %v12743_v1  ;;  %v8982_v56 = vld [vmem:[%s11679_s29 + $0x9c] sm:$0xe]  ;;  %v3177_v39 = vrot.slane %v12751_v49, 5  ;;  %v3169_v1 = vrot.slane %v3167_v48, 4 }
 0x111   : > { %14625 = vst [vmem:[#allocation12_spill] sm:$0xff] %v12727_v8  ;;  %v8998_v7 = vrot.slane %v8982_v56, 9  ;;  %v3174_v8 = vrot.slane %v12746_v40, 5  ;;  %v8999_v43 = vrot.slane %v8983_v42, 9  ;;  %v11477_v47 = vld [vmem:[%s11679_s29 + $0xb4] sm:$0xff]  }
 0x112   : > { %v12770_v56 = vsel %vm12177_vm5, %v3169_v1, %v3170_v54  ;;  %v12780_v42 = vld [vmem:[%s11679_s29 + $0xbc] sm:$0x1]  ;;  %v3181_v1 = vrot.slane %v12777_v63, 5  ;;  %v2334_v54 = vsel %vm11750_vm2, %v12524_v20, %v12526_v25 }
 0x113   : > { %v3176_v38 = vrot.slane %v3174_v8, 4  ;;  %14629 = vst [vmem:[#allocation11_spill] sm:$0xff] %v12770_v56  ;;  %v12774_v6 = vsel %vm12177_vm5, %v8999_v43, %v3174_v8  ;;  %14631 = vst [vmem:[#allocation16_spill] sm:$0xff] %v12780_v42  ;;  %v12794_v43 = vld [vmem:[%s11679_s29 + $0xc8] sm:$0x1]  ;;  %v3184_v46 = vrot.slane %v12780_v42, 5 }
 0x114   : > { %14630 = vst [vmem:[#allocation15_spill] sm:$0xff] %v12774_v6  ;;  %14634 = vst [vmem:[#allocation19_spill] sm:$0xff] %v12794_v43  ;;  %v8984_v8 = vld [vmem:[%s11679_s29 + $0xb4] sm:$0xe]  ;;  %v8906_v42 = vld [vmem:[%s11679_s29 + $0x6c] sm:$0xf] }
 0x115   : > { %v9000_v56 = vrot.slane %v8984_v8, 9  ;;  %v2493_v8 = vshrl.u32 %v12626_v26, 16 }
 0x116   : > { %10139 = vmatmul.mubr.bf16.gmra.mrb[20].mxu0 %v11472_v10  ;;  %v11475_v10 = vld [vmem:[%s11679_s29 + $0xa8] sm:$0xff]  }
 0x117   : > { %10142 = vmatprep.mubr.bf16.mxu0 %v11474_v3  ;;  %v12766_v3 = vsel %vm12177_vm5, %v8998_v7, %v3167_v48  ;;  %v12786_v48 = vsel %vm12177_vm5, %v3176_v38, %v3177_v39  ;;  %v12789_v7 = vld [vmem:[%s11679_s29 + $0xc4] sm:$0xf]  ;;  %v8985_v39 = vld [vmem:[%s11679_s29 + $0xc0] sm:$0xe]  ;;  %v12815_v6 = vsel %vm12177_vm5, %v9000_v56, %v3181_v1 }
 0x118   : > { %14628 = vst [vmem:[#allocation10_spill] sm:$0xff] %v12766_v3  ;;  %14632 = vst [vmem:[#allocation17_spill] sm:$0xff] %v12786_v48  ;;  %v3188_v38 = vrot.slane %v12789_v7, 5  ;;  %v3191_v3 = vrot.slane %v12794_v43, 5  ;;  %v9001_v48 = vrot.slane %v8985_v39, 9  ;;  %v2348_v39 = vsel %vm11750_vm2, %v12528_v4, %v12516_v27  ;;  %v11481_v4 = vld [vmem:[%s14513_s1 + $0x148] sm:$0xff]  }
 0x119   : > { %14633 = vst [vmem:[#allocation18_spill] sm:$0xff] %v12789_v7 }
 0x11a   : > { %v3190_v43 = vrot.slane %v3188_v38, 4 }
 0x11c   : > { %v12830_v25 = vsel %vm12177_vm5, %v3190_v43, %v3191_v3  ;;  %v2358_v3 = vsel %vm11750_vm2, %v12540_v15, %v12530_v17  ;;  %v2507_v43 = vshll.u32 %v8906_v42, 16  ;;  %v2462_v15 = vor.u32 %v12639_v35, %v12633_v52 }
 0x11d   : > { %v8947_v27 = vcombine.low %v2348_v39, %v2358_v3  ;;  %v2430_v52 = vsel %vm11750_vm2, %v12597_v62, %v12583_v50  ;;  %v14636_v35 = vshll.u32 %v12663_v57, 16  ;;  %v2537_v62 = vshll.u32 %v12666_v61, 16 }
 0x11e   : > { %10143 = vmatmul.mubr.bf16.gmra.mrb[24].mxu0 %v11475_v10  ;;  %v2324_v10 = vsel %vm11750_vm2, %v12518_v12, %v12504_v2  ;;  %v12824_v2 = vsel %vm12177_vm5, %v9001_v48, %v3188_v38  ;;  %v12836_v48 = vrot.slane %v2489_v29, 5  ;;  %v2372_v29 = vsel %vm11750_vm2, %v12550_v32, %v12543_v41 }
 0x11f   : > { %10146 = vmatprep.mubr.bf16.mxu0 %v11477_v47  ;;  %v3183_v47 = vrot.slane %v3181_v1, 4  ;;  %v8946_v12 = vcombine.low %v2324_v10, %v2334_v54  ;;  %v9033_v26 = vcombine.low %v12824_v2, %v12830_v25  ;;  %v2485_v1 = vrot.slane %v2483_v51, 5  ;;  %v12855_v51 = vld [vmem:[%s11679_s29 + $0x70] sm:$0xf]  ;;  %v11502_v2 = vld [vmem:[%s11679_s29 + $0x48] sm:$0xff]  }
 0x120   : > { %v2495_v54 = vrot.slane %v2493_v8, 4  ;;  %v2396_v41 = vsel %vm11750_vm2, %v12574_v9, %v12552_v31  ;;  %v2406_v32 = vsel %vm11750_vm2, %v12576_v30, %v12578_v45  ;;  %v11482_v31 = vld [vmem:[%s14513_s1 + $0x150] sm:$0xff]   ;;  %v2513_v9 = vshll.u32 %v12855_v51, 16  ;;  %v13129_v25 = vld [vmem:[%s11679_s29 + $0x58] sm:$0xf] }
 0x121   : > { %v12820_v7 = vsel %vm12177_vm5, %v3183_v47, %v3184_v46  ;;  %v14635_v46 = vshrl.u32 %v12683_v53, 16  ;;  %v2382_v53 = vsel %vm11750_vm2, %v12567_v60, %v12569_v59  ;;  %v2472_v60 = vor.u32 %v12756_v24, %v12678_v11 }
 0x122   : > { %v9032_v20 = vcombine.low %v12815_v6, %v12820_v7  ;;  %v8948_v17 = vcombine.low %v2372_v29, %v2382_v53  ;;  %v2420_v59 = vsel %vm11750_vm2, %v12595_v23, %v12571_v0  ;;  %v2517_v30 = vshrl.u32 %v12855_v51, 16  ;;  %v11483_v29 = vld [vmem:[%s14513_s1 + $0x158] sm:$0xff]   ;;  %v11504_v6 = vld [vmem:[%s14513_s1 + $0x1d0] sm:$0xff]  }
 0x123   : > { %v2482_v56 = vrot.slane %v14635_v46, 4  ;;  %v2463_v45 = vrot.slane %v2462_v15, 4  ;;  %v2477_v0 = vrot.slane %v14636_v35, 5  ;;  %v2509_v24 = vrot.slane %v2507_v43, 5  ;;  %v8915_v35 = vld [vmem:[%s11679_s29 + $0x90] sm:$0xf] }
 0x124   : > { %v2541_v10 = vshrl.u32 %v12666_v61, 16  ;;  %v2473_v47 = vrot.slane %v2472_v60, 4  ;;  %v8949_v46 = vcombine.low %v2396_v41, %v2406_v32  ;;  %v8950_v39 = vcombine.low %v2420_v59, %v2430_v52  ;;  %v11500_v7 = vld [vmem:[%s11679_s29 + $0x3c] sm:$0xff]  }
 0x125   : > { %v2486_v8 = vor.u32 %v2485_v1, %v2482_v56  ;;  %v12893_v3 = vrot.slane %v2513_v9, 5  ;;  %v2444_v43 = vsel %vm11750_vm2, %v12671_v33, %v12621_v16  ;;  %v2454_v61 = vsel %vm11750_vm2, %v12719_v22, %v12631_v58  ;;  %v12907_v56 = vld [vmem:[%s11679_s29 + $0x74] sm:$0x1] }
 0x126   : > { %10147 = vmatmul.mubr.bf16.gmra.mrb[28].mxu0 %v11478_v14  ;;  %v2504_v14 = vshrl.u32 %v8906_v42, 16  ;;  %v8909_v42 = vld [vmem:[%s11679_s29 + $0x78] sm:$0xf]  ;;  %v12913_v33 = vrot.slane %v2537_v62, 5  ;;  %v2478_v58 = vsel %vm11750_vm2, %v2473_v47, %v2477_v0  ;;  %v2523_v15 = vshll.u32 %v12907_v56, 16 }
 0x127   : > { %10166 = vmatprep.mubr.bf16.mxu0 %v8946_v12  ;;  %v2528_v38 = vshrl.u32 %v8909_v42, 16  ;;  %v2531_v50 = vshll.u32 %v8909_v42, 16  ;;  %v2499_v12 = vshll.u32 %v12629_v55, 16  ;;  %v2468_v55 = vsel %vm11750_vm2, %v2463_v45, %v12678_v11  ;;  %v11484_v45 = vld [vmem:[%s14513_s1 + $0x160] sm:$0xff]  }
 0x128   : > { %v2506_v23 = vrot.slane %v2504_v14, 4  ;;  %v2519_v14 = vrot.slane %v2517_v30, 4  ;;  %v2487_v22 = vrot.slane %v2486_v8, 4  ;;  %v2561_v32 = vshll.u32 %v12690_v19, 16 }
 0x129   : > { %v2530_v53 = vrot.slane %v2528_v38, 4  ;;  %v2533_v16 = vrot.slane %v2531_v50, 5  ;;  %v2501_v11 = vrot.slane %v2499_v12, 5  ;;  %v2565_v60 = vshrl.u32 %v12690_v19, 16 }
 0x12a   : > { %v2510_v1 = vor.u32 %v2509_v24, %v2506_v23  ;;  %v2547_v30 = vshll.u32 %v12669_v37, 16  ;;  %v8951_v0 = vcombine.low %v2444_v43, %v2454_v61  ;;  %v8952_v23 = vcombine.low %v2468_v55, %v2478_v58 }
 0x12b   : > { %v2534_v52 = vor.u32 %v2533_v16, %v2530_v53  ;;  %v2525_v38 = vrot.slane %v2523_v15, 5  ;;  %v12933_v37 = vrot.slane %v2561_v32, 5  ;;  %v2567_v47 = vrot.slane %v2565_v60, 4 }
 0x12c   : > { %v2511_v59 = vrot.slane %v2510_v1, 4  ;;  %v2576_v8 = vshrl.u32 %v8915_v35, 16  ;;  %v2585_v43 = vshll.u32 %v12701_v44, 16  ;;  %v2589_v61 = vshrl.u32 %v12701_v44, 16 }
 0x12d   : > { %v2613_v53 = vshrl.u32 %v12734_v34, 16 }
 0x12e   : > { %10167 = vmatmul.mubr.bf16.vlgmr.msra.gmra.mrb[0].mxu0 %v8947_v27  ;;  %v2543_v27 = vrot.slane %v2541_v10, 4  ;;  %v8918_v10 = vld [vmem:[%s11679_s29 + $0x9c] sm:$0xf]  ;;  %v2516_v12 = vsel %vm11750_vm2, %v2511_v59, %v12893_v3  ;;  %v2578_v58 = vrot.slane %v2576_v8, 4 }
 0x12f   : > { %10199 = vmatpush3.bf16.msra.mxu0 %v12660_v36  ;;  %10170 = vmatprep.mubr.bf16.mxu0 %v8948_v17  ;;  %v2496_v36 = vor.u32 %v2495_v54, %v12836_v48  ;;  %v8912_v54 = vld [vmem:[%s11679_s29 + $0x84] sm:$0xf]  ;;  %v2520_v17 = vor.u32 %v2519_v14, %v12893_v3  ;;  %v11485_v14 = vld [vmem:[%s14513_s1 + $0x168] sm:$0xff]   ;;  %v2600_v55 = vshrl.u32 %v8918_v10, 16  ;;  %v2603_v1 = vshll.u32 %v8918_v10, 16 }
 0x130   : > { %10200 = vmatprep.subr.bf16.mxu0 %v11481_v4  ;;  %v2552_v42 = vshrl.u32 %v8912_v54, 16  ;;  %v2555_v41 = vshll.u32 %v8912_v54, 16  ;;  %v2544_v9 = vor.u32 %v2543_v27, %v12913_v33  ;;  %v2571_v3 = vshll.u32 %v12693_v18, 16 }
 0x131   : > { %v2521_v24 = vrot.slane %v2520_v17, 4  ;;  %v2568_v27 = vor.u32 %v2567_v47, %v12933_v37  ;;  %v2591_v17 = vrot.slane %v2589_v61, 4  ;;  %v2602_v15 = vrot.slane %v2600_v55, 4 }
 0x132   : > { %v2554_v50 = vrot.slane %v2552_v42, 4  ;;  %v2557_v62 = vrot.slane %v2555_v41, 5  ;;  %v2605_v42 = vrot.slane %v2603_v1, 5  ;;  %v2573_v32 = vrot.slane %v2571_v3, 5 }
 0x133   : > { %10201 = vmatpush3.bf16.msra.mxu0 %v11481_v4  ;;  %v2497_v4 = vrot.slane %v2496_v36, 4  ;;  %v2579_v36 = vshll.u32 %v8915_v35, 16  ;;  %v2526_v54 = vsel %vm11750_vm2, %v2521_v24, %v2525_v38  ;;  %v2615_v59 = vrot.slane %v2613_v53, 4  ;;  %v8924_v38 = vld [vmem:[%s11679_s29 + $0xb4] sm:$0xf] }
 0x134   : > { %10202 = vmatprep.subr.bf16.mxu0 %v11482_v31  ;;  %v2558_v16 = vor.u32 %v2557_v62, %v2554_v50  ;;  %v8954_v41 = vcombine.low %v2516_v12, %v2526_v54  ;;  %v2637_v10 = vshrl.u32 %v12746_v40, 16  ;;  %v2648_v12 = vshrl.u32 %v8924_v38, 16 }
 0x135   : > { %v2502_v19 = vsel %vm11750_vm2, %v2497_v4, %v2501_v11  ;;  %v2581_v44 = vrot.slane %v2579_v36, 5  ;;  %v12957_v11 = vrot.slane %v2585_v43, 5 }
 0x136   : > { %10171 = vmatmul.mubr.bf16.gmra.mrb[4].mxu0 %v8949_v46  ;;  %v2535_v46 = vrot.slane %v2534_v52, 4  ;;  %v2559_v52 = vrot.slane %v2558_v16, 4  ;;  %v2639_v3 = vrot.slane %v2637_v10, 4  ;;  %v2650_v53 = vrot.slane %v2648_v12, 4 }
 0x137   : > { %10174 = vmatprep.mubr.bf16.mxu0 %v8950_v39  ;;  %10203 = vmatpush3.bf16.msra.mxu0 %v11482_v31  ;;  %v2492_v31 = vsel %vm11750_vm2, %v2487_v22, %v12836_v48  ;;  %v2545_v48 = vrot.slane %v2544_v9, 4  ;;  %v2549_v39 = vrot.slane %v2547_v30, 5  ;;  %v2569_v9 = vrot.slane %v2568_v27, 4 }
 0x138   : > { %10204 = vmatprep.subr.bf16.mxu0 %v11483_v29  ;;  %v8953_v22 = vcombine.low %v2492_v31, %v2502_v19  ;;  %v2540_v4 = vsel %vm11750_vm2, %v2535_v46, %v12913_v33  ;;  %v8921_v33 = vld [vmem:[%s11679_s29 + $0xa8] sm:$0xf]  ;;  %v2582_v30 = vor.u32 %v2581_v44, %v2578_v58  ;;  %v2606_v31 = vor.u32 %v2605_v42, %v2602_v15  ;;  %v8927_v58 = vld [vmem:[%s11679_s29 + $0xc0] sm:$0xf] }
 0x139   : > { %v2550_v18 = vsel %vm11750_vm2, %v2545_v48, %v2549_v39  ;;  %v2619_v19 = vshll.u32 %v12737_v21, 16  ;;  %v2624_v24 = vshrl.u32 %v8921_v33, 16  ;;  %v2627_v62 = vshll.u32 %v8921_v33, 16 }
 0x13a   : > { %v8955_v35 = vcombine.low %v2540_v4, %v2550_v18  ;;  %v2564_v47 = vsel %vm11750_vm2, %v2559_v52, %v12933_v37  ;;  %v2574_v8 = vsel %vm11750_vm2, %v2569_v9, %v2573_v32  ;;  %v2583_v36 = vrot.slane %v2582_v30, 4  ;;  %v14637_v32 = vld [vmem:[#allocation18_spill] sm:$0xff] }
 0x13b   : > { %10205 = vmatpush3.bf16.msra.mxu0 %v11483_v29  ;;  %v2609_v29 = vshll.u32 %v12734_v34, 16  ;;  %v11486_v34 = vld [vmem:[%s14513_s1 + $0x170] sm:$0xff]   ;;  %v2651_v46 = vshll.u32 %v8924_v38, 16  ;;  %v2657_v48 = vshll.u32 %v12777_v63, 16  ;;  %v2661_v39 = vshrl.u32 %v12777_v63, 16 }
 0x13c   : > { %10206 = vmatprep.subr.bf16.mxu0 %v11484_v45  ;;  %v2621_v43 = vrot.slane %v2619_v19, 5  ;;  %v2626_v61 = vrot.slane %v2624_v24, 4  ;;  %v2629_v1 = vrot.slane %v2627_v62, 5  ;;  %v2588_v44 = vsel %vm11750_vm2, %v2583_v36, %v12957_v11  ;;  %v14639_v36 = vld [vmem:[#allocation19_spill] sm:$0xff] }
 0x13d   : > { %v12959_v60 = vrot.slane %v2609_v29, 5  ;;  %v8956_v29 = vcombine.low %v2564_v47, %v2574_v8  ;;  %v2653_v16 = vrot.slane %v2651_v46, 5  ;;  %v2659_v63 = vrot.slane %v2657_v48, 5  ;;  %v11604_v48 = vld [vmem:[%s11679_s29 + $0x10] sm:$0xf] }
 0x13e   : > { %10175 = vmatmul.mubr.bf16.gmra.mrb[8].mxu0 %v8951_v0  ;;  %v11487_v0 = vld [vmem:[%s14513_s1 + $0x178] sm:$0xff]   ;;  %v2663_v27 = vrot.slane %v2661_v39, 4  ;;  %v2643_v4 = vshll.u32 %v12751_v49, 16  ;;  %v2672_v42 = vshrl.u32 %v8927_v58, 16  ;;  %v3083_v39 = vrot.slane %v11604_v48, 5 }
 0x13f   : > { %10178 = vmatprep.mubr.bf16.mxu0 %v8952_v23  ;;  %10207 = vmatpush3.bf16.msra.mxu0 %v11484_v45  ;;  %v2595_v45 = vshll.u32 %v12708_v13, 16  ;;  %v2592_v23 = vor.u32 %v2591_v17, %v12957_v11  ;;  %v2616_v50 = vor.u32 %v2615_v59, %v12959_v60  ;;  %v2633_v13 = vshll.u32 %v12746_v40, 16  ;;  %v12982_v40 = vld [vmem:[%s14513_s1 + $0x180] sm:$0xff]   ;;  %v14638_v49 = vld [vmem:[#allocation16_spill] sm:$0xff] }
 0x140   : > { %10208 = vmatprep.subr.bf16.mxu0 %v11485_v14  ;;  %v2630_v17 = vor.u32 %v2629_v1, %v2626_v61  ;;  %v2681_v11 = vshll.u32 %v14637_v32, 16  ;;  %v2685_v59 = vshrl.u32 %v14637_v32, 16  ;;  %v2654_v33 = vor.u32 %v2653_v16, %v2650_v53 }
 0x141   : > { %v2597_v21 = vrot.slane %v2595_v45, 5  ;;  %v2593_v37 = vrot.slane %v2592_v23, 4  ;;  %v2617_v55 = vrot.slane %v2616_v50, 4  ;;  %v2635_v54 = vrot.slane %v2633_v13, 5 }
 0x142   : > { %v2664_v52 = vor.u32 %v2663_v27, %v2659_v63  ;;  %v2667_v9 = vshll.u32 %v14638_v49, 16  ;;  %v2674_v23 = vrot.slane %v2672_v42, 4  ;;  %v2683_v19 = vrot.slane %v2681_v11, 5  ;;  %v11606_v27 = vld [vmem:[%s11679_s29 + $0x1c] sm:$0xf] }
 0x143   : > { %10209 = vmatpush3.bf16.msra.mxu0 %v11485_v14  ;;  %v2607_v14 = vrot.slane %v2606_v31, 4  ;;  %v2640_v15 = vor.u32 %v2639_v3, %v2635_v54  ;;  %v2687_v24 = vrot.slane %v2685_v59, 4  ;;  %v2655_v38 = vrot.slane %v2654_v33, 4  ;;  %v11608_v11 = vld [vmem:[%s11679_s29 + $0x20] sm:$0x1] }
 0x144   : > { %10210 = vmatprep.subr.bf16.mxu0 %v11486_v34  ;;  %v2665_v50 = vrot.slane %v2664_v52, 4  ;;  %v2669_v62 = vrot.slane %v2667_v9, 5  ;;  %v3085_v3 = vrot.slane %v3083_v39, 4  ;;  %v3093_v59 = vrot.slane %v11608_v11, 5  ;;  %v11609_v49 = vld [vmem:[%s11679_s29 + $0x2c] sm:$0x1] }
 0x145   : > { %v2612_v18 = vsel %vm11750_vm2, %v2607_v14, %v12959_v60  ;;  %v2641_v60 = vrot.slane %v2640_v15, 4  ;;  %v2688_v8 = vor.u32 %v2687_v24, %v2683_v19  ;;  %v2660_v12 = vsel %vm11750_vm2, %v2655_v38, %v2659_v63  ;;  %v8974_v38 = vld [vmem:[%s11679_s29 + $0x3c] sm:$0xe] }
 0x146   : > { %10179 = vmatmul.mubr.bf16.gmra.mrb[12].mxu0 %v8953_v22  ;;  %v2598_v22 = vsel %vm11750_vm2, %v2593_v37, %v2597_v21  ;;  %v2691_v21 = vshll.u32 %v14639_v36, 16  ;;  %v2670_v46 = vsel %vm11750_vm2, %v2665_v50, %v2669_v62  ;;  %v8970_v37 = vld [vmem:[%s11679_s29 + $0xc] sm:$0xe]  ;;  %v3100_v9 = vrot.slane %v11609_v49, 5  ;;  %v14644_v49 = vld [vmem:[#allocation5_spill] sm:$0xff] }
 0x147   : > { %10182 = vmatprep.mubr.bf16.mxu0 %v8954_v41  ;;  %10211 = vmatpush3.bf16.msra.mxu0 %v11486_v34  ;;  %v2622_v34 = vsel %vm11750_vm2, %v2617_v55, %v2621_v43  ;;  %v2675_v41 = vshll.u32 %v8927_v58, 16  ;;  %v8957_v30 = vcombine.low %v2588_v44, %v2598_v22  ;;  %v8960_v43 = vcombine.low %v2660_v12, %v2670_v46  ;;  %v11489_v36 = vld [vmem:[%s14513_s1 + $0x188] sm:$0xff]   ;;  %v11613_v46 = vld [vmem:[%s11679_s29 + $0x44] sm:$0x1] }
 0x148   : > { %10212 = vmatprep.subr.bf16.mxu0 %v11487_v0  ;;  %v8958_v45 = vcombine.low %v2612_v18, %v2622_v34  ;;  %v2689_v55 = vrot.slane %v2688_v8, 4  ;;  %v2693_v1 = vrot.slane %v2691_v21, 5  ;;  %v3090_v58 = vrot.slane %v11606_v27, 5  ;;  %v11607_v18 = vld [vmem:[%s11679_s29 + $0x28] sm:$0xf] }
 0x149   : > { %v2677_v31 = vrot.slane %v2675_v41, 5  ;;  %v3097_v34 = vrot.slane %v11607_v18, 5  ;;  %v8990_v21 = vrot.slane %v8974_v38, 9  ;;  %v3114_v48 = vrot.slane %v11613_v46, 5  ;;  %v11501_v46 = vld [vmem:[%s14513_s1 + $0x1c8] sm:$0xff]  }
 0x14a   : > { %v2694_v63 = vsel %vm11750_vm2, %v2689_v55, %v2693_v1  ;;  %v3092_v32 = vrot.slane %v3090_v58, 4  ;;  %v11614_v55 = vld [vmem:[%s11679_s29 + $0x58] sm:$0xf]  ;;  %v8976_v1 = vld [vmem:[%s11679_s29 + $0x54] sm:$0xe] }
 0x14b   : > { %10213 = vmatpush3.bf16.msra.mxu0 %v11487_v0  ;;  %v2645_v0 = vrot.slane %v2643_v4, 5  ;;  %v2678_v47 = vor.u32 %v2677_v31, %v2674_v23  ;;  %v8971_v4 = vld [vmem:[%s11679_s29 + $0x18] sm:$0xe]  ;;  %v3099_v52 = vrot.slane %v3097_v34, 4  ;;  %v8973_v31 = vld [vmem:[%s11679_s29 + $0x30] sm:$0xe] }
 0x14c   : > { %10246 = vmatprep.subr.bf16.mxu0 %v12982_v40  ;;  %v8987_v41 = vrot.slane %v8971_v4, 9 }
 0x14d   : > { %v2646_v10 = vsel %vm11750_vm2, %v2641_v60, %v2645_v0  ;;  %v2679_v61 = vrot.slane %v2678_v47, 4  ;;  %v3101_v23 = vsel %vm12177_vm5, %v3099_v52, %v3100_v9  ;;  %v11612_v47 = vld [vmem:[%s11679_s29 + $0x38] sm:$0x1]  ;;  %v14643_v52 = vld [vmem:[#allocation6_spill] sm:$0xff] }
 0x14e   : > { %10183 = vmatmul.mubr.bf16.gmra.mrb[16].mxu0 %v8955_v35  ;;  %v2631_v35 = vrot.slane %v2630_v17, 4  ;;  %v8972_v17 = vld [vmem:[%s11679_s29 + $0x24] sm:$0xe]  ;;  %v3107_v8 = vrot.slane %v11612_v47, 5  ;;  %v14645_v9 = vcombine.low %v14643_v52, %v14644_v49 }
 0x14f   : > { %10186 = vmatprep.mubr.bf16.mxu0 %v8956_v29  ;;  %v11605_v29 = vld [vmem:[%s11679_s29 + $0x14] sm:$0x1]  ;;  %v2684_v16 = vsel %vm11750_vm2, %v2679_v61, %v2683_v19  ;;  %v8988_v33 = vrot.slane %v8972_v17, 9  ;;  %v11611_v19 = vld [vmem:[%s11679_s29 + $0x40] sm:$0xf]  ;;  %v3142_v17 = vrot.slane %v12907_v56, 5 }
 0x150   : > { %v2636_v13 = vsel %vm11750_vm2, %v2631_v35, %v2635_v54  ;;  %v8986_v54 = vrot.slane %v8970_v37, 9  ;;  %v3086_v53 = vrot.slane %v11605_v29, 5  ;;  %v8961_v15 = vcombine.low %v2684_v16, %v2694_v63  ;;  %v11610_v35 = vld [vmem:[%s11679_s29 + $0x34] sm:$0xf]  ;;  %v11491_v63 = vld [vmem:[%s14513_s1 + $0x198] sm:$0xff]   ;;  %v14659_v47 = vld [vmem:[#allocation17_spill] sm:$0xff] }
 0x151   : > { %v8959_v14 = vcombine.low %v2636_v13, %v2646_v10  ;;  %v3104_v60 = vrot.slane %v11610_v35, 5  ;;  %v3098_v0 = vsel %vm12177_vm5, %v8988_v33, %v3097_v34  ;;  %v3111_v24 = vrot.slane %v11611_v19, 5  ;;  %v11490_v61 = vld [vmem:[%s14513_s1 + $0x190] sm:$0xff]   ;;  %v11495_v33 = vld [vmem:[%s14513_s1 + $0x1b8] sm:$0xff]   ;;  %v14652_v19 = vld [vmem:[#allocation13_spill] sm:$0xff] }
 0x152   : > { %v3084_v44 = vsel %vm12177_vm5, %v8986_v54, %v3083_v39  ;;  %v3087_v22 = vsel %vm12177_vm5, %v3085_v3, %v3086_v53  ;;  %v9020_v62 = vcombine.low %v3098_v0, %v3101_v23  ;;  %v8989_v13 = vrot.slane %v8973_v31, 9  ;;  %v11494_v56 = vld [vmem:[%s14513_s1 + $0x1b0] sm:$0xff]   ;;  %v14649_v0 = vld [vmem:[#allocation8_spill] sm:$0xff] }
 0x153   : > { %v9018_v42 = vcombine.low %v3084_v44, %v3087_v22  ;;  %v3106_v10 = vrot.slane %v3104_v60, 4  ;;  %v3113_v12 = vrot.slane %v3111_v24, 4  ;;  %v8992_v29 = vrot.slane %v8976_v1, 9  ;;  %v8978_v22 = vld [vmem:[%s11679_s29 + $0x6c] sm:$0xe]  ;;  %v14647_v35 = vld [vmem:[#allocation7_spill] sm:$0xff] }
 0x154   : > { %v3105_v39 = vsel %vm12177_vm5, %v8989_v13, %v3104_v60  ;;  %v3128_v16 = vrot.slane %v12663_v57, 5  ;;  %v3139_v44 = vrot.slane %v12855_v51, 5  ;;  %v11492_v57 = vld [vmem:[%s14513_s1 + $0x1a0] sm:$0xff]   ;;  %v8994_v18 = vrot.slane %v8978_v22, 9  ;;  %v14650_v23 = vld [vmem:[#allocation12_spill] sm:$0xff] }
 0x155   : > { %v3108_v37 = vsel %vm12177_vm5, %v3106_v10, %v3107_v8  ;;  %v14651_v31 = vcombine.low %v14649_v0, %v14650_v23  ;;  %v14658_v10 = vld [vmem:[#allocation15_spill] sm:$0xff]  ;;  %v13143_v1 = vld [vmem:[%s11679_s29 + $0x1c] sm:$0xf] }
 0x156   : > { %10187 = vmatmul.mubr.bf16.gmra.mrb[20].mxu0 %v8957_v30  ;;  %v3091_v30 = vsel %vm12177_vm5, %v8987_v41, %v3090_v58  ;;  %v9021_v54 = vcombine.low %v3105_v39, %v3108_v37  ;;  %v3141_v34 = vrot.slane %v3139_v44, 4  ;;  %v14641_v41 = vld [vmem:[#allocation4_spill] sm:$0xff]  ;;  %v3140_v51 = vsel %vm12177_vm5, %v8994_v18, %v3139_v44 }
 0x157   : > { %10190 = vmatprep.mubr.bf16.mxu0 %v8958_v45  ;;  %v3094_v45 = vsel %vm12177_vm5, %v3092_v32, %v3093_v59  ;;  %v14660_v8 = vcombine.low %v14658_v10, %v14659_v47  ;;  %v4757_v39 = vrot.slane %v13129_v25, 5  ;;  %v3964_v22 = vshrl.u32 %v13143_v1, 16  ;;  %v11508_v23 = vld [vmem:[%s11679_s29 + $0x78] sm:$0xff]  }
 0x158   : > { %v9019_v50 = vcombine.low %v3091_v30, %v3094_v45  ;;  %v3143_v11 = vsel %vm12177_vm5, %v3141_v34, %v3142_v17  ;;  %v11498_v30 = vld [vmem:[%s14513_s1 + $0x1c0] sm:$0xff]   ;;  %v13166_v34 = vld [vmem:[%s11679_s29 + $0x70] sm:$0xf]  ;;  %v13169_v17 = vld [vmem:[%s11679_s29 + $0x74] sm:$0x1] }
 0x159   : > { %v9026_v59 = vcombine.low %v3140_v51, %v3143_v11  ;;  %v14646_v45 = vld [vmem:[#allocation9_spill] sm:$0xff]  ;;  %v4774_v51 = vrot.slane %v13169_v17, 5  ;;  %v11516_v11 = vld [vmem:[%s14513_s1 + $0x1f0] sm:$0xff]   ;;  %v3966_v49 = vrot.slane %v3964_v22, 4 }
 0x15a   : > { %v14648_v60 = vcombine.low %v14646_v45, %v14647_v35  ;;  %v13183_v45 = vld [vmem:[%s11679_s29 + $0x20] sm:$0x1]  ;;  %v11511_v22 = vld [vmem:[%s11679_s29 + $0x90] sm:$0xff]  }
 0x15e   : > { %10191 = vmatmul.mubr.bf16.gmra.mrb[24].mxu0 %v8959_v14  ;;  %v3112_v14 = vsel %vm12177_vm5, %v8990_v21, %v3111_v24  ;;  %v14653_v24 = vld [vmem:[#allocation14_spill] sm:$0xff] }
 0x15f   : > { %10194 = vmatprep.mubr.bf16.mxu0 %v8960_v43  ;;  %v3115_v43 = vsel %vm12177_vm5, %v3113_v12, %v3114_v48  ;;  %v14654_v38 = vcombine.low %v14652_v19, %v14653_v24  ;;  %v11497_v21 = vld [vmem:[%s11679_s29 + $0x24] sm:$0xff]   ;;  %v11499_v12 = vld [vmem:[%s11679_s29 + $0x30] sm:$0xff]  }
 0x160   : > { %v9022_v3 = vcombine.low %v3112_v14, %v3115_v43  ;;  %v9207_v48 = vld [vmem:[%s11679_s29 + $0x54] sm:$0xe]  ;;  %v11510_v14 = vld [vmem:[%s14513_s1 + $0x1e0] sm:$0xff]  }
 0x161   : > { %v9223_v43 = vrot.slane %v9207_v48, 9 }
 0x166   : > { %10195 = vmatmul.mubr.bf16.gmra.mrb[28].mxu0 %v8961_v15  ;;  %v11493_v15 = vld [vmem:[%s14513_s1 + $0x1a8] sm:$0xff]  }
 0x167   : > { %10214 = vmatprep.mubr.bf16.mxu0 %v9018_v42  ;;  %v14640_v42 = vld [vmem:[#allocation3_spill] sm:$0xff] }
 0x168   : > { %v14642_v32 = vcombine.low %v14640_v42, %v14641_v41  ;;  %v9209_v41 = vld [vmem:[%s11679_s29 + $0x6c] sm:$0xe] }
 0x16e   : > { %10215 = vmatmul.mubr.bf16.vlgmr.msra.gmra.mrb[0].mxu0 %v9019_v50  ;;  %v14655_v50 = vld [vmem:[#allocation10_spill] sm:$0xff] }
 0x16f   : > { %10247 = vmatpush3.bf16.msra.mxu0 %v12982_v40  ;;  %10218 = vmatprep.mubr.bf16.mxu0 %v9020_v62  ;;  %v3125_v40 = vrot.slane %v11614_v55, 5  ;;  %v14656_v62 = vld [vmem:[#allocation11_spill] sm:$0xff]  ;;  %v4759_v55 = vrot.slane %v4757_v39, 4 }
 0x170   : > { %10248 = vmatprep.subr.bf16.mxu0 %v11489_v36  ;;  %v14657_v13 = vcombine.low %v14655_v50, %v14656_v62  ;;  %v11519_v50 = vld [vmem:[%s14513_s1 + $0x1f8] sm:$0xff]   ;;  %v9120_v62 = vld [vmem:[%s11679_s29 + $0x30] sm:$0xf] }
 0x171   : > { %v3127_v53 = vrot.slane %v3125_v40, 4  ;;  %v3126_v27 = vsel %vm12177_vm5, %v8992_v29, %v3125_v40  ;;  %v11503_v40 = vld [vmem:[%s11679_s29 + $0x54] sm:$0xff]   ;;  %v9117_v29 = vld [vmem:[%s11679_s29 + $0x24] sm:$0xf] }
 0x172   : > { %v3978_v18 = vshll.u32 %v9117_v29, 16 }
 0x173   : > { %10249 = vmatpush3.bf16.msra.mxu0 %v11489_v36  ;;  %v3129_v58 = vsel %vm12177_vm5, %v3127_v53, %v3128_v16  ;;  %v11496_v36 = vld [vmem:[%s11679_s29 + $0x18] sm:$0xff]   ;;  %v11513_v16 = vld [vmem:[%s14513_s1 + $0x1e8] sm:$0xff]  }
 0x174   : > { %10250 = vmatprep.subr.bf16.mxu0 %v11490_v61  ;;  %v9024_v4 = vcombine.low %v3126_v27, %v3129_v58  ;;  %v13159_v27 = vld [vmem:[%s11679_s29 + $0x28] sm:$0xf]  ;;  %v9215_v58 = vld [vmem:[%s11679_s29 + $0xb4] sm:$0xe] }
 0x175   : > { %v3988_v42 = vshrl.u32 %v13159_v27, 16 }
 0x176   : > { %10219 = vmatmul.mubr.bf16.gmra.mrb[4].mxu0 %v9021_v54  ;;  %v13147_v54 = vsel %vm12177_vm5, %v9223_v43, %v4757_v39  ;;  %v13221_v39 = vld [vmem:[%s14513_s1 + $0x200] sm:$0xff]  }
 0x177   : > { %10222 = vmatprep.mubr.bf16.mxu0 %v9022_v3  ;;  %10251 = vmatpush3.bf16.msra.mxu0 %v11490_v61  ;;  %v9114_v61 = vld [vmem:[%s11679_s29 + $0x18] sm:$0xf]  ;;  %14661 = vst [vmem:[#allocation18_spill] sm:$0xff] %v13147_v54  ;;  %v11505_v3 = vld [vmem:[%s11679_s29 + $0x60] sm:$0xff]   ;;  %v3990_v24 = vrot.slane %v3988_v42, 4  ;;  %v11518_v54 = vld [vmem:[%s11679_s29 + $0xcc] sm:$0xff]  }
 0x178   : > { %10252 = vmatprep.subr.bf16.mxu0 %v11491_v63  ;;  %v3954_v44 = vshll.u32 %v9114_v61, 16 }
 0x17b   : > { %10253 = vmatpush3.bf16.msra.mxu0 %v11491_v63  ;;  %v3951_v63 = vshrl.u32 %v9114_v61, 16 }
 0x17c   : > { %10254 = vmatprep.subr.bf16.mxu0 %v11492_v57 }
 0x17e   : > { %10223 = vmatmul.mubr.bf16.gmra.mrb[8].mxu0 %v14642_v32  ;;  %v4771_v32 = vrot.slane %v13166_v34, 5 }
 0x17f   : > { %10226 = vmatprep.mubr.bf16.mxu0 %v9024_v4  ;;  %10255 = vmatpush3.bf16.msra.mxu0 %v11492_v57  ;;  %v3960_v57 = vshll.u32 %v13143_v1, 16  ;;  %v3975_v4 = vshrl.u32 %v9117_v29, 16  ;;  %v11509_v29 = vld [vmem:[%s11679_s29 + $0x84] sm:$0xff]  }
 0x180   : > { %10256 = vmatprep.subr.bf16.mxu0 %v11493_v15 }
 0x181   : > { %v13179_v52 = vrot.slane %v3960_v57, 5  ;;  %v3977_v35 = vrot.slane %v3975_v4, 4 }
 0x183   : > { %10257 = vmatpush3.bf16.msra.mxu0 %v11493_v15  ;;  %v3984_v15 = vshll.u32 %v13159_v27, 16  ;;  %v3967_v47 = vor.u32 %v3966_v49, %v13179_v52  ;;  %v13266_v49 = vld [vmem:[%s11679_s29 + $0x98] sm:$0x1] }
 0x184   : > { %10258 = vmatprep.subr.bf16.mxu0 %v11494_v56 }
 0x185   : > { %v13193_v19 = vrot.slane %v3984_v15, 5  ;;  %v13228_v61 = vrot.slane %v3967_v47, 4 }
 0x186   : > { %10227 = vmatmul.mubr.bf16.gmra.mrb[12].mxu0 %v14645_v9  ;;  %v4773_v9 = vrot.slane %v4771_v32, 4 }
 0x187   : > { %10230 = vmatprep.mubr.bf16.mxu0 %v9026_v59  ;;  %10259 = vmatpush3.bf16.msra.mxu0 %v11494_v56  ;;  %v3953_v56 = vrot.slane %v3951_v63, 4  ;;  %v9225_v59 = vrot.slane %v9209_v41, 9 }
 0x188   : > { %10260 = vmatprep.subr.bf16.mxu0 %v11495_v33 }
 0x189   : > { %v13187_v0 = vsel %vm12177_vm5, %v9225_v59, %v4771_v32  ;;  %v13255_v32 = vld [vmem:[%s11679_s29 + $0x40] sm:$0xf]  ;;  %v13260_v59 = vld [vmem:[%s11679_s29 + $0x38] sm:$0x1] }
 0x18a   : > { %14663 = vst [vmem:[#allocation19_spill] sm:$0xff] %v13187_v0 }
 0x18b   : > { %10261 = vmatpush3.bf16.msra.mxu0 %v11495_v33  ;;  %v3956_v33 = vrot.slane %v3954_v44, 5  ;;  %v4002_v44 = vshll.u32 %v9120_v62, 16 }
 0x18c   : > { %10294 = vmatprep.subr.bf16.mxu0 %v11498_v30 }
 0x18d   : > { %v3957_v10 = vor.u32 %v3956_v33, %v3953_v56  ;;  %v13263_v33 = vld [vmem:[%s11679_s29 + $0x94] sm:$0xf]  ;;  %v13341_v56 = vld [vmem:[%s11679_s29 + $0xbc] sm:$0x1] }
 0x18e   : > { %10231 = vmatmul.mubr.bf16.gmra.mrb[16].mxu0 %v14648_v60  ;;  %v3980_v60 = vrot.slane %v3978_v18, 5 }
 0x18f   : > { %10234 = vmatprep.mubr.bf16.mxu0 %v14651_v31  ;;  %v13191_v31 = vld [vmem:[%s11679_s29 + $0x2c] sm:$0x1]  ;;  %v13226_v43 = vrot.slane %v3957_v10, 4 }
 0x196   : > { %10235 = vmatmul.mubr.bf16.gmra.mrb[20].mxu0 %v14654_v38  ;;  %v13197_v38 = vsel %vm12177_vm5, %v4773_v9, %v4774_v51  ;;  %v13269_v9 = vld [vmem:[%s11679_s29 + $0xa0] sm:$0xf] }
 0x197   : > { %10238 = vmatprep.mubr.bf16.mxu0 %v14657_v13  ;;  %14664 = vst [vmem:[#allocation3_spill] sm:$0xff] %v13197_v38  ;;  %v4799_v10 = vrot.slane %v13269_v9, 5  ;;  %v9214_v13 = vld [vmem:[%s11679_s29 + $0xa8] sm:$0xe] }
 0x19e   : > { %10239 = vmatmul.mubr.bf16.gmra.mrb[24].mxu0 %v14660_v8  ;;  %v3970_v8 = vshll.u32 %v13183_v45, 16 }
 0x19f   : > { %10242 = vmatprep.mubr.bf16.mxu0 %v9032_v20  ;;  %v11507_v20 = vld [vmem:[%s14513_s1 + $0x1d8] sm:$0xff]  }
 0x1a6   : > { %10243 = vmatmul.mubr.bf16.gmra.mrb[28].mxu0 %v9033_v26  ;;  %v13132_v26 = vld [vmem:[%s11679_s29 + $0x5c] sm:$0x1] }
 0x1a7   : > { %10262 = vmatprep.mubr.bf16.mxu0 %v11496_v36  ;;  %v4760_v37 = vrot.slane %v13132_v26, 5  ;;  %v3981_v36 = vor.u32 %v3980_v60, %v3977_v35  ;;  %v9212_v35 = vld [vmem:[%s11679_s29 + $0x90] sm:$0xe]  ;;  %v4792_v60 = vrot.slane %v13263_v33, 5 }
 0x1a9   : > { %v13153_v53 = vsel %vm12177_vm5, %v4759_v55, %v4760_v37  ;;  %v13224_v37 = vld [vmem:[%s11679_s29 + $0x34] sm:$0xf]  ;;  %v13230_v55 = vrot.slane %v3970_v8, 5  ;;  %v4004_v8 = vrot.slane %v4002_v44, 5 }
 0x1aa   : > { %14662 = vst [vmem:[#allocation16_spill] sm:$0xff] %v13153_v53  ;;  %v4008_v15 = vshll.u32 %v13224_v37, 16  ;;  %v4012_v41 = vshrl.u32 %v13224_v37, 16  ;;  %v13424_v53 = vld [vmem:[%s11679_s29 + $0x64] sm:$0xf] }
 0x1ab   : > { %14677 = vst [vmem:[#allocation17_spill] sm:$0xff] %v13424_v53 }
 0x1ae   : > { %10263 = vmatmul.mubr.bf16.vlgmr.msra.gmra.mrb[0].mxu0 %v11497_v21  ;;  %v3994_v21 = vshll.u32 %v13191_v31, 16 }
 0x1af   : > { %10295 = vmatpush3.bf16.msra.mxu0 %v11498_v30  ;;  %10266 = vmatprep.mubr.bf16.mxu0 %v11499_v12  ;;  %v11506_v30 = vld [vmem:[%s11679_s29 + $0x6c] sm:$0xff]   ;;  %v13209_v12 = vld [vmem:[%s11679_s29 + $0x88] sm:$0xf] }
 0x1b0   : > { %10296 = vmatprep.subr.bf16.mxu0 %v11501_v46  ;;  %v13236_v63 = vrot.slane %v3994_v21, 5  ;;  %v4794_v21 = vrot.slane %v4792_v60, 4 }
 0x1b3   : > { %10297 = vmatpush3.bf16.msra.mxu0 %v11501_v46  ;;  %v13212_v46 = vld [vmem:[%s11679_s29 + $0x8c] sm:$0x1] }
 0x1b4   : > { %10298 = vmatprep.subr.bf16.mxu0 %v11504_v6  ;;  %v4788_v48 = vrot.slane %v13212_v46, 5 }
 0x1b6   : > { %10267 = vmatmul.mubr.bf16.gmra.mrb[4].mxu0 %v11500_v7  ;;  %v3999_v7 = vshrl.u32 %v9120_v62, 16  ;;  %v9213_v62 = vld [vmem:[%s11679_s29 + $0x9c] sm:$0xe] }
 0x1b7   : > { %10270 = vmatprep.mubr.bf16.mxu0 %v11502_v2  ;;  %10299 = vmatpush3.bf16.msra.mxu0 %v11504_v6  ;;  %v3991_v6 = vor.u32 %v3990_v24, %v13193_v19  ;;  %v9211_v2 = vld [vmem:[%s11679_s29 + $0x84] sm:$0xe]  ;;  %v4032_v24 = vshll.u32 %v13255_v32, 16 }
 0x1b8   : > { %10300 = vmatprep.subr.bf16.mxu0 %v11507_v20  ;;  %v13245_v18 = vrot.slane %v3999_v7, 4  ;;  %v4014_v7 = vrot.slane %v4012_v41, 4 }
 0x1b9   : > { %v13243_v4 = vrot.slane %v3991_v6, 4  ;;  %v9229_v6 = vrot.slane %v9213_v62, 9  ;;  %v13317_v62 = vld [vmem:[%s11679_s29 + $0x4c] sm:$0xf] }
 0x1bb   : > { %10301 = vmatpush3.bf16.msra.mxu0 %v11507_v20  ;;  %v4785_v20 = vrot.slane %v13209_v12, 5 }
 0x1bc   : > { %10302 = vmatprep.subr.bf16.mxu0 %v11510_v14 }
 0x1be   : > { %10271 = vmatmul.mubr.bf16.gmra.mrb[8].mxu0 %v11503_v40  ;;  %v9123_v40 = vld [vmem:[%s11679_s29 + $0x3c] sm:$0xf] }
 0x1bf   : > { %10274 = vmatprep.mubr.bf16.mxu0 %v11505_v3  ;;  %10303 = vmatpush3.bf16.msra.mxu0 %v11510_v14  ;;  %v9227_v14 = vrot.slane %v9211_v2, 9  ;;  %v4787_v3 = vrot.slane %v4785_v20, 4  ;;  %v4023_v51 = vshrl.u32 %v9123_v40, 16  ;;  %v13284_v2 = vld [vmem:[%s11679_s29 + $0x44] sm:$0x1] }
 0x1c0   : > { %10304 = vmatprep.subr.bf16.mxu0 %v11513_v16  ;;  %14667 = vst [vmem:[#allocation5_spill] sm:$0xff] %v13284_v2 }
 0x1c1   : > { %v13240_v57 = vsel %vm12177_vm5, %v9227_v14, %v4785_v20  ;;  %v13250_v42 = vsel %vm12177_vm5, %v4787_v3, %v4788_v48  ;;  %v9126_v20 = vld [vmem:[%s11679_s29 + $0x48] sm:$0xf]  ;;  %v4801_v14 = vrot.slane %v4799_v10, 4  ;;  %v4018_v3 = vshll.u32 %v13260_v59, 16 }
 0x1c2   : > { %14665 = vst [vmem:[#allocation4_spill] sm:$0xff] %v13240_v57  ;;  %14666 = vst [vmem:[#allocation6_spill] sm:$0xff] %v13250_v42 }
 0x1c3   : > { %10305 = vmatpush3.bf16.msra.mxu0 %v11513_v16  ;;  %v13234_v16 = vrot.slane %v3981_v36, 4  ;;  %v13281_v36 = vrot.slane %v4008_v15, 5  ;;  %v11514_v15 = vld [vmem:[%s11679_s29 + $0xa8] sm:$0xff]  }
 0x1c4   : > { %10306 = vmatprep.subr.bf16.mxu0 %v11516_v11 }
 0x1c6   : > { %10275 = vmatmul.mubr.bf16.gmra.mrb[12].mxu0 %v11506_v30  ;;  %v13272_v30 = vld [vmem:[%s11679_s29 + $0xa4] sm:$0x1] }
 0x1c7   : > { %10278 = vmatprep.mubr.bf16.mxu0 %v11508_v23  ;;  %10307 = vmatpush3.bf16.msra.mxu0 %v11516_v11  ;;  %v4026_v11 = vshll.u32 %v9123_v40, 16  ;;  %v4795_v23 = vrot.slane %v13266_v49, 5  ;;  %v4802_v47 = vrot.slane %v13272_v30, 5  ;;  %v11512_v40 = vld [vmem:[%s11679_s29 + $0x9c] sm:$0xff]  }
 0x1c8   : > { %10308 = vmatprep.subr.bf16.mxu0 %v11519_v50 }
 0x1c9   : > { %v13297_v44 = vsel %vm12177_vm5, %v4794_v21, %v4795_v23  ;;  %v13304_v41 = vrot.slane %v4026_v11, 5  ;;  %v4036_v23 = vshrl.u32 %v13255_v32, 16  ;;  %v4005_v21 = vor.u32 %v4004_v8, %v13245_v18 }
 0x1ca   : > { %14669 = vst [vmem:[#allocation7_spill] sm:$0xff] %v13297_v44  ;;  %v3973_v11 = vsel %vm11750_vm2, %v13228_v61, %v13230_v55  ;;  %v4050_v18 = vshll.u32 %v9126_v20, 16  ;;  %v9230_v8 = vrot.slane %v9214_v13, 9  ;;  %v4056_v61 = vshll.u32 %v13317_v62, 16 }
 0x1cb   : > { %10309 = vmatpush3.bf16.msra.mxu0 %v11519_v50  ;;  %v9228_v50 = vrot.slane %v9212_v35, 9  ;;  %v13306_v35 = vrot.slane %v4032_v24, 5  ;;  %v3963_v24 = vsel %vm11750_vm2, %v13226_v43, %v13179_v52  ;;  %v4060_v55 = vshrl.u32 %v13317_v62, 16 }
 0x1cc   : > { %10342 = vmatprep.subr.bf16.mxu0 %v13221_v39  ;;  %v13351_v44 = vrot.slane %v4005_v21, 4  ;;  %v4038_v57 = vrot.slane %v4036_v23, 4 }
 0x1cd   : > { %v13289_v48 = vsel %vm12177_vm5, %v9228_v50, %v4792_v60  ;;  %v13312_v60 = vsel %vm12177_vm5, %v4801_v14, %v4802_v47  ;;  %v4042_v50 = vshll.u32 %v13284_v2, 16  ;;  %v13327_v47 = vld [vmem:[%s11679_s29 + $0xac] sm:$0xf]  ;;  %v13333_v14 = vld [vmem:[%s11679_s29 + $0xb8] sm:$0xf]  ;;  %v4080_v2 = vshll.u32 %v13129_v25, 16 }
 0x1ce   : > { %10279 = vmatmul.mubr.bf16.gmra.mrb[16].mxu0 %v11509_v29  ;;  %14668 = vst [vmem:[#allocation9_spill] sm:$0xff] %v13289_v48  ;;  %v13293_v29 = vrot.slane %v4023_v51, 4  ;;  %14671 = vst [vmem:[#allocation12_spill] sm:$0xff] %v13312_v60  ;;  %v4015_v51 = vor.u32 %v4014_v7, %v13281_v36  ;;  %v4806_v52 = vrot.slane %v13327_v47, 5  ;;  %v4816_v60 = vrot.slane %v13341_v56, 5 }
 0x1cf   : > { %10282 = vmatprep.mubr.bf16.mxu0 %v11511_v22  ;;  %v13301_v22 = vsel %vm12177_vm5, %v9229_v6, %v4799_v10  ;;  %v4047_v10 = vshrl.u32 %v9126_v20, 16  ;;  %v13330_v6 = vld [vmem:[%s11679_s29 + $0xb0] sm:$0x1]  ;;  %v13353_v48 = vrot.slane %v4018_v3, 5  ;;  %v11517_v3 = vld [vmem:[%s11679_s29 + $0xc0] sm:$0xff]   ;;  %v13371_v21 = vrot.slane %v4042_v50, 5 }
 0x1d0   : > { %14670 = vst [vmem:[#allocation8_spill] sm:$0xff] %v13301_v22  ;;  %v4809_v43 = vrot.slane %v13330_v6, 5  ;;  %v4808_v7 = vrot.slane %v4806_v52, 4  ;;  %v9231_v22 = vrot.slane %v9215_v58, 9  ;;  %v13357_v13 = vsel %vm12177_vm5, %v9230_v8, %v4806_v52  ;;  %v9129_v8 = vld [vmem:[%s11679_s29 + $0x54] sm:$0xf] }
 0x1d1   : > { %14672 = vst [vmem:[#allocation13_spill] sm:$0xff] %v13357_v13  ;;  %v13360_v42 = vrot.slane %v4015_v51, 4  ;;  %v4049_v52 = vrot.slane %v4047_v10, 4  ;;  %v9178_v10 = vcombine.low %v3963_v24, %v3973_v11  ;;  %v3987_v51 = vsel %vm11750_vm2, %v13234_v16, %v13193_v19  ;;  %v13412_v11 = vld [vmem:[%s11679_s29 + $0xd4] sm:$0x1] }
 0x1d2   : > { %v13364_v38 = vsel %vm12177_vm5, %v4808_v7, %v4809_v43  ;;  %v13381_v43 = vld [vmem:[%s11679_s29 + $0x50] sm:$0x1]  ;;  %v4062_v7 = vrot.slane %v4060_v55, 4  ;;  %v13401_v55 = vld [vmem:[%s11679_s29 + $0xc8] sm:$0x1]  ;;  %v4011_v19 = vsel %vm11750_vm2, %v13351_v44, %v13281_v36  ;;  %v4039_v16 = vor.u32 %v4038_v57, %v13306_v35 }
 0x1d3   : > { %14673 = vst [vmem:[#allocation14_spill] sm:$0xff] %v13364_v38  ;;  %14676 = vst [vmem:[#allocation15_spill] sm:$0xff] %v13381_v43  ;;  %v4066_v57 = vshll.u32 %v13381_v43, 16  ;;  %v9132_v44 = vld [vmem:[%s11679_s29 + $0x60] sm:$0xf]  ;;  %v4074_v0 = vshll.u32 %v9129_v8, 16 }
 0x1d6   : > { %10283 = vmatmul.mubr.bf16.gmra.mrb[20].mxu0 %v11512_v40  ;;  %v4813_v40 = vrot.slane %v13333_v14, 5 }
 0x1d7   : > { %10286 = vmatprep.mubr.bf16.mxu0 %v11514_v15  ;;  %v11515_v15 = vld [vmem:[%s11679_s29 + $0xb4] sm:$0xff]  }
 0x1d8   : > { %v4815_v20 = vrot.slane %v4813_v40, 4  ;;  %v13368_v58 = vsel %vm12177_vm5, %v9231_v22, %v4813_v40  ;;  %v4052_v22 = vrot.slane %v4050_v18, 5  ;;  %v13383_v40 = vrot.slane %v4056_v61, 5  ;;  %v13398_v61 = vld [vmem:[%s11679_s29 + $0xc4] sm:$0xf] }
 0x1d9   : > { %14674 = vst [vmem:[#allocation10_spill] sm:$0xff] %v13368_v58  ;;  %v4029_v18 = vor.u32 %v13304_v41, %v13293_v29  ;;  %v4823_v29 = vrot.slane %v13401_v55, 5  ;;  %v4071_v41 = vshrl.u32 %v9129_v8, 16  ;;  %v14700_v28 = vld [vmem:[#allocation13_spill] sm:$0xff] }
 0x1da   : > { %v13378_v23 = vsel %vm12177_vm5, %v4815_v20, %v4816_v60  ;;  %v3997_v60 = vsel %vm11750_vm2, %v13243_v4, %v13236_v63  ;;  %v13404_v20 = vld [vmem:[%s11679_s29 + $0xd0] sm:$0xf]  ;;  %v9216_v63 = vld [vmem:[%s11679_s29 + $0xc0] sm:$0xe]  ;;  %v4820_v4 = vrot.slane %v13398_v61, 5  ;;  %v4053_v36 = vor.u32 %v4052_v22, %v4049_v52 }
 0x1db   : > { %14675 = vst [vmem:[#allocation11_spill] sm:$0xff] %v13378_v23  ;;  %v9232_v24 = vrot.slane %v9216_v63, 9  ;;  %v4827_v50 = vrot.slane %v13404_v20, 5  ;;  %v4830_v23 = vrot.slane %v13412_v11, 5  ;;  %v4063_v13 = vor.u32 %v4062_v7, %v13383_v40 }
 0x1dc   : > { %v4822_v58 = vrot.slane %v4820_v4, 4  ;;  %v4084_v52 = vshrl.u32 %v13129_v25, 16  ;;  %v4095_v7 = vshrl.u32 %v9132_v44, 16  ;;  %v4021_v25 = vsel %vm11750_vm2, %v13360_v42, %v13353_v48 }
 0x1dd   : > { %v4829_v63 = vrot.slane %v4827_v50, 4  ;;  %v4076_v42 = vrot.slane %v4074_v0, 5  ;;  %v13464_v48 = vrot.slane %v4080_v2, 5  ;;  %v9180_v0 = vcombine.low %v4011_v19, %v4021_v25  ;;  %v13476_v2 = vld [vmem:[%s11679_s29 + $0x68] sm:$0x1] }
 0x1de   : > { %10287 = vmatmul.mubr.bf16.gmra.mrb[24].mxu0 %v11515_v15  ;;  %v9217_v15 = vld [vmem:[%s11679_s29 + $0xcc] sm:$0xe]  ;;  %v13435_v22 = vsel %vm12177_vm5, %v4822_v58, %v4823_v29  ;;  %v13451_v58 = vrot.slane %v4029_v18, 4  ;;  %v4104_v29 = vshll.u32 %v13424_v53, 16  ;;  %v4086_v18 = vrot.slane %v4084_v52, 4 }
 0x1df   : > { %10290 = vmatprep.mubr.bf16.mxu0 %v11517_v3  ;;  %v9233_v38 = vrot.slane %v9217_v15, 9  ;;  %v13428_v3 = vsel %vm12177_vm5, %v9232_v24, %v4820_v4  ;;  %14679 = vst [vmem:[#allocation21_spill] sm:$0xff] %v13435_v22  ;;  %v4098_v15 = vshll.u32 %v9132_v44, 16  ;;  %v13445_v24 = vsel %vm12177_vm5, %v4829_v63, %v4830_v23  ;;  %v9135_v63 = vld [vmem:[%s11679_s29 + $0x6c] sm:$0xf] }
 0x1e0   : > { %14678 = vst [vmem:[#allocation20_spill] sm:$0xff] %v13428_v3  ;;  %14681 = vst [vmem:[#allocation23_spill] sm:$0xff] %v13445_v24  ;;  %v13458_v44 = vrot.slane %v4066_v57, 5  ;;  %v4073_v4 = vrot.slane %v4071_v41, 4  ;;  %v4108_v23 = vshrl.u32 %v13424_v53, 16  ;;  %v13462_v22 = vrot.slane %v4053_v36, 4 }
 0x1e1   : > { %v13439_v8 = vsel %vm12177_vm5, %v9233_v38, %v4827_v50  ;;  %v13456_v50 = vrot.slane %v4039_v16, 4  ;;  %v11528_v16 = vld [vmem:[%s14515_s3] sm:$0xff]   ;;  %v11529_v41 = vld [vmem:[%s14515_s3 + $0x8] sm:$0xff]   ;;  %v13472_v57 = vrot.slane %v4063_v13, 4  ;;  %v4097_v36 = vrot.slane %v4095_v7, 4 }
 0x1e2   : > { %14680 = vst [vmem:[#allocation22_spill] sm:$0xff] %v13439_v8  ;;  %v4100_v38 = vrot.slane %v4098_v15, 5  ;;  %v9179_v24 = vcombine.low %v3987_v51, %v3997_v60  ;;  %v13478_v52 = vrot.slane %v4104_v29, 5  ;;  %v4119_v8 = vshrl.u32 %v9135_v63, 16  ;;  %v9138_v3 = vld [vmem:[%s11679_s29 + $0x78] sm:$0xf]  ;;  %10390 = vmatprep.subr.bf16.mxu1 %v11528_v16 }
 0x1e3   : > { %v4110_v53 = vrot.slane %v4108_v23, 4  ;;  %v4122_v43 = vshll.u32 %v9135_v63, 16  ;;  %v4132_v13 = vshrl.u32 %v13166_v34, 16  ;;  %10391 = vmatpush3.bf16.msra.mxu1 %v11528_v16  ;;  %v4045_v51 = vsel %vm11750_vm2, %v13456_v50, %v13371_v21  ;;  %v13497_v25 = vld [vmem:[%s11679_s29 + $0x7c] sm:$0xf]  ;;  %v11521_v21 = vld [vmem:[%s14513_s1 + $0x208] sm:$0xff]  }
 0x1e4   : > { %v4077_v60 = vor.u32 %v4076_v42, %v4073_v4  ;;  %v4087_v19 = vor.u32 %v4086_v18, %v13464_v48  ;;  %10392 = vmatprep.subr.bf16.mxu1 %v11529_v41  ;;  %v4101_v7 = vor.u32 %v4100_v38, %v4097_v36  ;;  %v4114_v15 = vshll.u32 %v13476_v2, 16  ;;  %v9141_v18 = vld [vmem:[%s11679_s29 + $0x84] sm:$0xf] }
 0x1e5   : > { %v4059_v4 = vsel %vm11750_vm2, %v13462_v22, %v13383_v40  ;;  %v4069_v29 = vsel %vm11750_vm2, %v13472_v57, %v13458_v44  ;;  %v4121_v50 = vrot.slane %v4119_v8, 4  ;;  %v4111_v23 = vor.u32 %v4110_v53, %v13478_v52  ;;  %v11531_v8 = vld [vmem:[%s14515_s3 + $0x18] sm:$0xff]  }
 0x1e6   : > { %10291 = vmatmul.mubr.bf16.gmra.mrb[28].mxu0 %v11518_v54  ;;  %v4090_v54 = vshll.u32 %v13132_v26, 16  ;;  %v4035_v26 = vsel %vm11750_vm2, %v13451_v58, %v13306_v35  ;;  %v4143_v35 = vshrl.u32 %v9138_v3, 16  ;;  %v4146_v58 = vshll.u32 %v9138_v3, 16 }
 0x1e7   : > { %10310 = vmatprep.mubr.bf16.mxu0 %v9178_v10  ;;  %v4128_v10 = vshll.u32 %v13166_v34, 16  ;;  %v11530_v34 = vld [vmem:[%s14515_s3 + $0x10] sm:$0xff]   ;;  %v4124_v3 = vrot.slane %v4122_v43, 5  ;;  %v4134_v42 = vrot.slane %v4132_v13, 4  ;;  %10393 = vmatpush3.bf16.msra.mxu1 %v11529_v41  ;;  %v13516_v16 = vrot.slane %v4077_v60, 4 }
 0x1e8   : > { %v13510_v38 = vrot.slane %v4090_v54, 5  ;;  %v4088_v40 = vrot.slane %v4087_v19, 4  ;;  %v4152_v22 = vshll.u32 %v13497_v25, 16  ;;  %v4156_v36 = vshrl.u32 %v13497_v25, 16  ;;  %10394 = vmatprep.subr.bf16.mxu1 %v11530_v34 }
 0x1e9   : > { %v13513_v63 = vrot.slane %v4128_v10, 5  ;;  %v4102_v53 = vrot.slane %v4101_v7, 4  ;;  %v4116_v43 = vrot.slane %v4114_v15, 5  ;;  %v4145_v44 = vrot.slane %v4143_v35, 4 }
 0x1ea   : > { %v4148_v41 = vrot.slane %v4146_v58, 5  ;;  %v4167_v57 = vshrl.u32 %v9141_v18, 16  ;;  %v4170_v54 = vshll.u32 %v9141_v18, 16  ;;  %v4176_v10 = vshll.u32 %v13209_v12, 16 }
 0x1eb   : > { %v4180_v13 = vshrl.u32 %v13209_v12, 16  ;;  %v4112_v60 = vrot.slane %v4111_v23, 4  ;;  %v4138_v19 = vshll.u32 %v13169_v17, 16  ;;  %10395 = vmatpush3.bf16.msra.mxu1 %v11530_v34  ;;  %v9181_v7 = vcombine.low %v4035_v26, %v4045_v51  ;;  %v13544_v26 = vld [vmem:[%s11679_s29 + $0x80] sm:$0x1] }
 0x1ec   : > { %v9182_v15 = vcombine.low %v4059_v4, %v4069_v29  ;;  %v13531_v35 = vrot.slane %v4152_v22, 5  ;;  %v4158_v58 = vrot.slane %v4156_v36, 4  ;;  %10396 = vmatprep.subr.bf16.mxu1 %v11531_v8  ;;  %v4083_v12 = vsel %vm11750_vm2, %v13516_v16, %v13464_v48  ;;  %v9144_v34 = vld [vmem:[%s11679_s29 + $0x90] sm:$0xf] }
 0x1ed   : > { %v4107_v17 = vsel %vm11750_vm2, %v4102_v53, %v13478_v52  ;;  %v4149_v51 = vor.u32 %v4148_v41, %v4145_v44  ;;  %v4169_v4 = vrot.slane %v4167_v57, 4  ;;  %v4172_v29 = vrot.slane %v4170_v54, 5  ;;  %v11524_v57 = vld [vmem:[%s14513_s1 + $0x220] sm:$0xff]   ;;  %v9147_v54 = vld [vmem:[%s11679_s29 + $0x9c] sm:$0xf] }
 0x1ee   : > { %10311 = vmatmul.mubr.bf16.vlgmr.msra.gmra.mrb[0].mxu0 %v9179_v24  ;;  %v11522_v24 = vld [vmem:[%s14513_s1 + $0x210] sm:$0xff]   ;;  %v13550_v48 = vrot.slane %v4176_v10, 5  ;;  %v4182_v23 = vrot.slane %v4180_v13, 4  ;;  %v4140_v52 = vrot.slane %v4138_v19, 5  ;;  %v4159_v18 = vor.u32 %v4158_v58, %v13531_v35 }
 0x1ef   : > { %10343 = vmatpush3.bf16.msra.mxu0 %v13221_v39  ;;  %10314 = vmatprep.mubr.bf16.mxu0 %v9180_v0  ;;  %v4125_v39 = vor.u32 %v4124_v3, %v4121_v50  ;;  %v4135_v0 = vor.u32 %v4134_v42, %v13513_v63  ;;  %v4093_v50 = vsel %vm11750_vm2, %v4088_v40, %v13510_v38  ;;  %v4162_v16 = vshll.u32 %v13544_v26, 16 }
 0x1f0   : > { %10344 = vmatprep.subr.bf16.mxu0 %v11521_v21  ;;  %v4117_v38 = vsel %vm11750_vm2, %v4112_v60, %v4116_v43  ;;  %10397 = vmatpush3.bf16.msra.mxu1 %v11531_v8  ;;  %v4191_v40 = vshrl.u32 %v9144_v34, 16  ;;  %v4194_v22 = vshll.u32 %v9144_v34, 16  ;;  %v4200_v36 = vshll.u32 %v13263_v33, 16  ;;  %v11525_v34 = vld [vmem:[%s14513_s1 + $0x228] sm:$0xff]  }
 0x1f1   : > { %v4126_v3 = vrot.slane %v4125_v39, 4  ;;  %v4136_v42 = vrot.slane %v4135_v0, 4  ;;  %v4204_v53 = vshrl.u32 %v13263_v33, 16  ;;  %v4150_v43 = vrot.slane %v4149_v51, 4 }
 0x1f2   : > { %v4173_v44 = vor.u32 %v4172_v29, %v4169_v4  ;;  %v4183_v8 = vor.u32 %v4182_v23, %v13550_v48  ;;  %v4186_v41 = vshll.u32 %v13212_v46, 16  ;;  %v9183_v10 = vcombine.low %v4083_v12, %v4093_v50 }
 0x1f3   : > { %10345 = vmatpush3.bf16.msra.mxu0 %v11521_v21  ;;  %v11523_v21 = vld [vmem:[%s14513_s1 + $0x218] sm:$0xff]   ;;  %v9184_v13 = vcombine.low %v4107_v17, %v4117_v38  ;;  %v4141_v33 = vsel %vm11750_vm2, %v4136_v42, %v4140_v52  ;;  %v4160_v60 = vrot.slane %v4159_v18, 4  ;;  %v4164_v39 = vrot.slane %v4162_v16, 5 }
 0x1f4   : > { %10346 = vmatprep.subr.bf16.mxu0 %v11522_v24  ;;  %v4193_v0 = vrot.slane %v4191_v40, 4  ;;  %v4196_v19 = vrot.slane %v4194_v22, 5  ;;  %v13570_v46 = vrot.slane %v4200_v36, 5  ;;  %v4215_v58 = vshrl.u32 %v9147_v54, 16 }
 0x1f5   : > { %v4218_v51 = vshll.u32 %v9147_v54, 16  ;;  %v4155_v12 = vsel %vm11750_vm2, %v4150_v43, %v13531_v35  ;;  %v4174_v50 = vrot.slane %v4173_v44, 4  ;;  %v4188_v17 = vrot.slane %v4186_v41, 5 }
 0x1f6   : > { %10315 = vmatmul.mubr.bf16.gmra.mrb[4].mxu0 %v9181_v7  ;;  %v9150_v7 = vld [vmem:[%s11679_s29 + $0xa8] sm:$0xf]  ;;  %v4224_v4 = vshll.u32 %v13269_v9, 16  ;;  %v4165_v38 = vsel %vm11750_vm2, %v4160_v60, %v4164_v39  ;;  %v4210_v35 = vshll.u32 %v13266_v49, 16  ;;  %v4252_v42 = vshrl.u32 %v13327_v47, 16  ;;  %v11527_v39 = vld [vmem:[%s14513_s1 + $0x238] sm:$0xff]  }
 0x1f7   : > { %10318 = vmatprep.mubr.bf16.mxu0 %v9182_v15  ;;  %10347 = vmatpush3.bf16.msra.mxu0 %v11522_v24  ;;  %v4131_v24 = vsel %vm11750_vm2, %v4126_v3, %v13513_v63  ;;  %v4206_v15 = vrot.slane %v4204_v53, 4  ;;  %v4184_v63 = vrot.slane %v4183_v8, 4  ;;  %v4239_v29 = vshrl.u32 %v9150_v7, 16 }
 0x1f8   : > { %10348 = vmatprep.subr.bf16.mxu0 %v11523_v21  ;;  %v4242_v23 = vshll.u32 %v9150_v7, 16  ;;  %v4248_v3 = vshll.u32 %v13327_v47, 16  ;;  %v4197_v52 = vor.u32 %v4196_v19, %v4193_v0  ;;  %v4217_v16 = vrot.slane %v4215_v58, 4  ;;  %v11526_v47 = vld [vmem:[%s14513_s1 + $0x230] sm:$0xff]   ;;  %v9156_v58 = vld [vmem:[%s11679_s29 + $0xc0] sm:$0xf] }
 0x1f9   : > { %v4207_v18 = vor.u32 %v4206_v15, %v13570_v46  ;;  %v9185_v40 = vcombine.low %v4131_v24, %v4141_v33  ;;  %v4179_v22 = vsel %vm11750_vm2, %v4174_v50, %v13550_v48  ;;  %v4189_v49 = vsel %vm11750_vm2, %v4184_v63, %v4188_v17  ;;  %v9153_v48 = vld [vmem:[%s11679_s29 + $0xb4] sm:$0xf] }
 0x1fa   : > { %v13594_v36 = vrot.slane %v4224_v4, 5  ;;  %v4241_v43 = vrot.slane %v4239_v29, 4  ;;  %v4244_v44 = vrot.slane %v4242_v23, 5  ;;  %v9186_v8 = vcombine.low %v4155_v12, %v4165_v38 }
 0x1fb   : > { %10349 = vmatpush3.bf16.msra.mxu0 %v11523_v21  ;;  %v4228_v21 = vshrl.u32 %v13269_v9, 16  ;;  %v4220_v9 = vrot.slane %v4218_v51, 5  ;;  %v4212_v41 = vrot.slane %v4210_v35, 5  ;;  %v4254_v54 = vrot.slane %v4252_v42, 4 }
 0x1fc   : > { %10350 = vmatprep.subr.bf16.mxu0 %v11524_v57  ;;  %v4234_v33 = vshll.u32 %v13272_v30, 16  ;;  %v9187_v60 = vcombine.low %v4179_v22, %v4189_v49  ;;  %v4245_v19 = vor.u32 %v4244_v44, %v4241_v43  ;;  %v4258_v7 = vshll.u32 %v13330_v6, 16 }
 0x1fd   : > { %v4230_v53 = vrot.slane %v4228_v21, 4  ;;  %v4221_v24 = vor.u32 %v4220_v9, %v4217_v16  ;;  %v4263_v15 = vshrl.u32 %v9153_v48, 16  ;;  %v4266_v12 = vshll.u32 %v9153_v48, 16 }
 0x1fe   : > { %10319 = vmatmul.mubr.bf16.gmra.mrb[8].mxu0 %v9183_v10  ;;  %v4198_v10 = vrot.slane %v4197_v52, 4  ;;  %v4272_v30 = vshll.u32 %v13333_v14, 16  ;;  %v4276_v50 = vshrl.u32 %v13333_v14, 16  ;;  %v4236_v6 = vrot.slane %v4234_v33, 5 }
 0x1ff   : > { %10322 = vmatprep.mubr.bf16.mxu0 %v9184_v13  ;;  %10351 = vmatpush3.bf16.msra.mxu0 %v11524_v57  ;;  %v13596_v57 = vrot.slane %v4248_v3, 5  ;;  %v4208_v13 = vrot.slane %v4207_v18, 4  ;;  %v4231_v0 = vor.u32 %v4230_v53, %v13594_v36  ;;  %v4287_v4 = vshrl.u32 %v9156_v58, 16 }
 0x200   : > { %10352 = vmatprep.subr.bf16.mxu0 %v11525_v34  ;;  %v4203_v63 = vsel %vm11750_vm2, %v4198_v10, %v13570_v46  ;;  %v4290_v21 = vshll.u32 %v9156_v58, 16  ;;  %v4296_v29 = vshll.u32 %v13398_v61, 16  ;;  %v4300_v23 = vshrl.u32 %v13398_v61, 16 }
 0x201   : > { %v4255_v51 = vor.u32 %v4254_v54, %v13596_v57  ;;  %v4213_v17 = vsel %vm11750_vm2, %v4208_v13, %v4212_v41  ;;  %v4232_v14 = vrot.slane %v4231_v0, 4  ;;  %v4246_v38 = vrot.slane %v4245_v19, 4 }
 0x202   : > { %v4260_v35 = vrot.slane %v4258_v7, 5  ;;  %v4265_v3 = vrot.slane %v4263_v15, 4  ;;  %v4268_v46 = vrot.slane %v4266_v12, 5  ;;  %v4274_v52 = vrot.slane %v4272_v30, 5 }
 0x203   : > { %10353 = vmatpush3.bf16.msra.mxu0 %v11525_v34  ;;  %v4222_v34 = vrot.slane %v4221_v24, 4  ;;  %v4256_v42 = vrot.slane %v4255_v51, 4  ;;  %v4278_v18 = vrot.slane %v4276_v50, 4  ;;  %v9188_v16 = vcombine.low %v4203_v63, %v4213_v17 }
 0x204   : > { %10354 = vmatprep.subr.bf16.mxu0 %v11526_v47  ;;  %v4289_v9 = vrot.slane %v4287_v4, 4  ;;  %v4298_v22 = vrot.slane %v4296_v29, 5  ;;  %v4302_v49 = vrot.slane %v4300_v23, 4  ;;  %v4237_v53 = vsel %vm11750_vm2, %v4232_v14, %v4236_v6  ;;  %v9202_v29 = vld [vmem:[%s11679_s29 + $0x18] sm:$0xe] }
 0x205   : > { %v4227_v61 = vsel %vm11750_vm2, %v4222_v34, %v13594_v36  ;;  %v4282_v43 = vshll.u32 %v13341_v56, 16  ;;  %v4251_v44 = vsel %vm11750_vm2, %v4246_v38, %v13596_v57  ;;  %v4269_v41 = vor.u32 %v4268_v46, %v4265_v3 }
 0x206   : > { %10323 = vmatmul.mubr.bf16.gmra.mrb[12].mxu0 %v9185_v40  ;;  %v4292_v40 = vrot.slane %v4290_v21, 5  ;;  %v4279_v54 = vor.u32 %v4278_v18, %v4274_v52  ;;  %v4320_v36 = vshll.u32 %v13404_v20, 16  ;;  %v4324_v13 = vshrl.u32 %v13404_v20, 16 }
 0x207   : > { %10326 = vmatprep.mubr.bf16.mxu0 %v9186_v8  ;;  %10355 = vmatpush3.bf16.msra.mxu0 %v11526_v47  ;;  %v9159_v47 = vld [vmem:[%s11679_s29 + $0xcc] sm:$0xf]  ;;  %v4261_v8 = vsel %vm11750_vm2, %v4256_v42, %v4260_v35  ;;  %v4303_v33 = vor.u32 %v4302_v49, %v4298_v22  ;;  %v4306_v56 = vshll.u32 %v13401_v55, 16  ;;  %v4270_v0 = vrot.slane %v4269_v41, 4 }
 0x208   : > { %10356 = vmatprep.subr.bf16.mxu0 %v11527_v39  ;;  %v4311_v48 = vshrl.u32 %v9159_v47, 16  ;;  %v4314_v10 = vshll.u32 %v9159_v47, 16  ;;  %v4293_v24 = vor.u32 %v4292_v40, %v4289_v9  ;;  %v4280_v57 = vrot.slane %v4279_v54, 4  ;;  %v9203_v40 = vld [vmem:[%s11679_s29 + $0x24] sm:$0xe] }
 0x209   : > { %v4284_v19 = vrot.slane %v4282_v43, 5  ;;  %v4322_v58 = vrot.slane %v4320_v36, 5  ;;  %v4326_v51 = vrot.slane %v4324_v13, 4  ;;  %v4304_v30 = vrot.slane %v4303_v33, 4 }
 0x20a   : > { %v4313_v7 = vrot.slane %v4311_v48, 4  ;;  %v4316_v15 = vrot.slane %v4314_v10, 5  ;;  %v4294_v12 = vrot.slane %v4293_v24, 4  ;;  %v4308_v50 = vrot.slane %v4306_v56, 5  ;;  %v9205_v10 = vld [vmem:[%s11679_s29 + $0x3c] sm:$0xe] }
 0x20b   : > { %10357 = vmatpush3.bf16.msra.mxu0 %v11527_v39  ;;  %v9190_v39 = vcombine.low %v4251_v44, %v4261_v8  ;;  %v4275_v20 = vsel %vm11750_vm2, %v4270_v0, %v4274_v52  ;;  %v4285_v55 = vsel %vm11750_vm2, %v4280_v57, %v4284_v19  ;;  %v4327_v17 = vor.u32 %v4326_v51, %v4322_v58  ;;  %v14684_v51 = vld [vmem:[#allocation17_spill] sm:$0xff] }
 0x20c   : > { %v4317_v63 = vor.u32 %v4316_v15, %v4313_v7  ;;  %v4330_v34 = vshll.u32 %v13412_v11, 16  ;;  %v4299_v6 = vsel %vm11750_vm2, %v4294_v12, %v4298_v22  ;;  %v4309_v4 = vsel %vm11750_vm2, %v4304_v30, %v4308_v50  ;;  %v9208_v30 = vld [vmem:[%s11679_s29 + $0x60] sm:$0xe] }
 0x20d   : > { %v4722_v21 = vrot.slane %v13143_v1, 5  ;;  %v9191_v23 = vcombine.low %v4275_v20, %v4285_v55  ;;  %v9192_v14 = vcombine.low %v4299_v6, %v4309_v4  ;;  %v4328_v35 = vrot.slane %v4327_v17, 4 }
 0x20e   : > { %10327 = vmatmul.mubr.bf16.gmra.mrb[16].mxu0 %v9187_v60  ;;  %v9189_v60 = vcombine.low %v4227_v61, %v4237_v53  ;;  %v4318_v38 = vrot.slane %v4317_v63, 4  ;;  %v4332_v3 = vrot.slane %v4330_v34, 5  ;;  %v9218_v42 = vrot.slane %v9202_v29, 9 }
 0x20f   : > { %10330 = vmatprep.mubr.bf16.mxu0 %v9188_v16  ;;  %v4724_v46 = vrot.slane %v4722_v21, 4  ;;  %v4725_v11 = vrot.slane %v13183_v45, 5  ;;  %v4729_v18 = vrot.slane %v13159_v27, 5  ;;  %v4736_v22 = vrot.slane %v13224_v37, 5  ;;  %v9204_v45 = vld [vmem:[%s11679_s29 + $0x30] sm:$0xe] }
 0x210   : > { %v4323_v52 = vsel %vm11750_vm2, %v4318_v38, %v4322_v58  ;;  %v4333_v1 = vsel %vm11750_vm2, %v4328_v35, %v4332_v3  ;;  %v4723_v16 = vsel %vm12177_vm5, %v9218_v42, %v4722_v21  ;;  %v9219_v61 = vrot.slane %v9203_v40, 9  ;;  %v9210_v21 = vld [vmem:[%s11679_s29 + $0x78] sm:$0xe]  ;;  %v14685_v35 = vld [vmem:[#allocation18_spill] sm:$0xff]  ;;  %v14695_v40 = vld [vmem:[#allocation7_spill] sm:$0xff] }
 0x211   : > { %v4726_v9 = vsel %vm12177_vm5, %v4724_v46, %v4725_v11  ;;  %v9193_v49 = vcombine.low %v4323_v52, %v4333_v1  ;;  %v4731_v53 = vrot.slane %v4729_v18, 4  ;;  %v4732_v43 = vrot.slane %v13191_v31, 5  ;;  %v14686_v3 = vld [vmem:[#allocation16_spill] sm:$0xff]  ;;  %v14688_v52 = vld [vmem:[#allocation19_spill] sm:$0xff] }
 0x212   : > { %v9250_v47 = vcombine.low %v4723_v16, %v4726_v9  ;;  %v9220_v44 = vrot.slane %v9204_v45, 9  ;;  %v4738_v27 = vrot.slane %v4736_v22, 4  ;;  %v4739_v8 = vrot.slane %v13260_v59, 5  ;;  %v9206_v59 = vld [vmem:[%s11679_s29 + $0x48] sm:$0xe]  ;;  %v14694_v9 = vld [vmem:[#allocation9_spill] sm:$0xff] }
 0x213   : > { %v4730_v41 = vsel %vm12177_vm5, %v9219_v61, %v4729_v18  ;;  %v4733_v37 = vsel %vm12177_vm5, %v4731_v53, %v4732_v43  ;;  %v4743_v54 = vrot.slane %v13255_v32, 5  ;;  %v4750_v36 = vrot.slane %v13317_v62, 5  ;;  %v14683_v32 = vld [vmem:[#allocation15_spill] sm:$0xff]  ;;  %v14691_v18 = vld [vmem:[#allocation4_spill] sm:$0xff]  ;;  %v14692_v16 = vld [vmem:[#allocation6_spill] sm:$0xff] }
 0x214   : > { %v4737_v48 = vsel %vm12177_vm5, %v9220_v44, %v4736_v22  ;;  %v4740_v31 = vsel %vm12177_vm5, %v4738_v27, %v4739_v8  ;;  %v9251_v13 = vcombine.low %v4730_v41, %v4733_v37  ;;  %v9221_v33 = vrot.slane %v9205_v10, 9  ;;  %v14697_v45 = vld [vmem:[#allocation8_spill] sm:$0xff]  ;;  %v14701_v61 = vld [vmem:[#allocation14_spill] sm:$0xff]  ;;  %v14704_v44 = vld [vmem:[#allocation11_spill] sm:$0xff] }
 0x215   : > { %v9252_v24 = vcombine.low %v4737_v48, %v4740_v31  ;;  %v4745_v56 = vrot.slane %v4743_v54, 4  ;;  %v9222_v0 = vrot.slane %v9206_v59, 9  ;;  %v4752_v57 = vrot.slane %v4750_v36, 4  ;;  %v14703_v43 = vld [vmem:[#allocation10_spill] sm:$0xff]  ;;  %v14706_v8 = vld [vmem:[#allocation20_spill] sm:$0xff]  ;;  %v14707_v41 = vld [vmem:[#allocation21_spill] sm:$0xff] }
 0x216   : > { %10331 = vmatmul.mubr.bf16.gmra.mrb[20].mxu0 %v9189_v60  ;;  %v14682_v60 = vld [vmem:[#allocation5_spill] sm:$0xff]  ;;  %v4753_v19 = vrot.slane %v14683_v32, 5  ;;  %v4744_v7 = vsel %vm12177_vm5, %v9221_v33, %v4743_v54  ;;  %v4764_v12 = vrot.slane %v14684_v51, 5  ;;  %v9224_v55 = vrot.slane %v9208_v30, 9  ;;  %v14709_v54 = vld [vmem:[#allocation22_spill] sm:$0xff]  ;;  %v14710_v48 = vld [vmem:[#allocation23_spill] sm:$0xff] }
 0x217   : > { %10334 = vmatprep.mubr.bf16.mxu0 %v9190_v39  ;;  %v4746_v39 = vrot.slane %v14682_v60, 5  ;;  %v4751_v15 = vsel %vm12177_vm5, %v9222_v0, %v4750_v36  ;;  %v4767_v17 = vrot.slane %v13476_v2, 5  ;;  %v4778_v4 = vrot.slane %v13497_v25, 5  ;;  %v14689_v25 = vld [vmem:[#allocation3_spill] sm:$0xff]  ;;  %v11532_v10 = vld [vmem:[%s14515_s3 + $0x20] sm:$0xff]   ;;  %v11533_v59 = vld [vmem:[%s14515_s3 + $0x28] sm:$0xff]  }
 0x218   : > { %v4754_v58 = vsel %vm12177_vm5, %v4752_v57, %v4753_v19  ;;  %v4766_v63 = vrot.slane %v4764_v12, 4  ;;  %v4765_v34 = vsel %vm12177_vm5, %v9224_v55, %v4764_v12  ;;  %v4781_v38 = vrot.slane %v13544_v26, 5  ;;  %10398 = vmatprep.subr.bf16.mxu1 %v11532_v10  ;;  %v13738_v60 = vld [vmem:[%s14514_s2] ss:$0 sm:$0xff] }
 0x219   : > { %v4747_v62 = vsel %vm12177_vm5, %v4745_v56, %v4746_v39  ;;  %v9254_v20 = vcombine.low %v4751_v15, %v4754_v58  ;;  %v14687_v42 = vcombine.low %v14685_v35, %v14686_v3  ;;  %v14690_v1 = vcombine.low %v14688_v52, %v14689_v25  ;;  %10399 = vmatpush3.bf16.msra.mxu1 %v11532_v10  ;;  %v11536_v56 = vld [vmem:[%s14515_s3 + $0x40] sm:$0xff]   ;;  %v11539_v10 = vld [vmem:[%s14515_s3 + $0x58] sm:$0xff]  }
 0x21a   : > { %v9253_v50 = vcombine.low %v4744_v7, %v4747_v62  ;;  %v4768_v6 = vsel %vm12177_vm5, %v4766_v63, %v4767_v17  ;;  %v14693_v26 = vcombine.low %v14691_v18, %v14692_v16  ;;  %v14696_v22 = vcombine.low %v14694_v9, %v14695_v40  ;;  %10400 = vmatprep.subr.bf16.mxu1 %v11533_v59 }
 0x21b   : > { %v9256_v29 = vcombine.low %v4765_v34, %v4768_v6  ;;  %v14702_v53 = vcombine.low %v14700_v28, %v14701_v61  ;;  %v14705_v27 = vcombine.low %v14703_v43, %v14704_v44  ;;  %v14708_v37 = vcombine.low %v14706_v8, %v14707_v41 }
 0x21c   : > { %v14711_v31 = vcombine.low %v14709_v54, %v14710_v48  ;;  %v11624_v36 = vmov 0.0   ;;  %v11625_v33 = vmov 0.0|0.0  }
 0x21d   : > { %5192 = vst [vmem:[#allocation2 + $0x30] sm:$0xff] %v11624_v36  ;;  %5193 = vst [vmem:[#allocation2 + $0x38] sm:$0xff] %v11624_v36  ;;  %10401 = vmatpush3.bf16.msra.mxu1 %v11533_v59  ;;  %10406 = vmatprep.mubr.bf16.mxu1 %v11625_v33 }
 0x21e   : > { %10335 = vmatmul.mubr.bf16.gmra.mrb[24].mxu0 %v9191_v23  ;;  %v9226_v23 = vrot.slane %v9210_v21, 9  ;;  %5186 = vst [vmem:[#allocation2] sm:$0xff] %v11624_v36  ;;  %5187 = vst [vmem:[#allocation2 + $0x8] sm:$0xff] %v11624_v36 }
 0x21f   : > { %10338 = vmatprep.mubr.bf16.mxu0 %v9192_v14  ;;  %v4780_v14 = vrot.slane %v4778_v4, 4  ;;  %5188 = vst [vmem:[#allocation2 + $0x10] sm:$0x3] %v11624_v36  ;;  %5189 = vst [vmem:[#allocation2 + $0x18] sm:$0xff] %v11624_v36 }
 0x220   : > { %v4779_v2 = vsel %vm12177_vm5, %v9226_v23, %v4778_v4  ;;  %5190 = vst [vmem:[#allocation2 + $0x20] sm:$0xff] %v11624_v36  ;;  %5191 = vst [vmem:[#allocation2 + $0x28] sm:$0x3] %v11624_v36 }
 0x221   : > { %v4782_v46 = vsel %vm12177_vm5, %v4780_v14, %v4781_v38  ;;  %5194 = vst [vmem:[#allocation2 + $0x40] sm:$0x3] %v11624_v36  ;;  %5195 = vst [vmem:[#allocation2 + $0x48] sm:$0xff] %v11624_v36 }
 0x222   : > { %v9258_v11 = vcombine.low %v4779_v2, %v4782_v46  ;;  %5196 = vst [vmem:[#allocation2 + $0x50] sm:$0xff] %v11624_v36  ;;  %5197 = vst [vmem:[#allocation2 + $0x58] sm:$0x3] %v11624_v36 }
 0x223   : > { %5198 = vst [vmem:[#allocation2 + $0x60] sm:$0xff] %v11624_v36  ;;  %5199 = vst [vmem:[#allocation2 + $0x68] sm:$0xff] %v11624_v36 }
 0x224   : > { %5200 = vst [vmem:[#allocation2 + $0x70] sm:$0x3] %v11624_v36  ;;  %5201 = vst [vmem:[#allocation2 + $0x78] sm:$0xff] %v11624_v36 }
 0x225   : > { %5202 = vst [vmem:[#allocation2 + $0x80] sm:$0xff] %v11624_v36  ;;  %5203 = vst [vmem:[#allocation2 + $0x88] sm:$0x3] %v11624_v36 }
 0x226   : > { %10339 = vmatmul.mubr.bf16.gmra.mrb[28].mxu0 %v9193_v49  ;;  %v14698_v49 = vld [vmem:[#allocation12_spill] sm:$0xff]  ;;  %5204 = vst [vmem:[#allocation2 + $0x90] sm:$0xff] %v11624_v36  ;;  %5205 = vst [vmem:[#allocation2 + $0x98] sm:$0xff] %v11624_v36 }
 0x227   : > { %10358 = vmatprep.mubr.bf16.mxu0 %v9250_v47  ;;  %v14699_v47 = vcombine.low %v14697_v45, %v14698_v49  ;;  %5206 = vst [vmem:[#allocation2 + $0xa0] sm:$0x3] %v11624_v36  ;;  %5207 = vst [vmem:[#allocation2 + $0xa8] sm:$0xff] %v11624_v36 }
 0x228   : > { %5208 = vst [vmem:[#allocation2 + $0xb0] sm:$0xff] %v11624_v36  ;;  %5209 = vst [vmem:[#allocation2 + $0xb8] sm:$0x3] %v11624_v36 }
 0x229   : > { %5210 = vst [vmem:[#allocation2 + $0xc0] sm:$0xff] %v11624_v36  ;;  %5211 = vst [vmem:[#allocation2 + $0xc8] sm:$0xff] %v11624_v36 }
 0x22a   : > { %5212 = vst [vmem:[#allocation2 + $0xd0] sm:$0x3] %v11624_v36  ;;  %5213 = vst [vmem:[#allocation2 + $0xd8] sm:$0xff] %v11624_v36 }
 0x22b   : > { %5214 = vst [vmem:[#allocation2 + $0xe0] sm:$0xff] %v11624_v36  ;;  %5215 = vst [vmem:[#allocation2 + $0xe8] sm:$0x3] %v11624_v36 }
 0x22c   : > { %5216 = vst [vmem:[#allocation2 + $0xf0] sm:$0xff] %v11624_v36  ;;  %5217 = vst [vmem:[#allocation2 + $0xf8] sm:$0xff] %v11624_v36 }
 0x22d   : > { %5218 = vst [vmem:[#allocation2 + $0x100] sm:$0x3] %v11624_v36  ;;  %5219 = vst [vmem:[#allocation2 + $0x108] sm:$0xff] %v11624_v36 }
 0x22e   : > { %10359 = vmatmul.mubr.bf16.vlgmr.msra.gmra.mrb[0].mxu0 %v9251_v13  ;;  %5220 = vst [vmem:[#allocation2 + $0x110] sm:$0xff] %v11624_v36  ;;  %5221 = vst [vmem:[#allocation2 + $0x118] sm:$0x3] %v11624_v36  ;;  %v11534_v13 = vld [vmem:[%s14515_s3 + $0x30] sm:$0xff]  }
 0x22f   : > { %10362 = vmatprep.mubr.bf16.mxu0 %v9252_v24  ;;  %5222 = vst [vmem:[#allocation2 + $0x120] sm:$0xff] %v11624_v36  ;;  %5223 = vst [vmem:[#allocation2 + $0x128] sm:$0xff] %v11624_v36  ;;  %10402 = vmatprep.subr.bf16.mxu1 %v11534_v13  ;;  %v11535_v24 = vld [vmem:[%s14515_s3 + $0x38] sm:$0xff]  }
 0x230   : > { %5224 = vst [vmem:[#allocation2 + $0x130] sm:$0x3] %v11624_v36  ;;  %5225 = vst [vmem:[#allocation2 + $0x138] sm:$0xff] %v11624_v36  ;;  %10403 = vmatpush3.bf16.msra.mxu1 %v11534_v13 }
 0x231   : > { %5226 = vst [vmem:[#allocation2 + $0x140] sm:$0xff] %v11624_v36  ;;  %5227 = vst [vmem:[#allocation2 + $0x148] sm:$0x3] %v11624_v36  ;;  %10404 = vmatprep.subr.bf16.mxu1 %v11535_v24 }
 0x232   : > { %5228 = vst [vmem:[#allocation2 + $0x150] sm:$0xff] %v11624_v36  ;;  %5229 = vst [vmem:[#allocation2 + $0x158] sm:$0xff] %v11624_v36 }
 0x233   : > { %5230 = vst [vmem:[#allocation2 + $0x160] sm:$0x3] %v11624_v36  ;;  %5231 = vst [vmem:[#allocation2 + $0x168] sm:$0xff] %v11624_v36 }
 0x234   : > { %5232 = vst [vmem:[#allocation2 + $0x170] sm:$0xff] %v11624_v36  ;;  %5233 = vst [vmem:[#allocation2 + $0x178] sm:$0x3] %v11624_v36  ;;  %10405 = vmatpush3.bf16.msra.mxu1 %v11535_v24 }
 0x235   : > { %5234 = vst [vmem:[#allocation2 + $0x180] sm:$0xff] %v11624_v36  ;;  %5235 = vst [vmem:[#allocation2 + $0x188] sm:$0xff] %v11624_v36  ;;  %10438 = vmatprep.subr.bf16.mxu1 %v11536_v56 }
 0x236   : > { %10363 = vmatmul.mubr.bf16.gmra.mrb[4].mxu0 %v9253_v50  ;;  %5236 = vst [vmem:[#allocation2 + $0x190] sm:$0x3] %v11624_v36  ;;  %5237 = vst [vmem:[#allocation2 + $0x198] sm:$0xff] %v11624_v36 }
 0x237   : > { %10366 = vmatprep.mubr.bf16.mxu0 %v9254_v20  ;;  %5238 = vst [vmem:[#allocation2 + $0x1a0] sm:$0xff] %v11624_v36  ;;  %5239 = vst [vmem:[#allocation2 + $0x1a8] sm:$0x3] %v11624_v36 }
 0x23e   : > { %10367 = vmatmul.mubr.bf16.gmra.mrb[8].mxu0 %v14687_v42 }
 0x23f   : > { %10370 = vmatprep.mubr.bf16.mxu0 %v9256_v29 }
 0x246   : > { %10371 = vmatmul.mubr.bf16.gmra.mrb[12].mxu0 %v14690_v1  ;;  %v11537_v1 = vld [vmem:[%s14515_s3 + $0x48] sm:$0xff]  }
 0x247   : > { %10374 = vmatprep.mubr.bf16.mxu0 %v9258_v11 }
 0x24e   : > { %10375 = vmatmul.mubr.bf16.gmra.mrb[16].mxu0 %v14693_v26 }
 0x24f   : > { %10378 = vmatprep.mubr.bf16.mxu0 %v14696_v22 }
 0x256   : > { %10379 = vmatmul.mubr.bf16.gmra.mrb[20].mxu0 %v14699_v47 }
 0x257   : > { %10382 = vmatprep.mubr.bf16.mxu0 %v14702_v53  ;;  %v11538_v53 = vld [vmem:[%s14515_s3 + $0x50] sm:$0xff]  }
 0x25e   : > { %10383 = vmatmul.mubr.bf16.gmra.mrb[24].mxu0 %v14705_v27 }
 0x25f   : > { %10386 = vmatprep.mubr.bf16.mxu0 %v14708_v37 }
 0x266   : > { %10387 = vmatmul.mubr.bf16.gmra.mrb[28].mxu0 %v14711_v31 }
 0x301   : > { %v10360_v39 = vpop.f32.mrb[0].mxu0 }
 0x302   : > { %v10822_v0 = vadd.f32 %v10360_v39, %v13738_v60  ;;  %v4995_v57 = vpop.f32.mrb[1].mxu0 }
 0x303   : > { %v10823_v32 = vadd.f32 %v13738_v60, %v4995_v57  ;;  %v10361_v19 = vpop.f32.mrb[2].mxu0 }
 0x304   : > { %v5156_v7 = vmax.f32 %v10822_v0, 0.0  ;;  %v10824_v62 = vadd.f32 %v10361_v19, %v13738_v60  ;;  %v4998_v15 = vpop.f32.mrb[3].mxu0 }
 0x305   : > { %v5154_v58 = vmax.f32 %v10823_v32, 0.0  ;;  %v10825_v51 = vadd.f32 %v13738_v60, %v4998_v15 }
 0x306   : > { %5243 = vst [vmem:[#allocation2 + $0x31] sm:$0xff] %v5156_v7  ;;  %v5157_v12 = vmax.f32 %v10824_v62, 0.0 }
 0x307   : > { %5241 = vst [vmem:[#allocation2 + $0x19] sm:$0xff] %v5154_v58  ;;  %v5155_v30 = vmax.f32 %v10825_v51, 0.0 }
 0x308   : > { %5244 = vst [vmem:[#allocation2 + $0x39] sm:$0xff] %v5157_v12  ;;  %v13744_v50 = vpack.c.bf16 %v5157_v12, %v5156_v7  ;;  %v11540_v7 = vld [vmem:[%s14515_s3 + $0x60] sm:$0xff]  }
 0x309   : > { %5242 = vst [vmem:[#allocation2 + $0x21] sm:$0xff] %v5155_v30  ;;  %v10364_v20 = vpop.f32.mrb[4].mxu0  ;;  %v13746_v55 = vpack.c.bf16 %v5155_v30, %v5154_v58 }
 0x30a   : > { %v10826_v63 = vadd.f32 %v10364_v20, %v13738_v60  ;;  %v5011_v17 = vpop.f32.mrb[5].mxu0 }
 0x30b   : > { %v10827_v34 = vadd.f32 %v13738_v60, %v5011_v17  ;;  %v10365_v6 = vpop.f32.mrb[6].mxu0 }
 0x30c   : > { %v5160_v4 = vmax.f32 %v10826_v63, 0.0  ;;  %v10828_v21 = vadd.f32 %v10365_v6, %v13738_v60  ;;  %v5014_v29 = vpop.f32.mrb[7].mxu0 }
 0x30d   : > { %v5158_v23 = vmax.f32 %v10827_v34, 0.0  ;;  %v10829_v14 = vadd.f32 %v13738_v60, %v5014_v29  ;;  %v5278_v25 = vld [vmem:[#allocation2 + $0x30] sm:$0xff]  ;;  %v11541_v34 = vld [vmem:[%s14515_s3 + $0x68] sm:$0xff]  }
 0x30e   : > { %5247 = vst [vmem:[#allocation2 + $0x61] sm:$0xff] %v5160_v4  ;;  %v5161_v38 = vmax.f32 %v10828_v21, 0.0  ;;  %v5276_v42 = vld [vmem:[#allocation2 + $0x18] sm:$0xff] }
 0x30f   : > { %5245 = vst [vmem:[#allocation2 + $0x49] sm:$0xff] %v5158_v23  ;;  %v5159_v35 = vmax.f32 %v10829_v14, 0.0  ;;  %v5279_v3 = vld [vmem:[#allocation2 + $0x38] sm:$0xff] }
 0x310   : > { %5248 = vst [vmem:[#allocation2 + $0x69] sm:$0xff] %v5161_v38  ;;  %v5277_v2 = vld [vmem:[#allocation2 + $0x20] sm:$0xff]  ;;  %v13752_v46 = vpack.c.bf16 %v5161_v38, %v5160_v4  ;;  %v13762_v9 = vpack.c.bf16 %v5279_v3, %v5278_v25 }
 0x311   : > { %5246 = vst [vmem:[#allocation2 + $0x51] sm:$0xff] %v5159_v35  ;;  %v10368_v11 = vpop.f32.mrb[8].mxu0  ;;  %v13754_v52 = vpack.c.bf16 %v5277_v2, %v5276_v42  ;;  %v13759_v18 = vpack.c.bf16 %v5159_v35, %v5158_v23 }
 0x312   : > { %v10830_v16 = vadd.f32 %v10368_v11, %v13738_v60  ;;  %v5027_v26 = vpop.f32.mrb[9].mxu0  ;;  %v11542_v11 = vld [vmem:[%s14515_s3 + $0x70] sm:$0xff]  }
 0x313   : > { %v10831_v40 = vadd.f32 %v13738_v60, %v5027_v26  ;;  %v10369_v22 = vpop.f32.mrb[10].mxu0  ;;  %10407 = vmatmul.mubr.bf16.vlgmr.msra.gmra.mrb[0].mxu1 %v13754_v52 }
 0x314   : > { %v5164_v45 = vmax.f32 %v10830_v16, 0.0  ;;  %v10832_v49 = vadd.f32 %v10369_v22, %v13738_v60  ;;  %v5030_v47 = vpop.f32.mrb[11].mxu0  ;;  %10410 = vmatprep.mubr.bf16.mxu1 %v13762_v9  ;;  %10439 = vmatpush3.bf16.msra.mxu1 %v11536_v56 }
 0x315   : > { %v5162_v28 = vmax.f32 %v10831_v40, 0.0  ;;  %v10833_v61 = vadd.f32 %v13738_v60, %v5030_v47  ;;  %10440 = vmatprep.subr.bf16.mxu1 %v11537_v1  ;;  %v5282_v31 = vld [vmem:[#allocation2 + $0x60] sm:$0xff] }
 0x316   : > { %5251 = vst [vmem:[#allocation2 + $0x91] sm:$0xff] %v5164_v45  ;;  %v5165_v43 = vmax.f32 %v10832_v49, 0.0  ;;  %v5280_v8 = vld [vmem:[#allocation2 + $0x48] sm:$0xff] }
 0x317   : > { %5249 = vst [vmem:[#allocation2 + $0x79] sm:$0xff] %v5162_v28  ;;  %v13772_v44 = vmax.f32 %v10833_v61, 0.0  ;;  %v5283_v27 = vld [vmem:[#allocation2 + $0x68] sm:$0xff] }
 0x318   : > { %5252 = vst [vmem:[#allocation2 + $0x99] sm:$0xff] %v5165_v43  ;;  %v5281_v41 = vld [vmem:[#allocation2 + $0x50] sm:$0xff]  ;;  %10441 = vmatpush3.bf16.msra.mxu1 %v11537_v1  ;;  %v13774_v37 = vpack.c.bf16 %v5165_v43, %v5164_v45  ;;  %v13786_v24 = vpack.c.bf16 %v5283_v27, %v5282_v31 }
 0x319   : > { %5250 = vst [vmem:[#allocation2 + $0x81] sm:$0xff] %v13772_v44  ;;  %v10372_v54 = vpop.f32.mrb[12].mxu0  ;;  %v13777_v48 = vpack.c.bf16 %v5281_v41, %v5280_v8  ;;  %10442 = vmatprep.subr.bf16.mxu1 %v11538_v53  ;;  %v13783_v36 = vpack.c.bf16 %v13772_v44, %v5162_v28  ;;  %v11543_v28 = vld [vmem:[%s14515_s3 + $0x78] sm:$0xff]  }
 0x31a   : > { %v10834_v59 = vadd.f32 %v10372_v54, %v13738_v60  ;;  %v5043_v13 = vpop.f32.mrb[13].mxu0 }
 0x31b   : > { %v10835_v33 = vadd.f32 %v13738_v60, %v5043_v13  ;;  %v10373_v56 = vpop.f32.mrb[14].mxu0  ;;  %10411 = vmatmul.mubr.bf16.gmra.mrb[4].mxu1 %v13777_v48 }
 0x31c   : > { %v5168_v39 = vmax.f32 %v10834_v59, 0.0  ;;  %v10836_v0 = vadd.f32 %v10373_v56, %v13738_v60  ;;  %v5046_v57 = vpop.f32.mrb[15].mxu0  ;;  %10414 = vmatprep.mubr.bf16.mxu1 %v13786_v24  ;;  %10443 = vmatpush3.bf16.msra.mxu1 %v11538_v53 }
 0x31d   : > { %v5166_v32 = vmax.f32 %v10835_v33, 0.0  ;;  %v10837_v19 = vadd.f32 %v13738_v60, %v5046_v57  ;;  %10444 = vmatprep.subr.bf16.mxu1 %v11539_v10  ;;  %v5286_v17 = vld [vmem:[#allocation2 + $0x90] sm:$0xff]  ;;  %v13840_v33 = vld [vmem:[%s14515_s3 + $0x80] sm:$0xff]  }
 0x31e   : > { %5255 = vst [vmem:[#allocation2 + $0xc1] sm:$0xff] %v5168_v39  ;;  %v13796_v62 = vmax.f32 %v10836_v0, 0.0  ;;  %v5284_v51 = vld [vmem:[#allocation2 + $0x78] sm:$0xff] }
 0x31f   : > { %5253 = vst [vmem:[#allocation2 + $0xa9] sm:$0xff] %v5166_v32  ;;  %v5167_v15 = vmax.f32 %v10837_v19, 0.0  ;;  %v5287_v58 = vld [vmem:[#allocation2 + $0x98] sm:$0xff] }
 0x320   : > { %5256 = vst [vmem:[#allocation2 + $0xc9] sm:$0xff] %v13796_v62  ;;  %v5285_v12 = vld [vmem:[#allocation2 + $0x80] sm:$0xff]  ;;  %10445 = vmatpush3.bf16.msra.mxu1 %v11539_v10  ;;  %v13800_v30 = vpack.c.bf16 %v13796_v62, %v5168_v39  ;;  %v13810_v29 = vpack.c.bf16 %v5287_v58, %v5286_v17 }
 0x321   : > { %5254 = vst [vmem:[#allocation2 + $0xb1] sm:$0xff] %v5167_v15  ;;  %v10376_v20 = vpop.f32.mrb[16].mxu0  ;;  %v13802_v63 = vpack.c.bf16 %v5285_v12, %v5284_v51  ;;  %10446 = vmatprep.subr.bf16.mxu1 %v11540_v7  ;;  %v13807_v6 = vpack.c.bf16 %v5167_v15, %v5166_v32 }
 0x322   : > { %v10838_v4 = vadd.f32 %v10376_v20, %v13738_v60  ;;  %v5059_v21 = vpop.f32.mrb[17].mxu0 }
 0x323   : > { %v10839_v23 = vadd.f32 %v13738_v60, %v5059_v21  ;;  %v10377_v14 = vpop.f32.mrb[18].mxu0  ;;  %10415 = vmatmul.mubr.bf16.gmra.mrb[8].mxu1 %v13802_v63 }
 0x324   : > { %v5172_v38 = vmax.f32 %v10838_v4, 0.0  ;;  %v10840_v35 = vadd.f32 %v10377_v14, %v13738_v60  ;;  %v5062_v3 = vpop.f32.mrb[19].mxu0  ;;  %10418 = vmatprep.mubr.bf16.mxu1 %v13810_v29  ;;  %10447 = vmatpush3.bf16.msra.mxu1 %v11540_v7 }
 0x325   : > { %v5170_v42 = vmax.f32 %v10839_v23, 0.0  ;;  %v10841_v2 = vadd.f32 %v13738_v60, %v5062_v3  ;;  %10448 = vmatprep.subr.bf16.mxu1 %v11541_v34  ;;  %v5290_v47 = vld [vmem:[#allocation2 + $0xc0] sm:$0xff] }
 0x326   : > { %5259 = vst [vmem:[#allocation2 + $0xf1] sm:$0xff] %v5172_v38  ;;  %v5173_v25 = vmax.f32 %v10840_v35, 0.0  ;;  %v5288_v26 = vld [vmem:[#allocation2 + $0xa8] sm:$0xff] }
 0x327   : > { %5257 = vst [vmem:[#allocation2 + $0xd9] sm:$0xff] %v5170_v42  ;;  %v5171_v1 = vmax.f32 %v10841_v2, 0.0  ;;  %v5291_v16 = vld [vmem:[#allocation2 + $0xc8] sm:$0xff] }
 0x328   : > { %5260 = vst [vmem:[#allocation2 + $0xf9] sm:$0xff] %v5173_v25  ;;  %v5289_v40 = vld [vmem:[#allocation2 + $0xb0] sm:$0xff]  ;;  %10449 = vmatpush3.bf16.msra.mxu1 %v11541_v34  ;;  %v13820_v22 = vpack.c.bf16 %v5173_v25, %v5172_v38  ;;  %v13830_v27 = vpack.c.bf16 %v5291_v16, %v5290_v47 }
 0x329   : > { %5258 = vst [vmem:[#allocation2 + $0xe1] sm:$0xff] %v5171_v1  ;;  %v10380_v45 = vpop.f32.mrb[20].mxu0  ;;  %v13822_v49 = vpack.c.bf16 %v5289_v40, %v5288_v26  ;;  %10450 = vmatprep.subr.bf16.mxu1 %v11542_v11  ;;  %v13827_v61 = vpack.c.bf16 %v5171_v1, %v5170_v42 }
 0x32a   : > { %v10842_v53 = vadd.f32 %v10380_v45, %v13738_v60  ;;  %v5075_v43 = vpop.f32.mrb[21].mxu0 }
 0x32b   : > { %v10843_v8 = vadd.f32 %v13738_v60, %v5075_v43  ;;  %v10381_v41 = vpop.f32.mrb[22].mxu0  ;;  %10419 = vmatmul.mubr.bf16.gmra.mrb[12].mxu1 %v13822_v49 }
 0x32c   : > { %v5176_v54 = vmax.f32 %v10842_v53, 0.0  ;;  %v10844_v31 = vadd.f32 %v10381_v41, %v13738_v60  ;;  %v5078_v10 = vpop.f32.mrb[23].mxu0  ;;  %10422 = vmatprep.mubr.bf16.mxu1 %v13830_v27  ;;  %10451 = vmatpush3.bf16.msra.mxu1 %v11542_v11 }
 0x32d   : > { %v5174_v59 = vmax.f32 %v10843_v8, 0.0  ;;  %v10845_v13 = vadd.f32 %v13738_v60, %v5078_v10  ;;  %10452 = vmatprep.subr.bf16.mxu1 %v11543_v28  ;;  %v5294_v58 = vld [vmem:[#allocation2 + $0xf0] sm:$0xff] }
 0x32e   : > { %5263 = vst [vmem:[#allocation2 + $0x121] sm:$0xff] %v5176_v54  ;;  %v5177_v56 = vmax.f32 %v10844_v31, 0.0  ;;  %v5292_v57 = vld [vmem:[#allocation2 + $0xd8] sm:$0xff] }
 0x32f   : > { %5261 = vst [vmem:[#allocation2 + $0x109] sm:$0xff] %v5174_v59  ;;  %v5175_v39 = vmax.f32 %v10845_v13, 0.0  ;;  %v5295_v0 = vld [vmem:[#allocation2 + $0xf8] sm:$0xff] }
 0x330   : > { %5264 = vst [vmem:[#allocation2 + $0x129] sm:$0xff] %v5177_v56  ;;  %v5293_v32 = vld [vmem:[#allocation2 + $0xe0] sm:$0xff]  ;;  %10453 = vmatpush3.bf16.msra.mxu1 %v11543_v28  ;;  %v13842_v19 = vpack.c.bf16 %v5177_v56, %v5176_v54  ;;  %v13850_v17 = vpack.c.bf16 %v5295_v0, %v5294_v58 }
 0x331   : > { %5262 = vst [vmem:[#allocation2 + $0x111] sm:$0xff] %v5175_v39  ;;  %v10384_v7 = vpop.f32.mrb[24].mxu0  ;;  %v13844_v15 = vpack.c.bf16 %v5293_v32, %v5292_v57  ;;  %10486 = vmatprep.subr.bf16.mxu1 %v13840_v33  ;;  %v13847_v51 = vpack.c.bf16 %v5175_v39, %v5174_v59 }
 0x332   : > { %v10846_v12 = vadd.f32 %v10384_v7, %v13738_v60  ;;  %v5091_v20 = vpop.f32.mrb[25].mxu0 }
 0x333   : > { %v10847_v34 = vadd.f32 %v13738_v60, %v5091_v20  ;;  %v10385_v4 = vpop.f32.mrb[26].mxu0  ;;  %10423 = vmatmul.mubr.bf16.gmra.mrb[16].mxu1 %v13844_v15 }
 0x334   : > { %v5180_v21 = vmax.f32 %v10846_v12, 0.0  ;;  %v10848_v23 = vadd.f32 %v10385_v4, %v13738_v60  ;;  %v5094_v14 = vpop.f32.mrb[27].mxu0  ;;  %10426 = vmatprep.mubr.bf16.mxu1 %v13850_v17 }
 0x335   : > { %v5178_v38 = vmax.f32 %v10847_v34, 0.0  ;;  %v10849_v35 = vadd.f32 %v13738_v60, %v5094_v14  ;;  %v5298_v40 = vld [vmem:[#allocation2 + $0x120] sm:$0xff]  ;;  %v5586_v34 = vld [vmem:[#allocation2 + $0x9] sm:$0xff] }
 0x336   : > { %5267 = vst [vmem:[#allocation2 + $0x151] sm:$0xff] %v5180_v21  ;;  %v5181_v3 = vmax.f32 %v10848_v23, 0.0  ;;  %v5296_v11 = vld [vmem:[#allocation2 + $0x108] sm:$0xff] }
 0x337   : > { %5265 = vst [vmem:[#allocation2 + $0x139] sm:$0xff] %v5178_v38  ;;  %v5179_v42 = vmax.f32 %v10849_v35, 0.0  ;;  %v5299_v2 = vld [vmem:[#allocation2 + $0x128] sm:$0xff]  ;;  %v11546_v35 = vld [vmem:[%s14515_s3 + $0x90] sm:$0xff]  }
 0x338   : > { %5268 = vst [vmem:[#allocation2 + $0x159] sm:$0xff] %v5181_v3  ;;  %v5297_v25 = vld [vmem:[#allocation2 + $0x110] sm:$0xff]  ;;  %v13857_v1 = vpack.c.bf16 %v5181_v3, %v5180_v21  ;;  %v13864_v53 = vpack.c.bf16 %v5299_v2, %v5298_v40  ;;  %v11547_v3 = vld [vmem:[%s14515_s3 + $0x98] sm:$0xff]   ;;  %v5894_v2 = vld [vmem:[#allocation2 + $0x22] sm:$0xff] }
 0x339   : > { %5266 = vst [vmem:[#allocation2 + $0x141] sm:$0xff] %v5179_v42  ;;  %v10388_v16 = vpop.f32.mrb[28].mxu0  ;;  %v13859_v26 = vpack.c.bf16 %v5297_v25, %v5296_v11  ;;  %v13861_v45 = vpack.c.bf16 %v5179_v42, %v5178_v38  ;;  %v11545_v38 = vld [vmem:[%s14515_s3 + $0x88] sm:$0xff]   ;;  %v5893_v42 = vld [vmem:[#allocation2 + $0x1a] sm:$0xff]  ;;  %v5895_v11 = vld [vmem:[#allocation2 + $0x32] sm:$0xff] }
 0x33a   : > { %v10850_v47 = vadd.f32 %v10388_v16, %v13738_v60  ;;  %v5107_v28 = vpop.f32.mrb[29].mxu0  ;;  %v5896_v25 = vld [vmem:[#allocation2 + $0x3a] sm:$0xff]  ;;  %v13924_v16 = vpack.c.bf16 %v5894_v2, %v5893_v42  ;;  %v11553_v40 = vld [vmem:[%s14515_s3 + $0xc8] sm:$0xff]  }
 0x33b   : > { %v10851_v43 = vadd.f32 %v13738_v60, %v5107_v28  ;;  %v10389_v8 = vpop.f32.mrb[30].mxu0  ;;  %10427 = vmatmul.mubr.bf16.gmra.mrb[20].mxu1 %v13859_v26  ;;  %v11554_v28 = vld [vmem:[%s14515_s3 + $0xd0] sm:$0xff]  }
 0x33c   : > { %v5184_v41 = vmax.f32 %v10850_v47, 0.0  ;;  %v10852_v54 = vadd.f32 %v10389_v8, %v13738_v60  ;;  %v5110_v31 = vpop.f32.mrb[31].mxu0  ;;  %10430 = vmatprep.mubr.bf16.mxu1 %v13864_v53  ;;  %v13929_v47 = vpack.c.bf16 %v5896_v25, %v5895_v11  ;;  %v5898_v8 = vld [vmem:[#allocation2 + $0x52] sm:$0xff]  ;;  %v5913_v2 = vld [vmem:[#allocation2 + $0x10a] sm:$0xff]  ;;  %v5915_v25 = vld [vmem:[#allocation2 + $0x122] sm:$0xff] }
 0x33d   : > { %v5182_v10 = vmax.f32 %v10851_v43, 0.0  ;;  %v10853_v59 = vadd.f32 %v13738_v60, %v5110_v31  ;;  %v5302_v58 = vld [vmem:[#allocation2 + $0x150] sm:$0xff]  ;;  %v5585_v60 = vld [vmem:[#allocation2 + $0x1] sm:$0xff] }
 0x33e   : > { %5271 = vst [vmem:[#allocation2 + $0x181] sm:$0xff] %v5184_v41  ;;  %v5185_v13 = vmax.f32 %v10852_v54, 0.0  ;;  %v5300_v0 = vld [vmem:[#allocation2 + $0x138] sm:$0xff]  ;;  %v5617_v23 = vpack.c.bf16 %v5586_v34, %v5585_v60  ;;  %v5897_v43 = vld [vmem:[#allocation2 + $0x4a] sm:$0xff] }
 0x33f   : > { %5269 = vst [vmem:[#allocation2 + $0x169] sm:$0xff] %v5182_v10  ;;  %v5183_v56 = vmax.f32 %v10853_v59, 0.0  ;;  %v5303_v39 = vld [vmem:[#allocation2 + $0x158] sm:$0xff]  ;;  %v5900_v54 = vld [vmem:[#allocation2 + $0x6a] sm:$0xff]  ;;  %v13936_v31 = vpack.c.bf16 %v5898_v8, %v5897_v43 }
 0x340   : > { %5272 = vst [vmem:[#allocation2 + $0x189] sm:$0xff] %v5185_v13  ;;  %v5301_v57 = vld [vmem:[#allocation2 + $0x140] sm:$0xff]  ;;  %v13871_v32 = vpack.c.bf16 %v5185_v13, %v5184_v41  ;;  %v13877_v20 = vpack.c.bf16 %v5303_v39, %v5302_v58  ;;  %v11557_v60 = vld [vmem:[%s14515_s3 + $0xe8] sm:$0xff]   ;;  %v5914_v11 = vld [vmem:[#allocation2 + $0x112] sm:$0xff] }
 0x341   : > { %5270 = vst [vmem:[#allocation2 + $0x171] sm:$0xff] %v5183_v56  ;;  %v13873_v7 = vpack.c.bf16 %v5301_v57, %v5300_v0  ;;  %v13875_v12 = vpack.c.bf16 %v5183_v56, %v5182_v10  ;;  %v5899_v41 = vld [vmem:[#allocation2 + $0x62] sm:$0xff]  ;;  %v11555_v10 = vld [vmem:[%s14515_s3 + $0xd8] sm:$0xff]  }
 0x342   : > { %v13941_v59 = vpack.c.bf16 %v5900_v54, %v5899_v41  ;;  %v11556_v13 = vld [vmem:[%s14515_s3 + $0xe0] sm:$0xff]   ;;  %v5903_v0 = vld [vmem:[#allocation2 + $0x92] sm:$0xff] }
 0x343   : > { %10431 = vmatmul.mubr.bf16.gmra.mrb[24].mxu1 %v13873_v7  ;;  %v5901_v56 = vld [vmem:[#allocation2 + $0x7a] sm:$0xff]  ;;  %v5902_v39 = vld [vmem:[#allocation2 + $0x82] sm:$0xff]  ;;  %v5919_v54 = vld [vmem:[#allocation2 + $0x152] sm:$0xff] }
 0x344   : > { %10434 = vmatprep.mubr.bf16.mxu1 %v13877_v20  ;;  %v5904_v57 = vld [vmem:[#allocation2 + $0x9a] sm:$0xff]  ;;  %v13948_v58 = vpack.c.bf16 %v5902_v39, %v5901_v56  ;;  %v5918_v41 = vld [vmem:[#allocation2 + $0x142] sm:$0xff] }
 0x345   : > { %v13953_v34 = vpack.c.bf16 %v5904_v57, %v5903_v0  ;;  %v5917_v8 = vld [vmem:[#allocation2 + $0x13a] sm:$0xff] }
 0x346   : > { %v5304_v4 = vld [vmem:[#allocation2 + $0x168] sm:$0xff] }
 0x348   : > { %v5305_v21 = vld [vmem:[#allocation2 + $0x170] sm:$0xff] }
 0x349   : > { %v13881_v14 = vpack.c.bf16 %v5305_v21, %v5304_v4  ;;  %v11558_v4 = vld [vmem:[%s14515_s3 + $0xf0] sm:$0xff]  }
 0x34a   : > { %v5905_v21 = vld [vmem:[#allocation2 + $0xaa] sm:$0xff]  ;;  %v5922_v0 = vld [vmem:[#allocation2 + $0x172] sm:$0xff] }
 0x34b   : > { %10435 = vmatmul.mubr.bf16.gmra.mrb[28].mxu1 %v13881_v14  ;;  %v5921_v39 = vld [vmem:[#allocation2 + $0x16a] sm:$0xff] }
 0x34c   : > { %10454 = vmatprep.mubr.bf16.mxu1 %v5617_v23  ;;  %v5906_v23 = vld [vmem:[#allocation2 + $0xb2] sm:$0xff]  ;;  %v13990_v57 = vpack.c.bf16 %v5922_v0, %v5921_v39 }
 0x34d   : > { %v11575_v39 = vld [vmem:[%s14515_s3 + $0x178] sm:$0xff]  }
 0x34e   : > { %v7125_v0 = vld [vmem:[#allocation2 + $0x98] sm:$0xff] }
 0x353   : > { %10455 = vmatmul.mubr.bf16.vlgmr.msra.gmra.mrb[0].mxu1 %v13746_v55  ;;  %v11549_v55 = vld [vmem:[%s14515_s3 + $0xa8] sm:$0xff]  }
 0x354   : > { %10458 = vmatprep.mubr.bf16.mxu1 %v13744_v50  ;;  %10487 = vmatpush3.bf16.msra.mxu1 %v13840_v33  ;;  %v11548_v50 = vld [vmem:[%s14515_s3 + $0xa0] sm:$0xff]  }
 0x355   : > { %10488 = vmatprep.subr.bf16.mxu1 %v11545_v38 }
 0x358   : > { %10489 = vmatpush3.bf16.msra.mxu1 %v11545_v38  ;;  %v5907_v38 = vld [vmem:[#allocation2 + $0xc2] sm:$0xff] }
 0x359   : > { %10490 = vmatprep.subr.bf16.mxu1 %v11546_v35 }
 0x35b   : > { %10459 = vmatmul.mubr.bf16.gmra.mrb[4].mxu1 %v13759_v18  ;;  %v11551_v18 = vld [vmem:[%s14515_s3 + $0xb8] sm:$0xff]  }
 0x35c   : > { %10462 = vmatprep.mubr.bf16.mxu1 %v13752_v46  ;;  %10491 = vmatpush3.bf16.msra.mxu1 %v11546_v35  ;;  %v11550_v46 = vld [vmem:[%s14515_s3 + $0xb0] sm:$0xff]  }
 0x35d   : > { %10492 = vmatprep.subr.bf16.mxu1 %v11547_v3  ;;  %v5908_v35 = vld [vmem:[#allocation2 + $0xca] sm:$0xff] }
 0x360   : > { %10493 = vmatpush3.bf16.msra.mxu1 %v11547_v3  ;;  %v13960_v3 = vpack.c.bf16 %v5906_v23, %v5905_v21  ;;  %v6503_v23 = vld [vmem:[#allocation2 + $0x19] sm:$0xff] }
 0x361   : > { %10494 = vmatprep.subr.bf16.mxu1 %v11548_v50 }
 0x363   : > { %10463 = vmatmul.mubr.bf16.gmra.mrb[8].mxu1 %v13783_v36  ;;  %v5891_v36 = vld [vmem:[#allocation2 + $0x2] sm:$0xff] }
 0x364   : > { %10466 = vmatprep.mubr.bf16.mxu1 %v13774_v37  ;;  %10495 = vmatpush3.bf16.msra.mxu1 %v11548_v50  ;;  %v11552_v37 = vld [vmem:[%s14515_s3 + $0xc0] sm:$0xff]   ;;  %v11559_v50 = vld [vmem:[%s14515_s3 + $0xf8] sm:$0xff]  }
 0x365   : > { %10496 = vmatprep.subr.bf16.mxu1 %v11549_v55 }
 0x368   : > { %10497 = vmatpush3.bf16.msra.mxu1 %v11549_v55  ;;  %v13965_v55 = vpack.c.bf16 %v5908_v35, %v5907_v38  ;;  %v6505_v35 = vld [vmem:[#allocation2 + $0x31] sm:$0xff] }
 0x369   : > { %10498 = vmatprep.subr.bf16.mxu1 %v11550_v46 }
 0x36b   : > { %10467 = vmatmul.mubr.bf16.gmra.mrb[12].mxu1 %v13807_v6 }
 0x36c   : > { %10470 = vmatprep.mubr.bf16.mxu1 %v13800_v30  ;;  %10499 = vmatpush3.bf16.msra.mxu1 %v11550_v46  ;;  %v5892_v30 = vld [vmem:[#allocation2 + $0xa] sm:$0xff]  ;;  %v11560_v46 = vld [vmem:[%s14515_s3 + $0x100] sm:$0xff]  }
 0x36d   : > { %10500 = vmatprep.subr.bf16.mxu1 %v11551_v18  ;;  %v5923_v33 = vpack.c.bf16 %v5892_v30, %v5891_v36  ;;  %v5911_v36 = vld [vmem:[#allocation2 + $0xf2] sm:$0xff]  ;;  %v5912_v30 = vld [vmem:[#allocation2 + $0xfa] sm:$0xff] }
 0x36e   : > { %v13974_v42 = vpack.c.bf16 %v5912_v30, %v5911_v36  ;;  %v11571_v30 = vld [vmem:[%s14515_s3 + $0x158] sm:$0xff]  }
 0x370   : > { %10501 = vmatpush3.bf16.msra.mxu1 %v11551_v18  ;;  %v5909_v18 = vld [vmem:[#allocation2 + $0xda] sm:$0xff] }
 0x371   : > { %10534 = vmatprep.subr.bf16.mxu1 %v11552_v37 }
 0x373   : > { %10471 = vmatmul.mubr.bf16.gmra.mrb[16].mxu1 %v13827_v61 }
 0x374   : > { %10474 = vmatprep.mubr.bf16.mxu1 %v13820_v22 }
 0x37b   : > { %10475 = vmatmul.mubr.bf16.gmra.mrb[20].mxu1 %v13847_v51 }
 0x37c   : > { %10478 = vmatprep.mubr.bf16.mxu1 %v13842_v19 }
 0x383   : > { %10479 = vmatmul.mubr.bf16.gmra.mrb[24].mxu1 %v13861_v45 }
 0x384   : > { %10482 = vmatprep.mubr.bf16.mxu1 %v13857_v1 }
 0x38b   : > { %10483 = vmatmul.mubr.bf16.gmra.mrb[28].mxu1 %v13875_v12 }
 0x38c   : > { %10502 = vmatprep.mubr.bf16.mxu1 %v5923_v33 }
 0x393   : > { %10503 = vmatmul.mubr.bf16.vlgmr.msra.gmra.mrb[0].mxu1 %v13924_v16 }
 0x394   : > { %10506 = vmatprep.mubr.bf16.mxu1 %v13929_v47  ;;  %10535 = vmatpush3.bf16.msra.mxu1 %v11552_v37  ;;  %v5910_v37 = vld [vmem:[#allocation2 + $0xe2] sm:$0xff] }
 0x395   : > { %10536 = vmatprep.subr.bf16.mxu1 %v11553_v40  ;;  %v13972_v33 = vpack.c.bf16 %v5910_v37, %v5909_v18  ;;  %v14047_v18 = vld [vmem:[#allocation2 + $0x79] sm:$0xff]  ;;  %v6509_v37 = vld [vmem:[#allocation2 + $0x61] sm:$0xff] }
 0x398   : > { %10537 = vmatpush3.bf16.msra.mxu1 %v11553_v40  ;;  %v5916_v40 = vld [vmem:[#allocation2 + $0x12a] sm:$0xff] }
 0x399   : > { %10538 = vmatprep.subr.bf16.mxu1 %v11554_v28  ;;  %v13980_v43 = vpack.c.bf16 %v5916_v40, %v5915_v25  ;;  %v6514_v25 = vld [vmem:[#allocation2 + $0x99] sm:$0xff]  ;;  %v6513_v40 = vld [vmem:[#allocation2 + $0x91] sm:$0xff] }
 0x39b   : > { %10507 = vmatmul.mubr.bf16.gmra.mrb[4].mxu1 %v13936_v31 }
 0x39c   : > { %10510 = vmatprep.mubr.bf16.mxu1 %v13941_v59  ;;  %10539 = vmatpush3.bf16.msra.mxu1 %v11554_v28  ;;  %v13978_v28 = vpack.c.bf16 %v5914_v11, %v5913_v2  ;;  %v6539_v2 = vpack.c.bf16 %v13772_v44, %v14047_v18  ;;  %v11572_v11 = vld [vmem:[%s14515_s3 + $0x160] sm:$0xff]   ;;  %v11574_v44 = vld [vmem:[%s14515_s3 + $0x170] sm:$0xff]  }
 0x39d   : > { %10540 = vmatprep.subr.bf16.mxu1 %v11555_v10 }
 0x3a0   : > { %10541 = vmatpush3.bf16.msra.mxu1 %v11555_v10  ;;  %v5920_v10 = vld [vmem:[#allocation2 + $0x15a] sm:$0xff] }
 0x3a1   : > { %10542 = vmatprep.subr.bf16.mxu1 %v11556_v13  ;;  %v13986_v56 = vpack.c.bf16 %v5920_v10, %v5919_v54  ;;  %v14070_v54 = vld [vmem:[#allocation2 + $0xc1] sm:$0xff] }
 0x3a2   : > { %v6542_v10 = vpack.c.bf16 %v13796_v62, %v14070_v54  ;;  %v11577_v62 = vld [vmem:[%s14515_s3 + $0x188] sm:$0xff]  }
 0x3a3   : > { %10511 = vmatmul.mubr.bf16.gmra.mrb[8].mxu1 %v13948_v58 }
 0x3a4   : > { %10514 = vmatprep.mubr.bf16.mxu1 %v13953_v34  ;;  %10543 = vmatpush3.bf16.msra.mxu1 %v11556_v13  ;;  %v13984_v13 = vpack.c.bf16 %v5918_v41, %v5917_v8  ;;  %v14060_v8 = vpack.c.bf16 %v6514_v25, %v6513_v40  ;;  %v11573_v41 = vld [vmem:[%s14515_s3 + $0x168] sm:$0xff]   ;;  %v7136_v40 = vld [vmem:[#allocation2 + $0x120] sm:$0xff] }
 0x3a5   : > { %10544 = vmatprep.subr.bf16.mxu1 %v11557_v60 }
 0x3a8   : > { %10545 = vmatpush3.bf16.msra.mxu1 %v11557_v60  ;;  %v11561_v60 = vld [vmem:[%s14515_s3 + $0x108] sm:$0xff]  }
 0x3a9   : > { %10546 = vmatprep.subr.bf16.mxu1 %v11558_v4 }
 0x3ab   : > { %10515 = vmatmul.mubr.bf16.gmra.mrb[12].mxu1 %v13960_v3 }
 0x3ac   : > { %10518 = vmatprep.mubr.bf16.mxu1 %v13965_v55  ;;  %10547 = vmatpush3.bf16.msra.mxu1 %v11558_v4  ;;  %v11562_v4 = vld [vmem:[%s14515_s3 + $0x110] sm:$0xff]  }
 0x3ad   : > { %10548 = vmatprep.subr.bf16.mxu1 %v11559_v50 }
 0x3b0   : > { %10549 = vmatpush3.bf16.msra.mxu1 %v11559_v50  ;;  %v11570_v50 = vld [vmem:[%s14515_s3 + $0x150] sm:$0xff]  }
 0x3b1   : > { %10582 = vmatprep.subr.bf16.mxu1 %v11560_v46 }
 0x3b3   : > { %10519 = vmatmul.mubr.bf16.gmra.mrb[16].mxu1 %v13972_v33 }
 0x3b4   : > { %10522 = vmatprep.mubr.bf16.mxu1 %v13974_v42 }
 0x3bb   : > { %10523 = vmatmul.mubr.bf16.gmra.mrb[20].mxu1 %v13978_v28 }
 0x3bc   : > { %10526 = vmatprep.mubr.bf16.mxu1 %v13980_v43 }
 0x3c3   : > { %10527 = vmatmul.mubr.bf16.gmra.mrb[24].mxu1 %v13984_v13 }
 0x3c4   : > { %10530 = vmatprep.mubr.bf16.mxu1 %v13986_v56 }
 0x3cb   : > { %10531 = vmatmul.mubr.bf16.gmra.mrb[28].mxu1 %v13990_v57 }
 0x3cc   : > { %10550 = vmatprep.mubr.bf16.mxu1 %v13754_v52  ;;  %v11563_v52 = vld [vmem:[%s14515_s3 + $0x118] sm:$0xff]  }
 0x3d3   : > { %10551 = vmatmul.mubr.bf16.vlgmr.msra.gmra.mrb[0].mxu1 %v13762_v9  ;;  %v11564_v9 = vld [vmem:[%s14515_s3 + $0x120] sm:$0xff]  }
 0x3d4   : > { %10554 = vmatprep.mubr.bf16.mxu1 %v13777_v48  ;;  %10583 = vmatpush3.bf16.msra.mxu1 %v11560_v46  ;;  %v11565_v48 = vld [vmem:[%s14515_s3 + $0x128] sm:$0xff]  }
 0x3d5   : > { %10584 = vmatprep.subr.bf16.mxu1 %v11561_v60  ;;  %v6510_v46 = vld [vmem:[#allocation2 + $0x69] sm:$0xff] }
 0x3d6   : > { %v14049_v36 = vpack.c.bf16 %v6510_v46, %v6509_v37  ;;  %v11592_v37 = vld [vmem:[%s14515_s3 + $0x200] sm:$0xff]  }
 0x3d8   : > { %10585 = vmatpush3.bf16.msra.mxu1 %v11561_v60 }
 0x3d9   : > { %10586 = vmatprep.subr.bf16.mxu1 %v11562_v4 }
 0x3db   : > { %10555 = vmatmul.mubr.bf16.gmra.mrb[4].mxu1 %v13786_v24  ;;  %v11566_v24 = vld [vmem:[%s14515_s3 + $0x130] sm:$0xff]  }
 0x3dc   : > { %10558 = vmatprep.mubr.bf16.mxu1 %v13802_v63  ;;  %10587 = vmatpush3.bf16.msra.mxu1 %v11562_v4  ;;  %v11567_v63 = vld [vmem:[%s14515_s3 + $0x138] sm:$0xff]   ;;  %v7124_v4 = vld [vmem:[#allocation2 + $0x90] sm:$0xff] }
 0x3dd   : > { %10588 = vmatprep.subr.bf16.mxu1 %v11563_v52 }
 0x3e0   : > { %10589 = vmatpush3.bf16.msra.mxu1 %v11563_v52  ;;  %v11587_v52 = vld [vmem:[%s14515_s3 + $0x1d8] sm:$0xff]  }
 0x3e1   : > { %10590 = vmatprep.subr.bf16.mxu1 %v11564_v9 }
 0x3e3   : > { %10559 = vmatmul.mubr.bf16.gmra.mrb[8].mxu1 %v13810_v29  ;;  %v11568_v29 = vld [vmem:[%s14515_s3 + $0x140] sm:$0xff]  }
 0x3e4   : > { %10562 = vmatprep.mubr.bf16.mxu1 %v13822_v49  ;;  %10591 = vmatpush3.bf16.msra.mxu1 %v11564_v9  ;;  %v6228_v49 = vld [vmem:[#allocation2 + $0x188] sm:$0xff]  ;;  %v7152_v9 = vpack.c.bf16 %v7125_v0, %v7124_v4 }
 0x3e5   : > { %10592 = vmatprep.subr.bf16.mxu1 %v11565_v48  ;;  %v7440_v0 = vld [vmem:[#allocation2 + $0x109] sm:$0xff] }
 0x3e8   : > { %10593 = vmatpush3.bf16.msra.mxu1 %v11565_v48  ;;  %v11588_v48 = vld [vmem:[%s14515_s3 + $0x1e0] sm:$0xff]  }
 0x3e9   : > { %10594 = vmatprep.subr.bf16.mxu1 %v11566_v24 }
 0x3eb   : > { %10563 = vmatmul.mubr.bf16.gmra.mrb[12].mxu1 %v13830_v27  ;;  %v6504_v27 = vld [vmem:[#allocation2 + $0x21] sm:$0xff] }
 0x3ec   : > { %10566 = vmatprep.mubr.bf16.mxu1 %v13844_v15  ;;  %10595 = vmatpush3.bf16.msra.mxu1 %v11566_v24  ;;  %v6227_v15 = vld [vmem:[#allocation2 + $0x180] sm:$0xff]  ;;  %v6535_v38 = vpack.c.bf16 %v6504_v27, %v6503_v23  ;;  %v7127_v24 = vld [vmem:[#allocation2 + $0xb0] sm:$0xff] }
 0x3ed   : > { %10596 = vmatprep.subr.bf16.mxu1 %v11567_v63  ;;  %v14032_v21 = vpack.c.bf16 %v6228_v49, %v6227_v15  ;;  %v7128_v27 = vld [vmem:[#allocation2 + $0xc0] sm:$0xff]  ;;  %v11589_v15 = vld [vmem:[%s14515_s3 + $0x1e8] sm:$0xff]  }
 0x3f0   : > { %10597 = vmatpush3.bf16.msra.mxu1 %v11567_v63  ;;  %v7129_v63 = vld [vmem:[#allocation2 + $0xc8] sm:$0xff] }
 0x3f1   : > { %10630 = vmatprep.subr.bf16.mxu1 %v11568_v29  ;;  %v7154_v23 = vpack.c.bf16 %v7129_v63, %v7128_v27  ;;  %v7446_v63 = vld [vmem:[#allocation2 + $0x151] sm:$0xff]  ;;  %v7451_v27 = vld [vmem:[#allocation2 + $0x189] sm:$0xff] }
 0x3f3   : > { %10567 = vmatmul.mubr.bf16.gmra.mrb[16].mxu1 %v13850_v17  ;;  %v6506_v17 = vld [vmem:[#allocation2 + $0x39] sm:$0xff] }
 0x3f4   : > { %10570 = vmatprep.mubr.bf16.mxu1 %v13859_v26  ;;  %v6508_v26 = vld [vmem:[#allocation2 + $0x51] sm:$0xff] }
 0x3fb   : > { %10571 = vmatmul.mubr.bf16.gmra.mrb[20].mxu1 %v13864_v53  ;;  %v14035_v53 = vpack.c.bf16 %v6506_v17, %v6505_v35  ;;  %v7131_v17 = vld [vmem:[#allocation2 + $0xe0] sm:$0xff]  ;;  %v7130_v35 = vld [vmem:[#allocation2 + $0xd8] sm:$0xff] }
 0x3fc   : > { %10574 = vmatprep.mubr.bf16.mxu1 %v13873_v7  ;;  %v6507_v7 = vld [vmem:[#allocation2 + $0x49] sm:$0xff] }
 0x403   : > { %10575 = vmatmul.mubr.bf16.gmra.mrb[24].mxu1 %v13877_v20  ;;  %v11569_v20 = vld [vmem:[%s14515_s3 + $0x148] sm:$0xff]  }
 0x404   : > { %10578 = vmatprep.mubr.bf16.mxu1 %v13881_v14  ;;  %v14040_v14 = vpack.c.bf16 %v6508_v26, %v6507_v7  ;;  %v7133_v26 = vld [vmem:[#allocation2 + $0xf8] sm:$0xff]  ;;  %v7155_v7 = vpack.c.bf16 %v7131_v17, %v7130_v35  ;;  %v7453_v35 = vld [vmem:[#allocation2 + $0x1a1] sm:$0xff] }
 0x40b   : > { %10579 = vmatmul.mubr.bf16.gmra.mrb[28].mxu1 %v14032_v21 }
 0x40c   : > { %10598 = vmatprep.mubr.bf16.mxu1 %v6535_v38  ;;  %v11590_v38 = vld [vmem:[%s14515_s3 + $0x1f0] sm:$0xff]  }
 0x413   : > { %10599 = vmatmul.mubr.bf16.vlgmr.msra.gmra.mrb[0].mxu1 %v14035_v53 }
 0x414   : > { %10602 = vmatprep.mubr.bf16.mxu1 %v14040_v14  ;;  %10631 = vmatpush3.bf16.msra.mxu1 %v11568_v29  ;;  %v7126_v29 = vld [vmem:[#allocation2 + $0xa8] sm:$0xff] }
 0x415   : > { %10632 = vmatprep.subr.bf16.mxu1 %v11569_v20  ;;  %v7153_v49 = vpack.c.bf16 %v7127_v24, %v7126_v29 }
 0x418   : > { %10633 = vmatpush3.bf16.msra.mxu1 %v11569_v20  ;;  %v7132_v20 = vld [vmem:[#allocation2 + $0xf0] sm:$0xff] }
 0x419   : > { %10634 = vmatprep.subr.bf16.mxu1 %v11570_v50  ;;  %v7156_v46 = vpack.c.bf16 %v7133_v26, %v7132_v20  ;;  %v7452_v26 = vld [vmem:[#allocation2 + $0x199] sm:$0xff] }
 0x41a   : > { %v7728_v20 = vld [vmem:[#allocation2 + $0x32] sm:$0xff] }
 0x41b   : > { %10603 = vmatmul.mubr.bf16.gmra.mrb[4].mxu1 %v14049_v36 }
 0x41c   : > { %10606 = vmatprep.mubr.bf16.mxu1 %v6539_v2  ;;  %10635 = vmatpush3.bf16.msra.mxu1 %v11570_v50  ;;  %v11591_v50 = vld [vmem:[%s14515_s3 + $0x1f8] sm:$0xff]   ;;  %v7137_v2 = vld [vmem:[#allocation2 + $0x128] sm:$0xff] }
 0x41d   : > { %10636 = vmatprep.subr.bf16.mxu1 %v11571_v30 }
 0x420   : > { %10637 = vmatpush3.bf16.msra.mxu1 %v11571_v30  ;;  %v7135_v30 = vld [vmem:[#allocation2 + $0x110] sm:$0xff] }
 0x421   : > { %10638 = vmatprep.subr.bf16.mxu1 %v11572_v11 }
 0x423   : > { %10607 = vmatmul.mubr.bf16.gmra.mrb[8].mxu1 %v14060_v8 }
 0x424   : > { %10610 = vmatprep.mubr.bf16.mxu1 %v13807_v6  ;;  %10639 = vmatpush3.bf16.msra.mxu1 %v11572_v11  ;;  %v11576_v6 = vld [vmem:[%s14515_s3 + $0x180] sm:$0xff]   ;;  %v7134_v11 = vld [vmem:[#allocation2 + $0x108] sm:$0xff] }
 0x425   : > { %10640 = vmatprep.subr.bf16.mxu1 %v11573_v41  ;;  %v7157_v25 = vpack.c.bf16 %v7135_v30, %v7134_v11  ;;  %v7731_v30 = vld [vmem:[#allocation2 + $0x52] sm:$0xff]  ;;  %v7733_v11 = vld [vmem:[#allocation2 + $0x6a] sm:$0xff] }
 0x428   : > { %10641 = vmatpush3.bf16.msra.mxu1 %v11573_v41  ;;  %v7158_v41 = vpack.c.bf16 %v7137_v2, %v7136_v40  ;;  %v7732_v2 = vld [vmem:[#allocation2 + $0x62] sm:$0xff] }
 0x429   : > { %10642 = vmatprep.subr.bf16.mxu1 %v11574_v44  ;;  %v7762_v40 = vpack.c.bf16 %v7733_v11, %v7732_v2 }
 0x42b   : > { %10611 = vmatmul.mubr.bf16.gmra.mrb[12].mxu1 %v6542_v10  ;;  %v7141_v10 = vld [vmem:[#allocation2 + $0x158] sm:$0xff] }
 0x42c   : > { %10614 = vmatprep.mubr.bf16.mxu1 %v13827_v61  ;;  %10643 = vmatpush3.bf16.msra.mxu1 %v11574_v44  ;;  %v11579_v61 = vld [vmem:[%s14515_s3 + $0x198] sm:$0xff]   ;;  %v7139_v44 = vld [vmem:[#allocation2 + $0x140] sm:$0xff] }
 0x42d   : > { %10644 = vmatprep.subr.bf16.mxu1 %v11575_v39 }
 0x430   : > { %10645 = vmatpush3.bf16.msra.mxu1 %v11575_v39  ;;  %v7138_v39 = vld [vmem:[#allocation2 + $0x138] sm:$0xff] }
 0x431   : > { %10678 = vmatprep.subr.bf16.mxu1 %v11576_v6 }
 0x433   : > { %10615 = vmatmul.mubr.bf16.gmra.mrb[16].mxu1 %v13820_v22  ;;  %v11578_v22 = vld [vmem:[%s14515_s3 + $0x190] sm:$0xff]  }
 0x434   : > { %10618 = vmatprep.mubr.bf16.mxu1 %v13847_v51  ;;  %v11581_v51 = vld [vmem:[%s14515_s3 + $0x1a8] sm:$0xff]  }
 0x43b   : > { %10619 = vmatmul.mubr.bf16.gmra.mrb[20].mxu1 %v13842_v19  ;;  %v11580_v19 = vld [vmem:[%s14515_s3 + $0x1a0] sm:$0xff]  }
 0x43c   : > { %10622 = vmatprep.mubr.bf16.mxu1 %v13861_v45  ;;  %v11583_v45 = vld [vmem:[%s14515_s3 + $0x1b8] sm:$0xff]  }
 0x443   : > { %10623 = vmatmul.mubr.bf16.gmra.mrb[24].mxu1 %v13857_v1  ;;  %v11582_v1 = vld [vmem:[%s14515_s3 + $0x1b0] sm:$0xff]  }
 0x444   : > { %10626 = vmatprep.mubr.bf16.mxu1 %v13875_v12  ;;  %v6839_v12 = vld [vmem:[#allocation2 + $0x182] sm:$0xff] }
 0x44b   : > { %10627 = vmatmul.mubr.bf16.gmra.mrb[28].mxu1 %v13871_v32  ;;  %v11584_v32 = vld [vmem:[%s14515_s3 + $0x1c0] sm:$0xff]  }
 0x44c   : > { %10646 = vmatprep.mubr.bf16.mxu1 %v13924_v16  ;;  %v6840_v16 = vld [vmem:[#allocation2 + $0x18a] sm:$0xff] }
 0x453   : > { %10647 = vmatmul.mubr.bf16.vlgmr.msra.gmra.mrb[0].mxu1 %v13929_v47  ;;  %v7117_v47 = vld [vmem:[#allocation2 + $0x38] sm:$0xff] }
 0x454   : > { %10650 = vmatprep.mubr.bf16.mxu1 %v13936_v31  ;;  %10679 = vmatpush3.bf16.msra.mxu1 %v11576_v6  ;;  %v14127_v31 = vpack.c.bf16 %v6840_v16, %v6839_v12  ;;  %v7159_v6 = vpack.c.bf16 %v7139_v44, %v7138_v39  ;;  %v11594_v12 = vld [vmem:[%s14515_s3 + $0x210] sm:$0xff]   ;;  %v7735_v44 = vld [vmem:[#allocation2 + $0x82] sm:$0xff]  ;;  %v7737_v39 = vld [vmem:[#allocation2 + $0x9a] sm:$0xff] }
 0x455   : > { %10680 = vmatprep.subr.bf16.mxu1 %v11577_v62 }
 0x458   : > { %10681 = vmatpush3.bf16.msra.mxu1 %v11577_v62  ;;  %v7140_v62 = vld [vmem:[#allocation2 + $0x150] sm:$0xff] }
 0x459   : > { %10682 = vmatprep.subr.bf16.mxu1 %v11578_v22 }
 0x45b   : > { %10651 = vmatmul.mubr.bf16.gmra.mrb[4].mxu1 %v13941_v59  ;;  %v7116_v59 = vld [vmem:[#allocation2 + $0x30] sm:$0xff] }
 0x45c   : > { %10654 = vmatprep.mubr.bf16.mxu1 %v13948_v58  ;;  %10683 = vmatpush3.bf16.msra.mxu1 %v11578_v22  ;;  %v7148_v58 = vpack.c.bf16 %v7117_v47, %v7116_v59  ;;  %v7160_v22 = vpack.c.bf16 %v7141_v10, %v7140_v62  ;;  %v7435_v47 = vld [vmem:[#allocation2 + $0xc9] sm:$0xff]  ;;  %v7736_v10 = vld [vmem:[#allocation2 + $0x92] sm:$0xff] }
 0x45d   : > { %10684 = vmatprep.subr.bf16.mxu1 %v11579_v61  ;;  %v7432_v59 = vld [vmem:[#allocation2 + $0xa9] sm:$0xff]  ;;  %v7764_v62 = vpack.c.bf16 %v7737_v39, %v7736_v10  ;;  %v9477_v39 = vld [vmem:[%s11679_s29 + $0x14] sm:$0x1] }
 0x460   : > { %10685 = vmatpush3.bf16.msra.mxu1 %v11579_v61  ;;  %v7143_v61 = vld [vmem:[#allocation2 + $0x170] sm:$0xff] }
 0x461   : > { %10686 = vmatprep.subr.bf16.mxu1 %v11580_v19 }
 0x463   : > { %10655 = vmatmul.mubr.bf16.gmra.mrb[8].mxu1 %v13953_v34  ;;  %v7119_v34 = vld [vmem:[#allocation2 + $0x50] sm:$0xff] }
 0x464   : > { %10658 = vmatprep.mubr.bf16.mxu1 %v13960_v3  ;;  %10687 = vmatpush3.bf16.msra.mxu1 %v11580_v19  ;;  %v7121_v3 = vld [vmem:[#allocation2 + $0x68] sm:$0xff] }
 0x465   : > { %10688 = vmatprep.subr.bf16.mxu1 %v11581_v51  ;;  %v7142_v19 = vld [vmem:[#allocation2 + $0x168] sm:$0xff] }
 0x468   : > { %10689 = vmatpush3.bf16.msra.mxu1 %v11581_v51  ;;  %v7161_v51 = vpack.c.bf16 %v7143_v61, %v7142_v19  ;;  %v7739_v61 = vld [vmem:[#allocation2 + $0xb2] sm:$0xff]  ;;  %v7740_v19 = vld [vmem:[#allocation2 + $0xc2] sm:$0xff] }
 0x469   : > { %10690 = vmatprep.subr.bf16.mxu1 %v11582_v1 }
 0x46b   : > { %10659 = vmatmul.mubr.bf16.gmra.mrb[12].mxu1 %v13965_v55  ;;  %v7118_v55 = vld [vmem:[#allocation2 + $0x48] sm:$0xff] }
 0x46c   : > { %10662 = vmatprep.mubr.bf16.mxu1 %v13972_v33  ;;  %10691 = vmatpush3.bf16.msra.mxu1 %v11582_v1  ;;  %v7149_v33 = vpack.c.bf16 %v7119_v34, %v7118_v55  ;;  %v11615_v1 = vld [vmem:[#allocation2] sm:$0xff]  ;;  %v7460_v34 = vpack.c.bf16 %v7435_v47, %v14070_v54  ;;  %v7747_v47 = vld [vmem:[#allocation2 + $0x112] sm:$0xff] }
 0x46d   : > { %10692 = vmatprep.subr.bf16.mxu1 %v11583_v45  ;;  %v7439_v55 = vld [vmem:[#allocation2 + $0xf9] sm:$0xff] }
 0x470   : > { %10693 = vmatpush3.bf16.msra.mxu1 %v11583_v45  ;;  %v7163_v45 = vpack.c.bf16 %v11615_v1, %v11615_v1 }
 0x471   : > { %10726 = vmatprep.subr.bf16.mxu1 %v11584_v32 }
 0x473   : > { %10663 = vmatmul.mubr.bf16.gmra.mrb[16].mxu1 %v13974_v42  ;;  %v7120_v42 = vld [vmem:[#allocation2 + $0x60] sm:$0xff] }
 0x474   : > { %10666 = vmatprep.mubr.bf16.mxu1 %v13978_v28  ;;  %v11585_v28 = vld [vmem:[%s14515_s3 + $0x1c8] sm:$0xff]  }
 0x47b   : > { %10667 = vmatmul.mubr.bf16.gmra.mrb[20].mxu1 %v13980_v43  ;;  %v7150_v43 = vpack.c.bf16 %v7121_v3, %v7120_v42  ;;  %v7437_v3 = vld [vmem:[#allocation2 + $0xe1] sm:$0xff] }
 0x47c   : > { %10670 = vmatprep.mubr.bf16.mxu1 %v13984_v13  ;;  %v11586_v13 = vld [vmem:[%s14515_s3 + $0x1d0] sm:$0xff]  }
 0x483   : > { %10671 = vmatmul.mubr.bf16.gmra.mrb[24].mxu1 %v13986_v56  ;;  %v7123_v56 = vld [vmem:[#allocation2 + $0x80] sm:$0xff] }
 0x484   : > { %10674 = vmatprep.mubr.bf16.mxu1 %v13990_v57  ;;  %v7122_v57 = vld [vmem:[#allocation2 + $0x78] sm:$0xff] }
 0x485   : > { %v7151_v60 = vpack.c.bf16 %v7123_v56, %v7122_v57  ;;  %v7443_v56 = vld [vmem:[#allocation2 + $0x129] sm:$0xff] }
 0x48b   : > { %10675 = vmatmul.mubr.bf16.gmra.mrb[28].mxu1 %v14127_v31 }
 0x48c   : > { %10694 = vmatprep.mubr.bf16.mxu1 %v7148_v58 }
 0x493   : > { %10695 = vmatmul.mubr.bf16.vlgmr.msra.gmra.mrb[0].mxu1 %v7149_v33  ;;  %v7436_v33 = vld [vmem:[#allocation2 + $0xd9] sm:$0xff] }
 0x494   : > { %10698 = vmatprep.mubr.bf16.mxu1 %v7150_v43  ;;  %10727 = vmatpush3.bf16.msra.mxu1 %v11584_v32  ;;  %v11593_v32 = vld [vmem:[%s14515_s3 + $0x208] sm:$0xff]   ;;  %v7461_v42 = vpack.c.bf16 %v7437_v3, %v7436_v33  ;;  %v11599_v43 = vld [vmem:[%s14515_s3 + $0x238] sm:$0xff]  }
 0x495   : > { %10728 = vmatprep.subr.bf16.mxu1 %v11585_v28  ;;  %v7751_v3 = vld [vmem:[#allocation2 + $0x142] sm:$0xff]  ;;  %v7753_v33 = vld [vmem:[#allocation2 + $0x15a] sm:$0xff] }
 0x498   : > { %10729 = vmatpush3.bf16.msra.mxu1 %v11585_v28  ;;  %v7438_v28 = vld [vmem:[#allocation2 + $0xf1] sm:$0xff] }
 0x499   : > { %10730 = vmatprep.subr.bf16.mxu1 %v11586_v13  ;;  %v7462_v54 = vpack.c.bf16 %v7439_v55, %v7438_v28  ;;  %v7752_v55 = vld [vmem:[#allocation2 + $0x152] sm:$0xff] }
 0x49a   : > { %v7772_v28 = vpack.c.bf16 %v7753_v33, %v7752_v55 }
 0x49b   : > { %10699 = vmatmul.mubr.bf16.gmra.mrb[4].mxu1 %v7151_v60  ;;  %v7442_v60 = vld [vmem:[#allocation2 + $0x121] sm:$0xff] }
 0x49c   : > { %10702 = vmatprep.mubr.bf16.mxu1 %v7152_v9  ;;  %10731 = vmatpush3.bf16.msra.mxu1 %v11586_v13  ;;  %v7441_v13 = vld [vmem:[#allocation2 + $0x111] sm:$0xff]  ;;  %v7464_v4 = vpack.c.bf16 %v7443_v56, %v7442_v60  ;;  %v7447_v9 = vld [vmem:[#allocation2 + $0x159] sm:$0xff] }
 0x49d   : > { %10732 = vmatprep.subr.bf16.mxu1 %v11587_v52  ;;  %v7463_v57 = vpack.c.bf16 %v7441_v13, %v7440_v0  ;;  %v7466_v29 = vpack.c.bf16 %v7447_v9, %v7446_v63  ;;  %v7758_v56 = vld [vmem:[#allocation2 + $0x19a] sm:$0xff]  ;;  %v7759_v0 = vld [vmem:[#allocation2 + $0x1a2] sm:$0xff] }
 0x49e   : > { %v9478_v60 = vld [vmem:[%s11679_s29 + $0x18] sm:$0xf] }
 0x49f   : > { %v8107_v9 = vshrl.u32 %v9478_v60, 16 }
 0x4a0   : > { %10733 = vmatpush3.bf16.msra.mxu1 %v11587_v52  ;;  %v7445_v52 = vld [vmem:[#allocation2 + $0x141] sm:$0xff] }
 0x4a1   : > { %10734 = vmatprep.subr.bf16.mxu1 %v11588_v48 }
 0x4a3   : > { %10703 = vmatmul.mubr.bf16.gmra.mrb[8].mxu1 %v7153_v49  ;;  %v7449_v49 = vld [vmem:[#allocation2 + $0x171] sm:$0xff] }
 0x4a4   : > { %10706 = vmatprep.mubr.bf16.mxu1 %v7154_v23  ;;  %10735 = vmatpush3.bf16.msra.mxu1 %v11588_v48  ;;  %v7444_v48 = vld [vmem:[#allocation2 + $0x139] sm:$0xff] }
 0x4a5   : > { %10736 = vmatprep.subr.bf16.mxu1 %v11589_v15  ;;  %v7465_v24 = vpack.c.bf16 %v7445_v52, %v7444_v48  ;;  %v9479_v52 = vld [vmem:[%s11679_s29 + $0x1c] sm:$0xf]  ;;  %v8110_v48 = vshll.u32 %v9478_v60, 16 }
 0x4a8   : > { %10737 = vmatpush3.bf16.msra.mxu1 %v11589_v15  ;;  %v7448_v15 = vld [vmem:[#allocation2 + $0x169] sm:$0xff] }
 0x4a9   : > { %10738 = vmatprep.subr.bf16.mxu1 %v11590_v38  ;;  %v7467_v23 = vpack.c.bf16 %v7449_v49, %v7448_v15  ;;  %v8120_v49 = vshrl.u32 %v9479_v52, 16  ;;  %v8109_v15 = vrot.slane %v8107_v9, 4 }
 0x4ab   : > { %10707 = vmatmul.mubr.bf16.gmra.mrb[12].mxu1 %v7155_v7  ;;  %v7469_v7 = vpack.c.bf16 %v7453_v35, %v7452_v26 }
 0x4ac   : > { %10710 = vmatprep.mubr.bf16.mxu1 %v7156_v46  ;;  %10739 = vmatpush3.bf16.msra.mxu1 %v11590_v38  ;;  %v7450_v38 = vld [vmem:[#allocation2 + $0x181] sm:$0xff] }
 0x4ad   : > { %10740 = vmatprep.subr.bf16.mxu1 %v11591_v50  ;;  %v7468_v17 = vpack.c.bf16 %v7451_v27, %v7450_v38  ;;  %v9476_v27 = vld [vmem:[%s11679_s29 + $0x10] sm:$0xf] }
 0x4ae   : > { %v8092_v35 = vshll.u32 %v9476_v27, 16 }
 0x4b0   : > { %10741 = vmatpush3.bf16.msra.mxu1 %v11591_v50  ;;  %v7729_v50 = vld [vmem:[#allocation2 + $0x3a] sm:$0xff] }
 0x4b1   : > { %10774 = vmatprep.subr.bf16.mxu1 %v11592_v37  ;;  %v7760_v46 = vpack.c.bf16 %v7729_v50, %v7728_v20  ;;  %v8122_v20 = vrot.slane %v8120_v49, 4  ;;  %v9480_v50 = vld [vmem:[%s11679_s29 + $0x20] sm:$0x1] }
 0x4b3   : > { %10711 = vmatmul.mubr.bf16.gmra.mrb[16].mxu1 %v7157_v25 }
 0x4b4   : > { %10714 = vmatprep.mubr.bf16.mxu1 %v7158_v41  ;;  %v7734_v41 = vld [vmem:[#allocation2 + $0x7a] sm:$0xff] }
 0x4bb   : > { %10715 = vmatmul.mubr.bf16.gmra.mrb[20].mxu1 %v7159_v6  ;;  %v7763_v6 = vpack.c.bf16 %v7735_v44, %v7734_v41  ;;  %v8126_v44 = vshll.u32 %v9480_v50, 16  ;;  %v9496_v50 = vld [vmem:[%s11679_s29 + $0x60] sm:$0xf] }
 0x4bc   : > { %10718 = vmatprep.mubr.bf16.mxu1 %v7160_v22  ;;  %v7738_v22 = vld [vmem:[#allocation2 + $0xaa] sm:$0xff] }
 0x4bd   : > { %v7765_v1 = vpack.c.bf16 %v7739_v61, %v7738_v22 }
 0x4c3   : > { %10719 = vmatmul.mubr.bf16.gmra.mrb[24].mxu1 %v7161_v51  ;;  %v7741_v51 = vld [vmem:[#allocation2 + $0xca] sm:$0xff] }
 0x4c4   : > { %10722 = vmatprep.mubr.bf16.mxu1 %v14032_v21  ;;  %v7429_v21 = vld [vmem:[#allocation2 + $0x81] sm:$0xff] }
 0x4c5   : > { %v7457_v16 = vpack.c.bf16 %v7429_v21, %v14047_v18  ;;  %v11597_v18 = vld [vmem:[%s14515_s3 + $0x228] sm:$0xff]   ;;  %v7744_v21 = vld [vmem:[#allocation2 + $0xf2] sm:$0xff] }
 0x4cb   : > { %10723 = vmatmul.mubr.bf16.gmra.mrb[28].mxu1 %v7163_v45  ;;  %v7766_v45 = vpack.c.bf16 %v7741_v51, %v7740_v19 }
 0x4cc   : > { %10742 = vmatprep.mubr.bf16.mxu1 %v14035_v53  ;;  %v11595_v53 = vld [vmem:[%s14515_s3 + $0x218] sm:$0xff]  }
 0x4d3   : > { %10743 = vmatmul.mubr.bf16.vlgmr.msra.gmra.mrb[0].mxu1 %v14040_v14  ;;  %v11596_v14 = vld [vmem:[%s14515_s3 + $0x220] sm:$0xff]  }
 0x4d4   : > { %10746 = vmatprep.mubr.bf16.mxu1 %v14049_v36  ;;  %10775 = vmatpush3.bf16.msra.mxu1 %v11592_v37  ;;  %v7433_v36 = vld [vmem:[#allocation2 + $0xb1] sm:$0xff] }
 0x4d5   : > { %10776 = vmatprep.subr.bf16.mxu1 %v11593_v32  ;;  %v7459_v58 = vpack.c.bf16 %v7433_v36, %v7432_v59  ;;  %v7730_v37 = vld [vmem:[#allocation2 + $0x4a] sm:$0xff]  ;;  %v7748_v59 = vld [vmem:[#allocation2 + $0x122] sm:$0xff] }
 0x4d6   : > { %v7761_v25 = vpack.c.bf16 %v7731_v30, %v7730_v37  ;;  %v7746_v36 = vld [vmem:[#allocation2 + $0x10a] sm:$0xff] }
 0x4d8   : > { %10777 = vmatpush3.bf16.msra.mxu1 %v11593_v32  ;;  %v7742_v32 = vld [vmem:[#allocation2 + $0xda] sm:$0xff] }
 0x4d9   : > { %10778 = vmatprep.subr.bf16.mxu1 %v11594_v12 }
 0x4db   : > { %10747 = vmatmul.mubr.bf16.gmra.mrb[4].mxu1 %v7457_v16  ;;  %v7745_v16 = vld [vmem:[#allocation2 + $0xfa] sm:$0xff] }
 0x4dc   : > { %10750 = vmatprep.mubr.bf16.mxu1 %v14060_v8  ;;  %10779 = vmatpush3.bf16.msra.mxu1 %v11594_v12  ;;  %v11598_v8 = vld [vmem:[%s14515_s3 + $0x230] sm:$0xff]   ;;  %v7743_v12 = vld [vmem:[#allocation2 + $0xe2] sm:$0xff] }
 0x4dd   : > { %10780 = vmatprep.subr.bf16.mxu1 %v11595_v53 }
 0x4e0   : > { %10781 = vmatpush3.bf16.msra.mxu1 %v11595_v53  ;;  %v7767_v53 = vpack.c.bf16 %v7743_v12, %v7742_v32  ;;  %v8128_v12 = vrot.slane %v8126_v44, 5 }
 0x4e1   : > { %10782 = vmatprep.subr.bf16.mxu1 %v11596_v14 }
 0x4e3   : > { %10751 = vmatmul.mubr.bf16.gmra.mrb[8].mxu1 %v7459_v58  ;;  %v7749_v58 = vld [vmem:[#allocation2 + $0x12a] sm:$0xff] }
 0x4e4   : > { %10754 = vmatprep.mubr.bf16.mxu1 %v7460_v34  ;;  %10783 = vmatpush3.bf16.msra.mxu1 %v11596_v14  ;;  %v7768_v14 = vpack.c.bf16 %v7745_v16, %v7744_v21  ;;  %v7770_v34 = vpack.c.bf16 %v7749_v58, %v7748_v59  ;;  %v8102_v16 = vshll.u32 %v9477_v39, 16  ;;  %v9494_v39 = vld [vmem:[%s11679_s29 + $0x58] sm:$0xf] }
 0x4e5   : > { %10784 = vmatprep.subr.bf16.mxu1 %v11597_v18 }
 0x4e8   : > { %10785 = vmatpush3.bf16.msra.mxu1 %v11597_v18  ;;  %v7769_v18 = vpack.c.bf16 %v7747_v47, %v7746_v36  ;;  %v9486_v36 = vld [vmem:[%s11679_s29 + $0x38] sm:$0x1] }
 0x4e9   : > { %10786 = vmatprep.subr.bf16.mxu1 %v11598_v8 }
 0x4eb   : > { %10755 = vmatmul.mubr.bf16.gmra.mrb[12].mxu1 %v7461_v42 }
 0x4ec   : > { %10758 = vmatprep.mubr.bf16.mxu1 %v7462_v54  ;;  %10787 = vmatpush3.bf16.msra.mxu1 %v11598_v8  ;;  %v7750_v8 = vld [vmem:[#allocation2 + $0x13a] sm:$0xff]  ;;  %v7755_v54 = vld [vmem:[#allocation2 + $0x172] sm:$0xff] }
 0x4ed   : > { %10788 = vmatprep.subr.bf16.mxu1 %v11599_v43  ;;  %v7771_v42 = vpack.c.bf16 %v7751_v3, %v7750_v8  ;;  %v9490_v8 = vld [vmem:[%s11679_s29 + $0x48] sm:$0xf] }
 0x4ee   : > { %v8203_v60 = vshrl.u32 %v9490_v8, 16 }
 0x4f0   : > { %10789 = vmatpush3.bf16.msra.mxu1 %v11599_v43  ;;  %v7754_v43 = vld [vmem:[#allocation2 + $0x16a] sm:$0xff] }
 0x4f1   : > { %v7773_v13 = vpack.c.bf16 %v7755_v54, %v7754_v43 }
 0x4f3   : > { %10759 = vmatmul.mubr.bf16.gmra.mrb[16].mxu1 %v7463_v57  ;;  %v7775_v57 = vpack.c.bf16 %v7759_v0, %v7758_v56  ;;  %v8174_v56 = vshll.u32 %v9486_v36, 16 }
 0x4f4   : > { %10762 = vmatprep.mubr.bf16.mxu1 %v7464_v4  ;;  %v9475_v4 = vld [vmem:[%s11679_s29 + $0xc] sm:$0xf] }
 0x4f5   : > { %v8086_v63 = vshll.u32 %v9475_v4, 16 }
 0x4f7   : > { %v8088_v38 = vrot.slane %v8086_v63, 5 }
 0x4fb   : > { %10763 = vmatmul.mubr.bf16.gmra.mrb[20].mxu1 %v7465_v24  ;;  %v8083_v24 = vshrl.u32 %v9475_v4, 16  ;;  %v8206_v4 = vshll.u32 %v9490_v8, 16 }
 0x4fc   : > { %10766 = vmatprep.mubr.bf16.mxu1 %v7466_v29  ;;  %v8116_v29 = vshll.u32 %v9479_v52, 16 }
 0x4fe   : > { %v8118_v26 = vrot.slane %v8116_v29, 5 }
 0x500   : > { %v8123_v41 = vor.u32 %v8122_v20, %v8118_v26  ;;  %v8208_v20 = vrot.slane %v8206_v4, 5 }
 0x502   : > { %v8124_v32 = vrot.slane %v8123_v41, 4 }
 0x503   : > { %10767 = vmatmul.mubr.bf16.gmra.mrb[24].mxu1 %v7467_v23  ;;  %v8085_v23 = vrot.slane %v8083_v24, 4 }
 0x504   : > { %10770 = vmatprep.mubr.bf16.mxu1 %v7468_v17  ;;  %v9484_v17 = vld [vmem:[%s11679_s29 + $0x30] sm:$0xf]  ;;  %v8129_v43 = vsel %vm11750_vm2, %v8124_v32, %v8128_v12 }
 0x505   : > { %v8155_v37 = vshrl.u32 %v9484_v17, 16  ;;  %v8158_v30 = vshll.u32 %v9484_v17, 16  ;;  %v8089_v11 = vor.u32 %v8088_v38, %v8085_v23  ;;  %v8176_v23 = vrot.slane %v8174_v56, 5  ;;  %v9488_v17 = vld [vmem:[%s11679_s29 + $0x40] sm:$0xf] }
 0x506   : > { %v8188_v44 = vshll.u32 %v9488_v17, 16 }
 0x507   : > { %v8157_v22 = vrot.slane %v8155_v37, 4  ;;  %v8160_v61 = vrot.slane %v8158_v30, 5 }
 0x509   : > { %v8161_v59 = vor.u32 %v8160_v61, %v8157_v22  ;;  %v8251_v61 = vshrl.u32 %v9496_v50, 16 }
 0x50b   : > { %10771 = vmatmul.mubr.bf16.gmra.mrb[28].mxu1 %v7469_v7  ;;  %v8096_v7 = vshrl.u32 %v9476_v27, 16  ;;  %v8162_v52 = vrot.slane %v8161_v59, 4  ;;  %v9487_v27 = vld [vmem:[%s11679_s29 + $0x3c] sm:$0xf]  ;;  %v8253_v8 = vrot.slane %v8251_v61, 4 }
 0x50c   : > { %10790 = vmatprep.mubr.bf16.mxu1 %v7760_v46  ;;  %v9485_v46 = vld [vmem:[%s11679_s29 + $0x34] sm:$0xf]  ;;  %v8182_v41 = vshll.u32 %v9487_v27, 16  ;;  %v9503_v61 = vld [vmem:[%s11679_s29 + $0x7c] sm:$0xf] }
 0x50d   : > { %v8098_v10 = vrot.slane %v8096_v7, 4  ;;  %v8205_v7 = vrot.slane %v8203_v60, 4 }
 0x50e   : > { %v8184_v36 = vrot.slane %v8182_v41, 5 }
 0x513   : > { %10791 = vmatmul.mubr.bf16.vlgmr.msra.gmra.mrb[0].mxu1 %v7761_v25  ;;  %v9481_v25 = vld [vmem:[%s11679_s29 + $0x24] sm:$0xf] }
 0x514   : > { %10794 = vmatprep.mubr.bf16.mxu1 %v7762_v40  ;;  %v8094_v40 = vrot.slane %v8092_v35, 5  ;;  %v8131_v19 = vshrl.u32 %v9481_v25, 16  ;;  %v8134_v51 = vshll.u32 %v9481_v25, 16 }
 0x516   : > { %v8099_v21 = vor.u32 %v8098_v10, %v8094_v40  ;;  %v8133_v58 = vrot.slane %v8131_v19, 4  ;;  %v9497_v10 = vld [vmem:[%s11679_s29 + $0x64] sm:$0xf]  ;;  %v8254_v19 = vshll.u32 %v9496_v50, 16 }
 0x517   : > { %v8260_v12 = vshll.u32 %v9497_v10, 16 }
 0x518   : > { %v8100_v54 = vrot.slane %v8099_v21, 4  ;;  %v8264_v21 = vshrl.u32 %v9497_v10, 16 }
 0x51a   : > { %v8266_v56 = vrot.slane %v8264_v21, 4 }
 0x51b   : > { %10795 = vmatmul.mubr.bf16.gmra.mrb[4].mxu1 %v7763_v6  ;;  %v8164_v6 = vshll.u32 %v9485_v46, 16 }
 0x51c   : > { %10798 = vmatprep.mubr.bf16.mxu1 %v7764_v62  ;;  %v8168_v62 = vshrl.u32 %v9485_v46, 16 }
 0x51e   : > { %v8170_v47 = vrot.slane %v8168_v62, 4  ;;  %v9492_v62 = vld [vmem:[%s11679_s29 + $0x50] sm:$0x1] }
 0x51f   : > { %v8222_v59 = vshll.u32 %v9492_v62, 16 }
 0x523   : > { %10799 = vmatmul.mubr.bf16.gmra.mrb[8].mxu1 %v7765_v1 }
 0x524   : > { %10802 = vmatprep.mubr.bf16.mxu1 %v7766_v45  ;;  %v8090_v45 = vrot.slane %v8089_v11, 4  ;;  %v9493_v11 = vld [vmem:[%s11679_s29 + $0x54] sm:$0xf] }
 0x525   : > { %v8230_v32 = vshll.u32 %v9493_v11, 16 }
 0x526   : > { %v8095_v55 = vsel %vm11750_vm2, %v8090_v45, %v8094_v40  ;;  %v8227_v45 = vshrl.u32 %v9493_v11, 16  ;;  %v9499_v11 = vld [vmem:[%s11679_s29 + $0x6c] sm:$0xf] }
 0x527   : > { %v14205_v63 = vunpack.c.l.bf16 %v8095_v55 }
 0x52b   : > { %10803 = vmatmul.mubr.bf16.gmra.mrb[12].mxu1 %v7767_v53  ;;  %v9482_v53 = vld [vmem:[%s11679_s29 + $0x28] sm:$0xf] }
 0x52c   : > { %10806 = vmatprep.mubr.bf16.mxu1 %v7768_v14  ;;  %v8166_v14 = vrot.slane %v8164_v6, 5  ;;  %v8140_v33 = vshll.u32 %v9482_v53, 16  ;;  %v8192_v6 = vshrl.u32 %v9488_v17, 16 }
 0x52e   : > { %v8171_v0 = vor.u32 %v8170_v47, %v8166_v14  ;;  %v14207_v29 = vrot.slane %v8140_v33, 5  ;;  %v8167_v46 = vsel %vm11750_vm2, %v8162_v52, %v8166_v14  ;;  %v14233_v47 = vrot.slane %v8188_v44, 5 }
 0x52f   : > { %v8224_v52 = vrot.slane %v8222_v59, 5  ;;  %v8308_v59 = vshll.u32 %v9503_v61, 16 }
 0x533   : > { %10807 = vmatmul.mubr.bf16.gmra.mrb[16].mxu1 %v7769_v18  ;;  %v8136_v18 = vrot.slane %v8134_v51, 5  ;;  %v14231_v51 = vunpack.c.l.bf16 %v8167_v46 }
 0x534   : > { %10810 = vmatprep.mubr.bf16.mxu1 %v7770_v34  ;;  %v9483_v34 = vld [vmem:[%s11679_s29 + $0x2c] sm:$0x1] }
 0x535   : > { %v8137_v9 = vor.u32 %v8136_v18, %v8133_v58  ;;  %v9489_v18 = vld [vmem:[%s11679_s29 + $0x44] sm:$0x1] }
 0x537   : > { %v14220_v37 = vrot.slane %v8137_v9, 4  ;;  %v8198_v9 = vshll.u32 %v9489_v18, 16  ;;  %v9500_v18 = vld [vmem:[%s11679_s29 + $0x70] sm:$0xf] }
 0x53b   : > { %10811 = vmatmul.mubr.bf16.gmra.mrb[20].mxu1 %v7771_v42  ;;  %v8144_v42 = vshrl.u32 %v9482_v53, 16  ;;  %v8240_v53 = vshrl.u32 %v9494_v39, 16 }
 0x53c   : > { %10814 = vmatprep.mubr.bf16.mxu1 %v7772_v28  ;;  %v9491_v28 = vld [vmem:[%s11679_s29 + $0x4c] sm:$0xf] }
 0x53d   : > { %v8146_v49 = vrot.slane %v8144_v42, 4  ;;  %v8216_v38 = vshrl.u32 %v9491_v28, 16  ;;  %v8229_v42 = vrot.slane %v8227_v45, 4 }
 0x53f   : > { %v8147_v40 = vor.u32 %v8146_v49, %v14207_v29  ;;  %v8218_v22 = vrot.slane %v8216_v38, 4  ;;  %v8143_v38 = vsel %vm11750_vm2, %v14220_v37, %v14207_v29  ;;  %v8200_v37 = vrot.slane %v8198_v9, 5 }
 0x540   : > { %v14262_v21 = vunpack.c.l.bf16 %v8143_v38 }
 0x541   : > { %v8148_v33 = vrot.slane %v8147_v40, 4 }
 0x543   : > { %10815 = vmatmul.mubr.bf16.gmra.mrb[24].mxu1 %v7773_v13  ;;  %v8104_v13 = vrot.slane %v8102_v16, 5  ;;  %v8236_v16 = vshll.u32 %v9494_v39, 16 }
 0x544   : > { %10818 = vmatprep.mubr.bf16.mxu1 %v14127_v31  ;;  %v8112_v31 = vrot.slane %v8110_v48, 5  ;;  %v8212_v48 = vshll.u32 %v9491_v28, 16  ;;  %v8232_v28 = vrot.slane %v8230_v32, 5 }
 0x546   : > { %v8113_v2 = vor.u32 %v8112_v31, %v8109_v15  ;;  %v14210_v15 = vunpack.c.l.bf16 %v8129_v43  ;;  %v8105_v31 = vsel %vm11750_vm2, %v8100_v54, %v8104_v13  ;;  %v14222_v30 = vrot.slane %v8212_v48, 5  ;;  %v9498_v43 = vld [vmem:[%s11679_s29 + $0x68] sm:$0x1]  ;;  %v9502_v48 = vld [vmem:[%s11679_s29 + $0x78] sm:$0xf] }
 0x547   : > { %v14225_v25 = vunpack.c.l.bf16 %v8105_v31  ;;  %v8262_v54 = vrot.slane %v8260_v12, 5  ;;  %v14240_v13 = vrot.slane %v8236_v16, 5  ;;  %v8299_v46 = vshrl.u32 %v9502_v48, 16 }
 0x548   : > { %v8114_v1 = vrot.slane %v8113_v2, 4  ;;  %v8179_v2 = vshrl.u32 %v9487_v27, 16  ;;  %v8219_v58 = vor.u32 %v8218_v22, %v14222_v30 }
 0x549   : > { %v8301_v32 = vrot.slane %v8299_v46, 4 }
 0x54a   : > { %v8119_v3 = vsel %vm11750_vm2, %v8114_v1, %v8118_v26  ;;  %v8172_v26 = vrot.slane %v8171_v0, 4  ;;  %v8209_v1 = vor.u32 %v8208_v20, %v8205_v7  ;;  %v8181_v14 = vrot.slane %v8179_v2, 4  ;;  %v9495_v0 = vld [vmem:[%s11679_s29 + $0x5c] sm:$0x1] }
 0x54b   : > { %10819 = vmatmul.mubr.bf16.gmra.mrb[28].mxu1 %v7775_v57  ;;  %v8150_v57 = vshll.u32 %v9483_v34, 16  ;;  %v14203_v24 = vunpack.c.l.bf16 %v8119_v3  ;;  %v8194_v34 = vrot.slane %v8192_v6, 4  ;;  %v8256_v3 = vrot.slane %v8254_v19, 5 }
 0x54c   : > { %v8177_v55 = vsel %vm11750_vm2, %v8172_v26, %v8176_v23  ;;  %v8210_v60 = vrot.slane %v8209_v1, 4  ;;  %v8185_v4 = vor.u32 %v8184_v36, %v8181_v14  ;;  %v8220_v49 = vrot.slane %v8219_v58, 4 }
 0x54d   : > { %v14215_v35 = vrot.slane %v8150_v57, 5  ;;  %v8242_v57 = vrot.slane %v8240_v53, 4  ;;  %v8195_v27 = vor.u32 %v8194_v34, %v14233_v47  ;;  %v8257_v31 = vor.u32 %v8256_v3, %v8253_v8  ;;  %v14279_v34 = vld [vmem:[%s14516_s4] ss:$0 sm:$0xff] }
 0x54e   : > { %v8270_v23 = vshll.u32 %v9498_v43, 16  ;;  %v14249_v17 = vunpack.c.l.bf16 %v8177_v55  ;;  %v8233_v26 = vor.u32 %v8232_v28, %v8229_v42  ;;  %v8246_v7 = vshll.u32 %v9495_v0, 16 }
 0x54f   : > { %v8267_v20 = vor.u32 %v8266_v56, %v8262_v54  ;;  %v8243_v50 = vor.u32 %v8242_v57, %v14240_v13  ;;  %v8302_v2 = vshll.u32 %v9502_v48, 16  ;;  %v8153_v40 = vsel %vm11750_vm2, %v8148_v33, %v14215_v35 }
 0x550   : > { %v8215_v41 = vsel %vm11750_vm2, %v8210_v60, %v14222_v30  ;;  %v8186_v29 = vrot.slane %v8185_v4, 4  ;;  %v8225_v44 = vsel %vm11750_vm2, %v8220_v49, %v8224_v52  ;;  %v8196_v10 = vrot.slane %v8195_v27, 4 }
 0x551   : > { %v8258_v39 = vrot.slane %v8257_v31, 4  ;;  %v8272_v6 = vrot.slane %v8270_v23, 5  ;;  %v8234_v62 = vrot.slane %v8233_v26, 4  ;;  %v8248_v22 = vrot.slane %v8246_v7, 5  ;;  %v9508_v7 = vld [vmem:[%s11679_s29 + $0x90] sm:$0xf] }
 0x552   : > { %v8275_v19 = vshrl.u32 %v9499_v11, 16  ;;  %v8278_v1 = vshll.u32 %v9499_v11, 16  ;;  %v8268_v45 = vrot.slane %v8267_v20, 4  ;;  %v8244_v35 = vrot.slane %v8243_v50, 4 }
 0x553   : > { %v8304_v12 = vrot.slane %v8302_v2, 5  ;;  %v14264_v30 = vunpack.c.l.bf16 %v8153_v40  ;;  %v14266_v16 = vunpack.c.l.bf16 %v8215_v41  ;;  %v8191_v53 = vsel %vm11750_vm2, %v8186_v29, %v14233_v47  ;;  %v9501_v40 = vld [vmem:[%s11679_s29 + $0x74] sm:$0x1] }
 0x554   : > { %v8201_v14 = vsel %vm11750_vm2, %v8196_v10, %v8200_v37  ;;  %v8263_v36 = vsel %vm11750_vm2, %v8258_v39, %v8262_v54  ;;  %v8312_v58 = vshrl.u32 %v9503_v61, 16  ;;  %v14281_v8 = vunpack.c.l.bf16 %v8225_v44  ;;  %v9505_v10 = vld [vmem:[%s11679_s29 + $0x84] sm:$0xf] }
 0x555   : > { %v8239_v47 = vsel %vm11750_vm2, %v8234_v62, %v14240_v13  ;;  %v8277_v3 = vrot.slane %v8275_v19, 4  ;;  %v8280_v55 = vrot.slane %v8278_v1, 5  ;;  %v14286_v33 = vunpack.c.l.bf16 %v8191_v53  ;;  %v9504_v13 = vld [vmem:[%s11679_s29 + $0x80] sm:$0x1] }
 0x556   : > { %v8273_v42 = vsel %vm11750_vm2, %v8268_v45, %v8272_v6  ;;  %v8249_v28 = vsel %vm11750_vm2, %v8244_v35, %v8248_v22  ;;  %v8305_v43 = vor.u32 %v8304_v12, %v8301_v32  ;;  %v14292_v56 = vunpack.c.l.bf16 %v8201_v14 }
 0x557   : > { %v14294_v0 = vunpack.c.l.bf16 %v8263_v36  ;;  %v8284_v57 = vshll.u32 %v9500_v18, 16  ;;  %v8288_v60 = vshrl.u32 %v9500_v18, 16  ;;  %v14299_v9 = vunpack.c.l.bf16 %v8239_v47 }
 0x558   : > { %v14301_v48 = vrot.slane %v8308_v59, 5  ;;  %v8314_v49 = vrot.slane %v8312_v58, 4  ;;  %v14304_v23 = vunpack.c.l.bf16 %v8273_v42  ;;  %v14306_v38 = vunpack.c.l.bf16 %v8249_v28 }
 0x559   : > { %v8281_v26 = vor.u32 %v8280_v55, %v8277_v3  ;;  %v8306_v2 = vrot.slane %v8305_v43, 4  ;;  %v8318_v11 = vshll.u32 %v9504_v13, 16  ;;  %v14319_v37 = vrot.slane %v8284_v57, 5  ;;  %v9506_v55 = vld [vmem:[%s11679_s29 + $0x88] sm:$0xf] }
 0x55a   : > { %v8290_v44 = vrot.slane %v8288_v60, 4  ;;  %v8315_v62 = vor.u32 %v8314_v49, %v14301_v48  ;;  %v8347_v22 = vshrl.u32 %v9508_v7, 16  ;;  %v8294_v35 = vshll.u32 %v9501_v40, 16 }
 0x55b   : > { %v8282_v1 = vrot.slane %v8281_v26, 4  ;;  %v8323_v12 = vshrl.u32 %v9505_v10, 16  ;;  %v14331_v36 = vrot.slane %v8318_v11, 5  ;;  %v8326_v59 = vshll.u32 %v9505_v10, 16 }
 0x55c   : > { %v14335_v18 = vrot.slane %v8315_v62, 4  ;;  %v8291_v47 = vor.u32 %v8290_v44, %v14319_v37  ;;  %v8332_v26 = vshll.u32 %v9506_v55, 16  ;;  %v9514_v44 = vld [vmem:[%s11679_s29 + $0xa8] sm:$0xf]  ;;  %v9507_v62 = vld [vmem:[%s11679_s29 + $0x8c] sm:$0x1] }
 0x55d   : > { %v8287_v43 = vsel %vm11750_vm2, %v8282_v1, %v14319_v37 }
 0x55e   : > { %v8292_v40 = vrot.slane %v8291_v47, 4  ;;  %v8321_v37 = vsel %vm11750_vm2, %v14335_v18, %v14331_v36 }
 0x5e6   : > { %v10792_v54 = vpop.f32.mrb[0].mxu1 }
 0x5e7   : > { %v10854_v4 = vadd.f32 %v10792_v54, %v14279_v34  ;;  %v7875_v52 = vpop.f32.mrb[1].mxu1  ;;  %v8349_v54 = vrot.slane %v8347_v22, 4 }
 0x5e8   : > { %v10855_v27 = vadd.f32 %v14279_v34, %v7875_v52  ;;  %v10793_v31 = vpop.f32.mrb[2].mxu1 }
 0x5e9   : > { %v8532_v20 = vadd.f32 %v10854_v4, %v14203_v24  ;;  %v10856_v50 = vadd.f32 %v10793_v31, %v14279_v34  ;;  %v7878_v46 = vpop.f32.mrb[3].mxu1  ;;  %v9509_v24 = vld [vmem:[%s11679_s29 + $0x94] sm:$0xf]  ;;  %v8328_v31 = vrot.slane %v8326_v59, 5 }
 0x5ea   : > { %v8530_v41 = vadd.f32 %v10855_v27, %v14205_v63  ;;  %v10857_v29 = vadd.f32 %v14279_v34, %v7878_v46  ;;  %v8350_v63 = vshll.u32 %v9508_v7, 16  ;;  %v8356_v32 = vshll.u32 %v9509_v24, 16 }
 0x5eb   : > { %v8564_v39 = vmax.f32 %v8532_v20, 0.0  ;;  %v8533_v6 = vadd.f32 %v10856_v50, %v14210_v15  ;;  %v8311_v15 = vsel %vm11750_vm2, %v8306_v2, %v14301_v48  ;;  %v8360_v3 = vshrl.u32 %v9509_v24, 16 }
 0x5ec   : > { %v8562_v61 = vmax.f32 %v8530_v41, 0.0  ;;  %v8531_v19 = vadd.f32 %v10857_v29, %v14225_v25  ;;  %v8352_v57 = vrot.slane %v8350_v63, 5  ;;  %v14346_v52 = vrot.slane %v8356_v32, 5 }
 0x5ed   : > { %8596 = vst [vmem:[%s14315_s7 + $0x10] sm:$0xff] %v8564_v39  ;;  %v8565_v45 = vmax.f32 %v8533_v6, 0.0  ;;  %v8325_v48 = vrot.slane %v8323_v12, 4  ;;  %v8336_v50 = vshrl.u32 %v9506_v55, 16  ;;  %v8362_v46 = vrot.slane %v8360_v3, 4 }
 0x5ee   : > { %8594 = vst [vmem:[%s14315_s7] sm:$0xff] %v8562_v61  ;;  %v8563_v53 = vmax.f32 %v8531_v19, 0.0  ;;  %v10796_v14 = vpop.f32.mrb[4].mxu1  ;;  %v8296_v41 = vrot.slane %v8294_v35, 5  ;;  %v14354_v29 = vunpack.c.l.bf16 %v8311_v15  ;;  %v14362_v39 = vunpack.c.l.bf16 %v8287_v43  ;;  %v9515_v43 = vld [vmem:[%s11679_s29 + $0xac] sm:$0xf] }
 0x5ef   : > { %8597 = vst [vmem:[%s14315_s7 + $0x18] sm:$0xff] %v8565_v45  ;;  %v10858_v25 = vadd.f32 %v10796_v14, %v14279_v34  ;;  %v7891_v58 = vpop.f32.mrb[5].mxu1  ;;  %v14367_v19 = vrot.slane %v8332_v26, 5  ;;  %v8363_v1 = vor.u32 %v8362_v46, %v14346_v52  ;;  %v8338_v63 = vrot.slane %v8336_v50, 4 }
 0x5f0   : > { %8595 = vst [vmem:[%s14315_s7 + $0x8] sm:$0xff] %v8563_v53  ;;  %v10859_v42 = vadd.f32 %v14279_v34, %v7891_v58  ;;  %v10797_v28 = vpop.f32.mrb[6].mxu1  ;;  %v8297_v32 = vsel %vm11750_vm2, %v8292_v40, %v8296_v41  ;;  %v8395_v12 = vshrl.u32 %v9514_v44, 16  ;;  %v8398_v53 = vshll.u32 %v9514_v44, 16 }
 0x5f1   : > { %v8536_v60 = vadd.f32 %v10858_v25, %v14231_v51  ;;  %v10860_v13 = vadd.f32 %v10797_v28, %v14279_v34  ;;  %v7894_v4 = vpop.f32.mrb[7].mxu1  ;;  %v9510_v51 = vld [vmem:[%s11679_s29 + $0x98] sm:$0x1]  ;;  %v8342_v25 = vshll.u32 %v9507_v62, 16  ;;  %v8339_v28 = vor.u32 %v8338_v63, %v14367_v19 }
 0x5f2   : > { %v8534_v49 = vadd.f32 %v10859_v42, %v14262_v21  ;;  %v10861_v27 = vadd.f32 %v14279_v34, %v7894_v4  ;;  %v8366_v6 = vshll.u32 %v9510_v51, 16  ;;  %v14385_v42 = vrot.slane %v8363_v1, 4 }
 0x5f3   : > { %v8568_v7 = vmax.f32 %v8536_v60, 0.0  ;;  %v8537_v20 = vadd.f32 %v10860_v13, %v14249_v17  ;;  %v8353_v17 = vor.u32 %v8352_v57, %v8349_v54  ;;  %v9511_v54 = vld [vmem:[%s11679_s29 + $0x9c] sm:$0xf]  ;;  %v8397_v60 = vrot.slane %v8395_v12, 4 }
 0x5f4   : > { %v8566_v2 = vmax.f32 %v8534_v49, 0.0  ;;  %v8535_v11 = vadd.f32 %v10861_v27, %v14264_v30  ;;  %v8329_v30 = vor.u32 %v8328_v31, %v8325_v48  ;;  %v14382_v3 = vrot.slane %v8366_v6, 5  ;;  %v9512_v27 = vld [vmem:[%s11679_s29 + $0xa0] sm:$0xf]  ;;  %v9516_v6 = vld [vmem:[%s11679_s29 + $0xb0] sm:$0x1] }
 0x5f5   : > { %8600 = vst [vmem:[%s14315_s7 + $0x30] sm:$0xff] %v8568_v7  ;;  %v8569_v21 = vmax.f32 %v8537_v20, 0.0  ;;  %v14376_v59 = vrot.slane %v8353_v17, 4  ;;  %v8400_v13 = vrot.slane %v8398_v53, 5  ;;  %v14392_v48 = vunpack.c.l.bf16 %v8321_v37 }
 0x5f6   : > { %8598 = vst [vmem:[%s14315_s7 + $0x20] sm:$0xff] %v8566_v2  ;;  %v8567_v24 = vmax.f32 %v8535_v11, 0.0  ;;  %v10800_v10 = vpop.f32.mrb[8].mxu1  ;;  %v14380_v47 = vrot.slane %v8329_v30, 4  ;;  %v14394_v49 = vunpack.c.l.bf16 %v8297_v32  ;;  %v8344_v7 = vrot.slane %v8342_v25, 5 }
 0x5f7   : > { %8601 = vst [vmem:[%s14315_s7 + $0x38] sm:$0xff] %v8569_v21  ;;  %v10862_v22 = vadd.f32 %v10800_v10, %v14279_v34  ;;  %v7907_v61 = vpop.f32.mrb[9].mxu1  ;;  %v8371_v20 = vshrl.u32 %v9511_v54, 16  ;;  %v8340_v2 = vrot.slane %v8339_v28, 4  ;;  %v8374_v11 = vshll.u32 %v9511_v54, 16 }
 0x5f8   : > { %8599 = vst [vmem:[%s14315_s7 + $0x28] sm:$0xff] %v8567_v24  ;;  %v10863_v45 = vadd.f32 %v14279_v34, %v7907_v61  ;;  %v10801_v35 = vpop.f32.mrb[10].mxu1  ;;  %v8335_v46 = vsel %vm11750_vm2, %v14380_v47, %v14367_v19  ;;  %v8369_v41 = vsel %vm11750_vm2, %v14385_v42, %v14382_v3  ;;  %v8401_v21 = vor.u32 %v8400_v13, %v8397_v60  ;;  %v9520_v25 = vld [vmem:[%s11679_s29 + $0xc0] sm:$0xf]  ;;  %v9517_v13 = vld [vmem:[%s11679_s29 + $0xb4] sm:$0xf] }
 0x5f9   : > { %v8540_v14 = vadd.f32 %v10862_v22, %v14266_v16  ;;  %v10864_v15 = vadd.f32 %v10801_v35, %v14279_v34  ;;  %v7910_v36 = vpop.f32.mrb[11].mxu1  ;;  %v8408_v37 = vshrl.u32 %v9515_v43, 16  ;;  %v8380_v10 = vshll.u32 %v9512_v27, 16  ;;  %v9513_v35 = vld [vmem:[%s11679_s29 + $0xa4] sm:$0x1] }
 0x5fa   : > { %v8538_v58 = vadd.f32 %v10863_v45, %v14286_v33  ;;  %v10865_v18 = vadd.f32 %v14279_v34, %v7910_v36  ;;  %v8384_v30 = vshrl.u32 %v9512_v27, 16  ;;  %v8373_v19 = vrot.slane %v8371_v20, 4 }
 0x5fb   : > { %v8572_v55 = vmax.f32 %v8540_v14, 0.0  ;;  %v8541_v16 = vadd.f32 %v10864_v15, %v14281_v8  ;;  %v8359_v8 = vsel %vm11750_vm2, %v14376_v59, %v14346_v52  ;;  %v8376_v45 = vrot.slane %v8374_v11, 5 }
 0x5fc   : > { %v8570_v57 = vmax.f32 %v8538_v58, 0.0  ;;  %v8539_v33 = vadd.f32 %v10865_v18, %v14292_v56  ;;  %v8404_v56 = vshll.u32 %v9515_v43, 16  ;;  %v8414_v53 = vshll.u32 %v9516_v6, 16 }
 0x5fd   : > { %8604 = vst [vmem:[%s14315_s7 + $0x50] sm:$0xff] %v8572_v55  ;;  %v8573_v4 = vmax.f32 %v8541_v16, 0.0  ;;  %v8402_v15 = vrot.slane %v8401_v21, 4  ;;  %v14427_v36 = vrot.slane %v8380_v10, 5  ;;  %v8386_v59 = vrot.slane %v8384_v30, 4 }
 0x5fe   : > { %8602 = vst [vmem:[%s14315_s7 + $0x40] sm:$0xff] %v8570_v57  ;;  %v8571_v31 = vmax.f32 %v8539_v33, 0.0  ;;  %v10804_v26 = vpop.f32.mrb[12].mxu1  ;;  %v14419_v61 = vrot.slane %v8404_v56, 5  ;;  %v8520_v18 = vunpack.c.l.bf16 %v8359_v8  ;;  %v14431_v47 = vunpack.c.l.bf16 %v8335_v46 }
 0x5ff   : > { %8605 = vst [vmem:[%s14315_s7 + $0x58] sm:$0xff] %v8573_v4  ;;  %v10866_v50 = vadd.f32 %v10804_v26, %v14279_v34  ;;  %v7923_v51 = vpop.f32.mrb[13].mxu1  ;;  %v8390_v3 = vshll.u32 %v9513_v35, 16  ;;  %v14435_v16 = vunpack.c.l.bf16 %v8369_v41  ;;  %v8377_v28 = vor.u32 %v8376_v45, %v8373_v19 }
 0x600   : > { %8603 = vst [vmem:[%s14315_s7 + $0x48] sm:$0xff] %v8571_v31  ;;  %v10867_v52 = vadd.f32 %v14279_v34, %v7923_v51  ;;  %v10805_v40 = vpop.f32.mrb[14].mxu1  ;;  %v14442_v33 = vrot.slane %v8414_v53, 5  ;;  %v8443_v60 = vshrl.u32 %v9520_v25, 16  ;;  %v8407_v31 = vsel %vm11750_vm2, %v8402_v15, %v14419_v61  ;;  %v9522_v15 = vld [vmem:[%s11679_s29 + $0xc8] sm:$0x1] }
 0x601   : > { %v8544_v17 = vadd.f32 %v10866_v50, %v14294_v0  ;;  %v10868_v44 = vadd.f32 %v10805_v40, %v14279_v34  ;;  %v7926_v24 = vpop.f32.mrb[15].mxu1  ;;  %v8345_v0 = vsel %vm11750_vm2, %v8340_v2, %v8344_v7  ;;  %v8387_v26 = vor.u32 %v8386_v59, %v14427_v36  ;;  %v9521_v7 = vld [vmem:[%s11679_s29 + $0xc4] sm:$0xf] }
 0x602   : > { %v8542_v62 = vadd.f32 %v10867_v52, %v14299_v9  ;;  %v10869_v22 = vadd.f32 %v14279_v34, %v7926_v24  ;;  %v8410_v9 = vrot.slane %v8408_v37, 4  ;;  %v14437_v42 = vunpack.c.l.bf16 %v8345_v0 }
 0x603   : > { %v8576_v1 = vmax.f32 %v8544_v17, 0.0  ;;  %v8545_v63 = vadd.f32 %v10868_v44, %v14304_v23  ;;  %v14454_v50 = vrot.slane %v8390_v3, 5  ;;  %v8446_v51 = vshll.u32 %v9520_v25, 16 }
 0x604   : > { %v8574_v32 = vmax.f32 %v8542_v62, 0.0  ;;  %v8543_v12 = vadd.f32 %v10869_v22, %v14306_v38  ;;  %v8411_v57 = vor.u32 %v8410_v9, %v14419_v61  ;;  %v8419_v11 = vshrl.u32 %v9517_v13, 16 }
 0x605   : > { %8608 = vst [vmem:[%s14315_s7 + $0x70] sm:$0xff] %v8576_v1  ;;  %v8577_v14 = vmax.f32 %v8545_v63, 0.0  ;;  %v8422_v52 = vshll.u32 %v9517_v13, 16  ;;  %v8452_v21 = vshll.u32 %v9521_v7, 16  ;;  %v8456_v37 = vshrl.u32 %v9521_v7, 16 }
 0x606   : > { %8606 = vst [vmem:[%s14315_s7 + $0x60] sm:$0xff] %v8574_v32  ;;  %v8575_v23 = vmax.f32 %v8543_v12, 0.0  ;;  %v10808_v58 = vpop.f32.mrb[16].mxu1  ;;  %v8524_v17 = vunpack.c.l.bf16 %v8407_v31  ;;  %v8378_v6 = vrot.slane %v8377_v28, 4  ;;  %v8445_v62 = vrot.slane %v8443_v60, 4 }
 0x607   : > { %8609 = vst [vmem:[%s14315_s7 + $0x78] sm:$0xff] %v8577_v14  ;;  %v10870_v38 = vadd.f32 %v10808_v58, %v14279_v34  ;;  %v7939_v55 = vpop.f32.mrb[17].mxu1  ;;  %v8421_v19 = vrot.slane %v8419_v11, 4  ;;  %v8424_v1 = vrot.slane %v8422_v52, 5  ;;  %v8388_v45 = vrot.slane %v8387_v26, 4 }
 0x608   : > { %8607 = vst [vmem:[%s14315_s7 + $0x68] sm:$0xff] %v8575_v23  ;;  %v10871_v43 = vadd.f32 %v14279_v34, %v7939_v55  ;;  %v10809_v54 = vpop.f32.mrb[18].mxu1  ;;  %v8454_v35 = vrot.slane %v8452_v21, 5  ;;  %v8458_v32 = vrot.slane %v8456_v37, 4  ;;  %v8383_v58 = vsel %vm11750_vm2, %v8378_v6, %v14427_v36 }
 0x609   : > { %v8548_v4 = vadd.f32 %v10870_v38, %v14354_v29  ;;  %v10872_v8 = vadd.f32 %v10809_v54, %v14279_v34  ;;  %v7942_v27 = vpop.f32.mrb[19].mxu1  ;;  %v9518_v29 = vld [vmem:[%s11679_s29 + $0xb8] sm:$0xf]  ;;  %v9519_v38 = vld [vmem:[%s11679_s29 + $0xbc] sm:$0x1]  ;;  %v8462_v60 = vshll.u32 %v9522_v15, 16  ;;  %v8393_v13 = vsel %vm11750_vm2, %v8388_v45, %v14454_v50 }
 0x60a   : > { %v8546_v56 = vadd.f32 %v10871_v43, %v14362_v39  ;;  %v10873_v20 = vadd.f32 %v14279_v34, %v7942_v27  ;;  %v8428_v44 = vshll.u32 %v9518_v29, 16  ;;  %v8432_v24 = vshrl.u32 %v9518_v29, 16 }
 0x60b   : > { %v8580_v46 = vmax.f32 %v8548_v4, 0.0  ;;  %v8549_v2 = vadd.f32 %v10872_v8, %v14392_v48  ;;  %v8448_v48 = vrot.slane %v8446_v51, 5  ;;  %v8425_v43 = vor.u32 %v8424_v1, %v8421_v19 }
 0x60c   : > { %v8578_v40 = vmax.f32 %v8546_v56, 0.0  ;;  %v8547_v41 = vadd.f32 %v10873_v20, %v14394_v49  ;;  %v8412_v49 = vrot.slane %v8411_v57, 4  ;;  %v8430_v14 = vrot.slane %v8428_v44, 5 }
 0x60d   : > { %8612 = vst [vmem:[%s14315_s7 + $0x90] sm:$0xff] %v8580_v46  ;;  %v8581_v39 = vmax.f32 %v8549_v2, 0.0  ;;  %v8434_v59 = vrot.slane %v8432_v24, 4  ;;  %v8449_v3 = vor.u32 %v8448_v48, %v8445_v62  ;;  %v8459_v57 = vor.u32 %v8458_v32, %v8454_v35 }
 0x60e   : > { %8610 = vst [vmem:[%s14315_s7 + $0x80] sm:$0xff] %v8578_v40  ;;  %v8579_v10 = vmax.f32 %v8547_v41, 0.0  ;;  %v10812_v30 = vpop.f32.mrb[20].mxu1  ;;  %v8417_v28 = vsel %vm11750_vm2, %v8412_v49, %v14442_v33  ;;  %v8522_v33 = vunpack.c.l.bf16 %v8383_v58  ;;  %v8426_v56 = vrot.slane %v8425_v43, 4 }
 0x60f   : > { %8613 = vst [vmem:[%s14315_s7 + $0x98] sm:$0xff] %v8581_v39  ;;  %v10874_v22 = vadd.f32 %v10812_v30, %v14279_v34  ;;  %v7955_v61 = vpop.f32.mrb[21].mxu1  ;;  %v8435_v4 = vor.u32 %v8434_v59, %v8430_v14  ;;  %v8450_v31 = vrot.slane %v8449_v3, 4  ;;  %v8525_v7 = vunpack.c.l.bf16 %v8417_v28 }
 0x610   : > { %8611 = vst [vmem:[%s14315_s7 + $0x88] sm:$0xff] %v8579_v10  ;;  %v10875_v63 = vadd.f32 %v14279_v34, %v7955_v61  ;;  %v10813_v0 = vpop.f32.mrb[22].mxu1  ;;  %v8523_v29 = vunpack.c.l.bf16 %v8393_v13  ;;  %v8460_v46 = vrot.slane %v8459_v57, 4  ;;  %v8464_v50 = vrot.slane %v8462_v60, 5 }
 0x611   : > { %v8552_v12 = vadd.f32 %v10874_v22, %v8520_v18  ;;  %v10876_v9 = vadd.f32 %v10813_v0, %v14279_v34  ;;  %v7958_v53 = vpop.f32.mrb[23].mxu1  ;;  %v8436_v40 = vrot.slane %v8435_v4, 4  ;;  %v8455_v39 = vsel %vm11750_vm2, %v8450_v31, %v8454_v35 }
 0x612   : > { %v8550_v25 = vadd.f32 %v10875_v63, %v14431_v47  ;;  %v10877_v23 = vadd.f32 %v14279_v34, %v7958_v53  ;;  %v8431_v10 = vsel %vm11750_vm2, %v8426_v56, %v8430_v14  ;;  %v8465_v6 = vsel %vm11750_vm2, %v8460_v46, %v8464_v50 }
 0x613   : > { %v8584_v55 = vmax.f32 %v8552_v12, 0.0  ;;  %v8553_v18 = vadd.f32 %v10876_v9, %v14435_v16  ;;  %v8438_v16 = vshll.u32 %v9519_v38, 16  ;;  %v8528_v48 = vunpack.c.l.bf16 %v8455_v39 }
 0x614   : > { %v8582_v54 = vmax.f32 %v8550_v25, 0.0  ;;  %v8551_v47 = vadd.f32 %v10877_v23, %v14437_v42  ;;  %v8526_v19 = vunpack.c.l.bf16 %v8431_v10  ;;  %v8529_v0 = vunpack.c.l.bf16 %v8465_v6 }
 0x615   : > { %8616 = vst [vmem:[%s14315_s7 + $0xb0] sm:$0xff] %v8584_v55  ;;  %v8585_v36 = vmax.f32 %v8553_v18, 0.0  ;;  %v8440_v41 = vrot.slane %v8438_v16, 5 }
 0x616   : > { %8614 = vst [vmem:[%s14315_s7 + $0xa0] sm:$0xff] %v8582_v54  ;;  %v8583_v8 = vmax.f32 %v8551_v47, 0.0  ;;  %v10816_v27 = vpop.f32.mrb[24].mxu1 }
 0x617   : > { %8617 = vst [vmem:[%s14315_s7 + $0xb8] sm:$0xff] %v8585_v36  ;;  %v10878_v26 = vadd.f32 %v10816_v27, %v14279_v34  ;;  %v7971_v42 = vpop.f32.mrb[25].mxu1  ;;  %v8441_v22 = vsel %vm11750_vm2, %v8436_v40, %v8440_v41 }
 0x618   : > { %8615 = vst [vmem:[%s14315_s7 + $0xa8] sm:$0xff] %v8583_v8  ;;  %v10879_v20 = vadd.f32 %v14279_v34, %v7971_v42  ;;  %v10817_v51 = vpop.f32.mrb[26].mxu1  ;;  %v8527_v32 = vunpack.c.l.bf16 %v8441_v22 }
 0x619   : > { %v8556_v2 = vadd.f32 %v10878_v26, %v8524_v17  ;;  %v10880_v11 = vadd.f32 %v10817_v51, %v14279_v34  ;;  %v7974_v52 = vpop.f32.mrb[27].mxu1 }
 0x61a   : > { %v8554_v21 = vadd.f32 %v10879_v20, %v8522_v33  ;;  %v10881_v37 = vadd.f32 %v14279_v34, %v7974_v52 }
 0x61b   : > { %v8588_v44 = vmax.f32 %v8556_v2, 0.0  ;;  %v8557_v24 = vadd.f32 %v10880_v11, %v8525_v7 }
 0x61c   : > { %v8586_v17 = vmax.f32 %v8554_v21, 0.0  ;;  %v8555_v30 = vadd.f32 %v10881_v37, %v8523_v29 }
 0x61d   : > { %8620 = vst [vmem:[%s14315_s7 + $0xd0] sm:$0xff] %v8588_v44  ;;  %v8589_v62 = vmax.f32 %v8557_v24, 0.0 }
 0x61e   : > { %8618 = vst [vmem:[%s14315_s7 + $0xc0] sm:$0xff] %v8586_v17  ;;  %v8587_v61 = vmax.f32 %v8555_v30, 0.0  ;;  %v10820_v49 = vpop.f32.mrb[28].mxu1 }
 0x61f   : > { %8621 = vst [vmem:[%s14315_s7 + $0xd8] sm:$0xff] %v8589_v62  ;;  %v10882_v1 = vadd.f32 %v10820_v49, %v14279_v34  ;;  %v7987_v63 = vpop.f32.mrb[29].mxu1 }
 0x620   : > { %8619 = vst [vmem:[%s14315_s7 + $0xc8] sm:$0xff] %v8587_v61  ;;  %v10883_v45 = vadd.f32 %v14279_v34, %v7987_v63  ;;  %v10821_v35 = vpop.f32.mrb[30].mxu1 }
 0x621   : > { %v8560_v5 = vadd.f32 %v10882_v1, %v8528_v48  ;;  %v10884_v12 = vadd.f32 %v10821_v35, %v14279_v34  ;;  %v7990_v9 = vpop.f32.mrb[31].mxu1 }
 0x622   : > { %v8558_v53 = vadd.f32 %v10883_v45, %v8526_v19  ;;  %v10885_v14 = vadd.f32 %v14279_v34, %v7990_v9 }
 0x623   : > { %v8592_v15 = vmax.f32 %v8560_v5, 0.0  ;;  %v8561_v59 = vadd.f32 %v10884_v12, %v8529_v0 }
 0x624   : > { %v8590_v25 = vmax.f32 %v8558_v53, 0.0  ;;  %v8559_v23 = vadd.f32 %v10885_v14, %v8527_v32 }
 0x625   : > { %8624 = vst [vmem:[%s14315_s7 + $0xf0] sm:$0xff] %v8592_v15  ;;  %v8593_v58 = vmax.f32 %v8561_v59, 0.0 }
 0x626   : > { %8622 = vst [vmem:[%s14315_s7 + $0xe0] sm:$0xff] %v8590_v25  ;;  %v8591_v3 = vmax.f32 %v8559_v23, 0.0 }
 0x627   : > { %8625 = vst [vmem:[%s14315_s7 + $0xf8] sm:$0xff] %v8593_v58 }
 0x628   : > { %8623 = vst [vmem:[%s14315_s7 + $0xe8] sm:$0xff] %v8591_v3 }
 0x629 PF: > { %s15_s18 = sadd.s32 1, %s11622_s18  }
 0x62a   : > { %p12_p4 = scmp.ge.s32.totalorder %s15_s18, 4  }
 0x62c   :  { %14 = sbr.rel (!%p12_p4) target bundleno = 1 (0x1), region = 90 }

</bundles_post_ra>
